<compile_context>
chip_gen: v7x
topology: tpu7x:2x2x1
jax: 0.10.0
libtpu: 0.0.40
codegen_flags: <defaults>
</compile_context>

<pallas_src>
import functools

import jax
import jax.numpy as jnp
from jax.experimental import pallas as pl
from jax.experimental.pallas import tpu as pltpu

LEAKY_ALPHA = 0.2  # GraphAttentionLayer alpha (LeakyReLU slope)


# ---------------------------------------------------------------------------
# Pallas kernel (entire forward pass, single invocation)
# ---------------------------------------------------------------------------
def _elu(x):
    # exp only evaluated on the non-positive branch -> no inf for large positive x
    return jnp.where(x > 0, x, jnp.exp(jnp.minimum(x, 0.0)) - 1.0)


def _masked_softmax_lastdim(e, mask):
    """LeakyReLU'd logits -> masked softmax along the last axis (f32 throughout)."""
    e = jnp.where(mask, e, jnp.float32(-9e15))
    e = e - jnp.max(e, axis=-1, keepdims=True)
    p = jnp.exp(e)
    inv = pl.reciprocal(jnp.sum(p, axis=-1, keepdims=True), approx=True)  # EUP slot
    return p * inv


def _gat_fused_kernel(x_ref, adj_ref, w1_ref, w2_ref,
                      fc1w_ref, fc1b_ref, fc2w_ref, fc2b_ref,
                      out_ref, *, nheads, nhid):
    """Full GAT forward.

    x_ref    : (N, F_in)               f32
    adj_ref  : (N, N)                  f32
    w1_ref   : (F_in, H*nhid + 2H)     bf16  [head-concat W | folded a1 | folded a2]
    w2_ref   : (H*nhid, nhid + 2)      bf16  [W_out | folded a1 | folded a2]
    fc1w_ref : (nhid, 200)             bf16
    fc1b_ref : (1, 200)                f32
    fc2w_ref : (200, 128)              bf16  (zero-padded beyond nclass)
    fc2b_ref : (1, 128)                f32   (zero-padded beyond nclass)
    out_ref  : (N, 128)                f32   (lane-dense; caller slices [:, :nclass])
    """
    H, D = nheads, nhid
    HD = H * D

    x = x_ref[...].astype(jnp.bfloat16)          # MXU operand in bf16
    mask = adj_ref[...] > 0                      # (N, N) bool

    # ---- layer 1: single fused projection for all heads + attention vectors ----
    proj1 = jnp.dot(x, w1_ref[...], preferred_element_type=jnp.float32)  # (N, HD+2H) f32
    wh = proj1[:, :HD]                           # (N, H*nhid)  concat layout already
    f12t = proj1[:, HD:].T                       # ONE small (N,2H)->(2H,N) transpose
    f1t = f12t[:H]                               # (H, N)
    f2t = f12t[H:]                               # (H, N)

    # all-head attention logits + masked softmax in one vectorized pass
    e = f1t[:, :, None] + f2t[:, None, :]        # (H, N, N)
    e = jnp.where(e > 0, e, LEAKY_ALPHA * e)     # LeakyReLU (f32, VPU)
    att = _masked_softmax_lastdim(e, mask[None, :, :])   # (H, N, N) f32

    att_bf = att.astype(jnp.bfloat16)
    wh_bf = wh.astype(jnp.bfloat16)
    head_outs = [
        jnp.dot(att_bf[h], wh_bf[:, h * D:(h + 1) * D],
                preferred_element_type=jnp.float32)       # (N, nhid)
        for h in range(H)                                  # H small, static unroll
    ]
    # torch.cat(..., dim=1) layout, then per-head ELU (concat=True)
    h1 = _elu(jnp.concatenate(head_outs, axis=1))          # (N, H*nhid) f32
    # dropout: identity at inference

    # ---- layer 2: out_att (concat=False -> no ELU), single fused projection ----
    h1_bf = h1.astype(jnp.bfloat16)
    proj2 = jnp.dot(h1_bf, w2_ref[...], preferred_element_type=jnp.float32)  # (N, D+2)
    wh2 = proj2[:, :D]                           # (N, nhid)
    g1 = proj2[:, D:D + 1]                       # (N, 1)
    g2 = proj2[:, D + 1:D + 2]                   # (N, 1)
    e2 = g1 + g2.T                               # one tiny (N,1)->(1,N) transpose
    e2 = jnp.where(e2 > 0, e2, LEAKY_ALPHA * e2)
    att2 = _masked_softmax_lastdim(e2, mask)     # (N, N)
    h2 = jnp.dot(att2.astype(jnp.bfloat16), wh2.astype(jnp.bfloat16),
                 preferred_element_type=jnp.float32)       # (N, nhid)

    # ---- classifier head: fc2(elu(fc1(h2))) -- lane-dense padded output ----
    z1 = _elu(jnp.dot(h2.astype(jnp.bfloat16), fc1w_ref[...],
                      preferred_element_type=jnp.float32) + fc1b_ref[...])
    out_ref[...] = (jnp.dot(z1.astype(jnp.bfloat16), fc2w_ref[...],
                            preferred_element_type=jnp.float32) + fc2b_ref[...])


# ---------------------------------------------------------------------------
# One-time parameter preparation (folding + bf16 cast + lane padding)
# ---------------------------------------------------------------------------
def prepare_params(params, *, out_pad_to=128):
    """Fold attention vectors into projection weights, cast MXU weights to bf16,
    and pad the classifier output to a lane-dense width. Run ONCE, outside the
    per-call jit path."""
    W_heads = params["W_heads"]                   # (H, F_in, nhid)
    a1 = params["a1_heads"][:, 0, :]              # (H, nhid)
    a2 = params["a2_heads"][:, 0, :]              # (H, nhid)
    H, f_in, nhid = W_heads.shape

    # layer 1: [head-concat W | per-head W@a1 | per-head W@a2]
    w1_proj = jnp.transpose(W_heads, (1, 0, 2)).reshape(f_in, H * nhid)   # (F_in, H*nhid)
    wa1 = jnp.einsum("hif,hf->ih", W_heads, a1)                           # (F_in, H)
    wb1 = jnp.einsum("hif,hf->ih", W_heads, a2)                           # (F_in, H)
    w1 = jnp.concatenate([w1_proj, wa1, wb1], axis=1).astype(jnp.bfloat16)

    # layer 2: [W_out | W_out@a1_out | W_out@a2_out]
    w2p = params["W_out"][0]                                              # (H*nhid, nhid)
    wa2 = w2p @ params["a1_out"][0].T                                     # (H*nhid, 1)
    wb2 = w2p @ params["a2_out"][0].T                                     # (H*nhid, 1)
    w2 = jnp.concatenate([w2p, wa2, wb2], axis=1).astype(jnp.bfloat16)

    nclass = params["fc2_w"].shape[1]
    pad = (-nclass) % out_pad_to
    fc2w = jnp.pad(params["fc2_w"], ((0, 0), (0, pad))).astype(jnp.bfloat16)
    fc2b = jnp.pad(params["fc2_b"], ((0, 0), (0, pad))).astype(jnp.float32)

    prep = {
        "w1": w1,
        "w2": w2,
        "fc1w": params["fc1_w"].astype(jnp.bfloat16),
        "fc1b": params["fc1_b"].astype(jnp.float32),
        "fc2w": fc2w,
        "fc2b": fc2b,
    }
    meta = dict(nheads=int(H), nhid=int(nhid), nclass=int(nclass))
    return prep, meta


# ---------------------------------------------------------------------------
# Wrapper
# ---------------------------------------------------------------------------
def _full_spec(shape):
    zeros = (0,) * len(shape)
    return pl.BlockSpec(shape, lambda i, _z=zeros: _z)


@functools.partial(jax.jit, static_argnames=("nheads", "nhid", "nclass"))
def gat_forward(x, adj, prep, *, nheads, nhid, nclass):
    n, f_in = x.shape
    out_cols = prep["fc2w"].shape[1]              # lane-dense (padded) output width

    kernel = functools.partial(_gat_fused_kernel, nheads=nheads, nhid=nhid)
    out_padded = pl.pallas_call(
        kernel,
        out_shape=jax.ShapeDtypeStruct((n, out_cols), jnp.float32),
        grid=(1,),
        in_specs=[
            _full_spec((n, f_in)),
            _full_spec((n, n)),
            _full_spec(prep["w1"].shape),
            _full_spec(prep["w2"].shape),
            _full_spec(prep["fc1w"].shape),
            _full_spec(prep["fc1b"].shape),
            _full_spec(prep["fc2w"].shape),
            _full_spec(prep["fc2b"].shape),
        ],
        out_specs=_full_spec((n, out_cols)),
        # TODO(synk): single grid point -> one TC; for scaled-up N add a "parallel"
        #   query-row-tile axis so v7x's second TensorCore is used.
        compiler_params=pltpu.CompilerParams(dimension_semantics=("arbitrary",)),
    )(x, adj, prep["w1"], prep["w2"],
      prep["fc1w"], prep["fc1b"], prep["fc2w"], prep["fc2b"])

    return out_padded[:, :nclass]                 # drop lane padding outside the kernel


# ---------------------------------------------------------------------------
# Pure-JAX f32 reference (faithful to the PyTorch module) for a sanity check
# ---------------------------------------------------------------------------
def _ref_head(x, adj, w, a1, a2, apply_elu):
    wh = x @ w
    e = (wh * a1).sum(1, keepdims=True) + ((wh * a2).sum(1, keepdims=True)).T
    e = jnp.where(e > 0, e, LEAKY_ALPHA * e)
    e = jnp.where(adj > 0, e, -9e15)
    att = jax.nn.softmax(e, axis=1)
    h = att @ wh
    return jnp.where(h > 0, h, jnp.exp(jnp.minimum(h, 0.0)) - 1.0) if apply_elu else h


def gat_forward_ref(x, adj, p):
    hs = [
        _ref_head(x, adj, p["W_heads"][h], p["a1_heads"][h], p["a2_heads"][h], True)
        for h in range(p["W_heads"].shape[0])
    ]
    h1 = jnp.concatenate(hs, axis=1)
    h2 = _ref_head(h1, adj, p["W_out"][0], p["a1_out"][0], p["a2_out"][0], False)
    z1 = h2 @ p["fc1_w"] + p["fc1_b"]
    z1 = jnp.where(z1 > 0, z1, jnp.exp(jnp.minimum(z1, 0.0)) - 1.0)
    return z1 @ p["fc2_w"] + p["fc2_b"]


# ---------------------------------------------------------------------------
# Parameter init + driver
# ---------------------------------------------------------------------------
def init_params(key, nfeat, nhid, nclass, nheads, fc_hidden=200):
    ks = jax.random.split(key, 10)

    def xavier(k, shape):
        fan_in, fan_out = shape[-2], shape[-1]
        lim = (6.0 / (fan_in + fan_out)) ** 0.5
        return jax.random.uniform(k, shape, jnp.float32, -lim, lim)

    return {
        # H heads of GraphAttentionLayer(nfeat, nhid)
        "W_heads": xavier(ks[0], (nheads, nfeat, nhid)),
        "a1_heads": xavier(ks[1], (nheads, 1, nhid)),
        "a2_heads": xavier(ks[2], (nheads, 1, nhid)),
        # out_att: GraphAttentionLayer(nhid*nheads, nhid), concat=False
        "W_out": xavier(ks[3], (1, nhid * nheads, nhid)),
        "a1_out": xavier(ks[4], (1, 1, nhid)),
        "a2_out": xavier(ks[5], (1, 1, nhid)),
        # fc1: Linear(nhid, 200), fc2: Linear(200, nclass) — stored transposed
        "fc1_w": xavier(ks[6], (nhid, fc_hidden)),
        "fc1_b": jax.random.uniform(ks[7], (1, fc_hidden), jnp.float32, -0.05, 0.05),
        "fc2_w": xavier(ks[8], (fc_hidden, nclass)),
        "fc2_b": jax.random.uniform(ks[9], (1, nclass), jnp.float32, -0.05, 0.05),
    }


if __name__ == "__main__":
    N, NFEAT, NHID, NCLASS, NHEADS = 64, 32, 16, 4, 8   # H*NHID = 128 (lane-dense)

    key = jax.random.PRNGKey(0)
    k_x, k_adj, k_p = jax.random.split(key, 3)

    x = jax.random.normal(k_x, (N, NFEAT), jnp.float32)
    # random dense adjacency with self-loops (so every softmax row has >=1 nonzero)
    adj = (jax.random.uniform(k_adj, (N, N)) > 0.7).astype(jnp.float32)
    adj = jnp.clip(adj + jnp.eye(N, dtype=jnp.float32), 0.0, 1.0)
    assert bool(jnp.all(adj.sum(axis=1) > 0)), "each node needs at least one neighbor"

    params = init_params(k_p, NFEAT, NHID, NCLASS, NHEADS)

    # one-time folding / bf16 casting / lane padding (outside the per-call jit path)
    prep, meta = prepare_params(params)

    out = jax.block_until_ready(gat_forward(x, adj, prep, **meta))
    assert out.shape == (N, NCLASS)

    # f32 reference; tolerance accounts for intentional bf16 MXU operands in the kernel
    ref = gat_forward_ref(x, adj, params)
    assert jnp.allclose(out, ref, rtol=5e-2, atol=5e-2), "mismatch vs JAX reference"

    # TODO(synk): F.dropout paths are identity here (inference mode); no RNG dropout in-kernel.
    print("KERNEL_OK")
</pallas_src>

<mosaic_0001>
module attributes {stable_mosaic.version = 11 : i64} {
  func.func @_gat_fused_kernel(%arg0: i32, %arg1: memref<64x32xf32, #tpu.memory_space<vmem>>, %arg2: memref<64x64xf32, #tpu.memory_space<vmem>>, %arg3: memref<32x144xbf16, #tpu.memory_space<vmem>>, %arg4: memref<128x18xbf16, #tpu.memory_space<vmem>>, %arg5: memref<16x200xbf16, #tpu.memory_space<vmem>>, %arg6: memref<1x200xf32, #tpu.memory_space<vmem>>, %arg7: memref<200x128xbf16, #tpu.memory_space<vmem>>, %arg8: memref<1x128xf32, #tpu.memory_space<vmem>>, %arg9: memref<64x128xf32, #tpu.memory_space<vmem>>) attributes {dimension_semantics = [#tpu.dimension_semantics<arbitrary>], iteration_bounds = array<i64: 1>, scalar_prefetch = 0 : i64, scratch_operands = 0 : i64, tpu.core_type = #tpu.core_type<tc>, window_params = [{pipeline_mode = #tpu.pipeline_mode<synchronous>, transform_indices = @transform_0, window_bounds = array<i64: 64, 32>}, {pipeline_mode = #tpu.pipeline_mode<synchronous>, transform_indices = @transform_1, window_bounds = array<i64: 64, 64>}, {pipeline_mode = #tpu.pipeline_mode<synchronous>, transform_indices = @transform_2, window_bounds = array<i64: 32, 144>}, {pipeline_mode = #tpu.pipeline_mode<synchronous>, transform_indices = @transform_3, window_bounds = array<i64: 128, 18>}, {pipeline_mode = #tpu.pipeline_mode<synchronous>, transform_indices = @transform_4, window_bounds = array<i64: 16, 200>}, {pipeline_mode = #tpu.pipeline_mode<synchronous>, transform_indices = @transform_5, window_bounds = array<i64: 1, 200>}, {pipeline_mode = #tpu.pipeline_mode<synchronous>, transform_indices = @transform_6, window_bounds = array<i64: 200, 128>}, {pipeline_mode = #tpu.pipeline_mode<synchronous>, transform_indices = @transform_7, window_bounds = array<i64: 1, 128>}, {pipeline_mode = #tpu.pipeline_mode<synchronous>, transform_indices = @transform_8, window_bounds = array<i64: 64, 128>}]} {
    %c0 = arith.constant 0 : index
    %c0_0 = arith.constant 0 : index
    %0 = vector.load %arg1[%c0, %c0_0] : memref<64x32xf32, #tpu.memory_space<vmem>>, vector<64x32xf32>
    %1 = arith.truncf %0 : vector<64x32xf32> to vector<64x32xbf16>
    %c0_1 = arith.constant 0 : index
    %c0_2 = arith.constant 0 : index
    %2 = vector.load %arg2[%c0_1, %c0_2] : memref<64x64xf32, #tpu.memory_space<vmem>>, vector<64x64xf32>
    %cst = arith.constant 0.000000e+00 : f32
    %3 = vector.broadcast %cst : f32 to vector<64x64xf32>
    %4 = arith.cmpf ogt, %2, %3 : vector<64x64xf32>
    %c0_3 = arith.constant 0 : index
    %c0_4 = arith.constant 0 : index
    %5 = vector.load %arg3[%c0_3, %c0_4] : memref<32x144xbf16, #tpu.memory_space<vmem>>, vector<32x144xbf16>
    %cst_5 = arith.constant dense<0.000000e+00> : vector<64x144xf32>
    %6 = tpu.matmul %1, %5, %cst_5 {dimension_numbers = #tpu.dot_dimension_numbers<[1], [0], [0], [1], [0, 0, 1, 1], [], []>} : vector<64x32xbf16>, vector<32x144xbf16>, vector<64x144xf32> -> vector<64x144xf32>
    %7 = vector.extract_strided_slice %6 {offsets = [0, 0], sizes = [64, 128], strides = [1, 1]} : vector<64x144xf32> to vector<64x128xf32>
    %8 = vector.extract_strided_slice %6 {offsets = [0, 128], sizes = [64, 16], strides = [1, 1]} : vector<64x144xf32> to vector<64x16xf32>
    %9 = tpu.transpose %8, [1, 0] : vector<64x16xf32> -> vector<16x64xf32>
    %10 = vector.extract_strided_slice %9 {offsets = [0, 0], sizes = [8, 64], strides = [1, 1]} : vector<16x64xf32> to vector<8x64xf32>
    %11 = vector.extract_strided_slice %9 {offsets = [8, 0], sizes = [8, 64], strides = [1, 1]} : vector<16x64xf32> to vector<8x64xf32>
    %12 = vector.shape_cast %10 : vector<8x64xf32> to vector<8x64x1xf32>
    %13 = vector.shape_cast %11 : vector<8x64xf32> to vector<8x1x64xf32>
    %14 = vector.broadcast %12 : vector<8x64x1xf32> to vector<8x64x64xf32>
    %15 = vector.broadcast %13 : vector<8x1x64xf32> to vector<8x64x64xf32>
    %16 = arith.addf %14, %15 : vector<8x64x64xf32>
    %cst_6 = arith.constant 0.000000e+00 : f32
    %17 = vector.broadcast %cst_6 : f32 to vector<8x64x64xf32>
    %18 = arith.cmpf ogt, %16, %17 : vector<8x64x64xf32>
    %cst_7 = arith.constant 2.000000e-01 : f32
    %19 = vector.broadcast %cst_7 : f32 to vector<8x64x64xf32>
    %20 = arith.mulf %19, %16 : vector<8x64x64xf32>
    %21 = arith.select %18, %16, %20 : vector<8x64x64xi1>, vector<8x64x64xf32>
    %22 = vector.shape_cast %4 : vector<64x64xi1> to vector<1x64x64xi1>
    %cst_8 = arith.constant -9.000000e+15 : f32
    %23 = vector.shape_cast %22 : vector<1x64x64xi1> to vector<1x64x64xi1>
    %24 = vector.broadcast %23 : vector<1x64x64xi1> to vector<8x64x64xi1>
    %25 = vector.broadcast %cst_8 : f32 to vector<8x64x64xf32>
    %26 = arith.select %24, %21, %25 : vector<8x64x64xi1>, vector<8x64x64xf32>
    %cst_9 = arith.constant dense<0xFF800000> : vector<8x64xf32>
    %27 = vector.multi_reduction <maximumf>, %26, %cst_9 [2] : vector<8x64x64xf32> to vector<8x64xf32>
    %28 = vector.shape_cast %27 : vector<8x64xf32> to vector<8x64x1xf32>
    %29 = vector.broadcast %28 : vector<8x64x1xf32> to vector<8x64x64xf32>
    %30 = arith.subf %26, %29 : vector<8x64x64xf32>
    %31 = math.exp %30 : vector<8x64x64xf32>
    %cst_10 = arith.constant dense<0.000000e+00> : vector<8x64xf32>
    %32 = vector.multi_reduction <add>, %31, %cst_10 [2] : vector<8x64x64xf32> to vector<8x64xf32>
    %33 = vector.shape_cast %32 : vector<8x64xf32> to vector<8x64x1xf32>
    %34 = tpu.reciprocal %33 {approx = true} : vector<8x64x1xf32> -> vector<8x64x1xf32>
    %35 = vector.broadcast %34 : vector<8x64x1xf32> to vector<8x64x64xf32>
    %36 = arith.mulf %31, %35 : vector<8x64x64xf32>
    %37 = arith.truncf %36 : vector<8x64x64xf32> to vector<8x64x64xbf16>
    %38 = arith.truncf %7 : vector<64x128xf32> to vector<64x128xbf16>
    %39 = vector.extract_strided_slice %37 {offsets = [0, 0, 0], sizes = [1, 64, 64], strides = [1, 1, 1]} : vector<8x64x64xbf16> to vector<1x64x64xbf16>
    %40 = vector.shape_cast %39 : vector<1x64x64xbf16> to vector<64x64xbf16>
    %41 = vector.extract_strided_slice %38 {offsets = [0, 0], sizes = [64, 16], strides = [1, 1]} : vector<64x128xbf16> to vector<64x16xbf16>
    %cst_11 = arith.constant dense<0.000000e+00> : vector<64x16xf32>
    %42 = tpu.matmul %40, %41, %cst_11 {dimension_numbers = #tpu.dot_dimension_numbers<[1], [0], [0], [1], [0, 0, 1, 1], [], []>} : vector<64x64xbf16>, vector<64x16xbf16>, vector<64x16xf32> -> vector<64x16xf32>
    %43 = vector.extract_strided_slice %37 {offsets = [1, 0, 0], sizes = [1, 64, 64], strides = [1, 1, 1]} : vector<8x64x64xbf16> to vector<1x64x64xbf16>
    %44 = vector.shape_cast %43 : vector<1x64x64xbf16> to vector<64x64xbf16>
    %45 = vector.extract_strided_slice %38 {offsets = [0, 16], sizes = [64, 16], strides = [1, 1]} : vector<64x128xbf16> to vector<64x16xbf16>
    %cst_12 = arith.constant dense<0.000000e+00> : vector<64x16xf32>
    %46 = tpu.matmul %44, %45, %cst_12 {dimension_numbers = #tpu.dot_dimension_numbers<[1], [0], [0], [1], [0, 0, 1, 1], [], []>} : vector<64x64xbf16>, vector<64x16xbf16>, vector<64x16xf32> -> vector<64x16xf32>
    %47 = vector.extract_strided_slice %37 {offsets = [2, 0, 0], sizes = [1, 64, 64], strides = [1, 1, 1]} : vector<8x64x64xbf16> to vector<1x64x64xbf16>
    %48 = vector.shape_cast %47 : vector<1x64x64xbf16> to vector<64x64xbf16>
    %49 = vector.extract_strided_slice %38 {offsets = [0, 32], sizes = [64, 16], strides = [1, 1]} : vector<64x128xbf16> to vector<64x16xbf16>
    %cst_13 = arith.constant dense<0.000000e+00> : vector<64x16xf32>
    %50 = tpu.matmul %48, %49, %cst_13 {dimension_numbers = #tpu.dot_dimension_numbers<[1], [0], [0], [1], [0, 0, 1, 1], [], []>} : vector<64x64xbf16>, vector<64x16xbf16>, vector<64x16xf32> -> vector<64x16xf32>
    %51 = vector.extract_strided_slice %37 {offsets = [3, 0, 0], sizes = [1, 64, 64], strides = [1, 1, 1]} : vector<8x64x64xbf16> to vector<1x64x64xbf16>
    %52 = vector.shape_cast %51 : vector<1x64x64xbf16> to vector<64x64xbf16>
    %53 = vector.extract_strided_slice %38 {offsets = [0, 48], sizes = [64, 16], strides = [1, 1]} : vector<64x128xbf16> to vector<64x16xbf16>
    %cst_14 = arith.constant dense<0.000000e+00> : vector<64x16xf32>
    %54 = tpu.matmul %52, %53, %cst_14 {dimension_numbers = #tpu.dot_dimension_numbers<[1], [0], [0], [1], [0, 0, 1, 1], [], []>} : vector<64x64xbf16>, vector<64x16xbf16>, vector<64x16xf32> -> vector<64x16xf32>
    %55 = vector.extract_strided_slice %37 {offsets = [4, 0, 0], sizes = [1, 64, 64], strides = [1, 1, 1]} : vector<8x64x64xbf16> to vector<1x64x64xbf16>
    %56 = vector.shape_cast %55 : vector<1x64x64xbf16> to vector<64x64xbf16>
    %57 = vector.extract_strided_slice %38 {offsets = [0, 64], sizes = [64, 16], strides = [1, 1]} : vector<64x128xbf16> to vector<64x16xbf16>
    %cst_15 = arith.constant dense<0.000000e+00> : vector<64x16xf32>
    %58 = tpu.matmul %56, %57, %cst_15 {dimension_numbers = #tpu.dot_dimension_numbers<[1], [0], [0], [1], [0, 0, 1, 1], [], []>} : vector<64x64xbf16>, vector<64x16xbf16>, vector<64x16xf32> -> vector<64x16xf32>
    %59 = vector.extract_strided_slice %37 {offsets = [5, 0, 0], sizes = [1, 64, 64], strides = [1, 1, 1]} : vector<8x64x64xbf16> to vector<1x64x64xbf16>
    %60 = vector.shape_cast %59 : vector<1x64x64xbf16> to vector<64x64xbf16>
    %61 = vector.extract_strided_slice %38 {offsets = [0, 80], sizes = [64, 16], strides = [1, 1]} : vector<64x128xbf16> to vector<64x16xbf16>
    %cst_16 = arith.constant dense<0.000000e+00> : vector<64x16xf32>
    %62 = tpu.matmul %60, %61, %cst_16 {dimension_numbers = #tpu.dot_dimension_numbers<[1], [0], [0], [1], [0, 0, 1, 1], [], []>} : vector<64x64xbf16>, vector<64x16xbf16>, vector<64x16xf32> -> vector<64x16xf32>
    %63 = vector.extract_strided_slice %37 {offsets = [6, 0, 0], sizes = [1, 64, 64], strides = [1, 1, 1]} : vector<8x64x64xbf16> to vector<1x64x64xbf16>
    %64 = vector.shape_cast %63 : vector<1x64x64xbf16> to vector<64x64xbf16>
    %65 = vector.extract_strided_slice %38 {offsets = [0, 96], sizes = [64, 16], strides = [1, 1]} : vector<64x128xbf16> to vector<64x16xbf16>
    %cst_17 = arith.constant dense<0.000000e+00> : vector<64x16xf32>
    %66 = tpu.matmul %64, %65, %cst_17 {dimension_numbers = #tpu.dot_dimension_numbers<[1], [0], [0], [1], [0, 0, 1, 1], [], []>} : vector<64x64xbf16>, vector<64x16xbf16>, vector<64x16xf32> -> vector<64x16xf32>
    %67 = vector.extract_strided_slice %37 {offsets = [7, 0, 0], sizes = [1, 64, 64], strides = [1, 1, 1]} : vector<8x64x64xbf16> to vector<1x64x64xbf16>
    %68 = vector.shape_cast %67 : vector<1x64x64xbf16> to vector<64x64xbf16>
    %69 = vector.extract_strided_slice %38 {offsets = [0, 112], sizes = [64, 16], strides = [1, 1]} : vector<64x128xbf16> to vector<64x16xbf16>
    %cst_18 = arith.constant dense<0.000000e+00> : vector<64x16xf32>
    %70 = tpu.matmul %68, %69, %cst_18 {dimension_numbers = #tpu.dot_dimension_numbers<[1], [0], [0], [1], [0, 0, 1, 1], [], []>} : vector<64x64xbf16>, vector<64x16xbf16>, vector<64x16xf32> -> vector<64x16xf32>
    %71 = tpu.concatenate %42, %46, %50, %54, %58, %62, %66, %70 in 1 : vector<64x16xf32>, vector<64x16xf32>, vector<64x16xf32>, vector<64x16xf32>, vector<64x16xf32>, vector<64x16xf32>, vector<64x16xf32>, vector<64x16xf32> -> vector<64x128xf32>
    %cst_19 = arith.constant 0.000000e+00 : f32
    %72 = vector.broadcast %cst_19 : f32 to vector<64x128xf32>
    %73 = arith.cmpf ogt, %71, %72 : vector<64x128xf32>
    %cst_20 = arith.constant 0.000000e+00 : f32
    %74 = vector.broadcast %cst_20 : f32 to vector<64x128xf32>
    %75 = arith.minimumf %71, %74 : vector<64x128xf32>
    %76 = math.exp %75 : vector<64x128xf32>
    %cst_21 = arith.constant 1.000000e+00 : f32
    %77 = vector.broadcast %cst_21 : f32 to vector<64x128xf32>
    %78 = arith.subf %76, %77 : vector<64x128xf32>
    %79 = arith.select %73, %71, %78 : vector<64x128xi1>, vector<64x128xf32>
    %80 = arith.truncf %79 : vector<64x128xf32> to vector<64x128xbf16>
    %c0_22 = arith.constant 0 : index
    %c0_23 = arith.constant 0 : index
    %81 = vector.load %arg4[%c0_22, %c0_23] : memref<128x18xbf16, #tpu.memory_space<vmem>>, vector<128x18xbf16>
    %cst_24 = arith.constant dense<0.000000e+00> : vector<64x18xf32>
    %82 = tpu.matmul %80, %81, %cst_24 {dimension_numbers = #tpu.dot_dimension_numbers<[1], [0], [0], [1], [0, 0, 1, 1], [], []>} : vector<64x128xbf16>, vector<128x18xbf16>, vector<64x18xf32> -> vector<64x18xf32>
    %83 = vector.extract_strided_slice %82 {offsets = [0, 0], sizes = [64, 16], strides = [1, 1]} : vector<64x18xf32> to vector<64x16xf32>
    %84 = vector.extract_strided_slice %82 {offsets = [0, 16], sizes = [64, 1], strides = [1, 1]} : vector<64x18xf32> to vector<64x1xf32>
    %85 = vector.extract_strided_slice %82 {offsets = [0, 17], sizes = [64, 1], strides = [1, 1]} : vector<64x18xf32> to vector<64x1xf32>
    %86 = tpu.transpose %85, [1, 0] : vector<64x1xf32> -> vector<1x64xf32>
    %87 = vector.broadcast %84 : vector<64x1xf32> to vector<64x64xf32>
    %88 = vector.broadcast %86 : vector<1x64xf32> to vector<64x64xf32>
    %89 = arith.addf %87, %88 : vector<64x64xf32>
    %cst_25 = arith.constant 0.000000e+00 : f32
    %90 = vector.broadcast %cst_25 : f32 to vector<64x64xf32>
    %91 = arith.cmpf ogt, %89, %90 : vector<64x64xf32>
    %cst_26 = arith.constant 2.000000e-01 : f32
    %92 = vector.broadcast %cst_26 : f32 to vector<64x64xf32>
    %93 = arith.mulf %92, %89 : vector<64x64xf32>
    %94 = arith.select %91, %89, %93 : vector<64x64xi1>, vector<64x64xf32>
    %cst_27 = arith.constant -9.000000e+15 : f32
    %95 = vector.broadcast %cst_27 : f32 to vector<64x64xf32>
    %96 = arith.select %4, %94, %95 : vector<64x64xi1>, vector<64x64xf32>
    %cst_28 = arith.constant dense<0xFF800000> : vector<64xf32>
    %97 = vector.multi_reduction <maximumf>, %96, %cst_28 [1] : vector<64x64xf32> to vector<64xf32>
    %98 = vector.shape_cast %97 : vector<64xf32> to vector<64x1xf32>
    %99 = vector.broadcast %98 : vector<64x1xf32> to vector<64x64xf32>
    %100 = arith.subf %96, %99 : vector<64x64xf32>
    %101 = math.exp %100 : vector<64x64xf32>
    %cst_29 = arith.constant dense<0.000000e+00> : vector<64xf32>
    %102 = vector.multi_reduction <add>, %101, %cst_29 [1] : vector<64x64xf32> to vector<64xf32>
    %103 = vector.shape_cast %102 : vector<64xf32> to vector<64x1xf32>
    %104 = tpu.reciprocal %103 {approx = true} : vector<64x1xf32> -> vector<64x1xf32>
    %105 = vector.broadcast %104 : vector<64x1xf32> to vector<64x64xf32>
    %106 = arith.mulf %101, %105 : vector<64x64xf32>
    %107 = arith.truncf %106 : vector<64x64xf32> to vector<64x64xbf16>
    %108 = arith.truncf %83 : vector<64x16xf32> to vector<64x16xbf16>
    %cst_30 = arith.constant dense<0.000000e+00> : vector<64x16xf32>
    %109 = tpu.matmul %107, %108, %cst_30 {dimension_numbers = #tpu.dot_dimension_numbers<[1], [0], [0], [1], [0, 0, 1, 1], [], []>} : vector<64x64xbf16>, vector<64x16xbf16>, vector<64x16xf32> -> vector<64x16xf32>
    %110 = arith.truncf %109 : vector<64x16xf32> to vector<64x16xbf16>
    %c0_31 = arith.constant 0 : index
    %c0_32 = arith.constant 0 : index
    %111 = vector.load %arg5[%c0_31, %c0_32] : memref<16x200xbf16, #tpu.memory_space<vmem>>, vector<16x200xbf16>
    %cst_33 = arith.constant dense<0.000000e+00> : vector<64x200xf32>
    %112 = tpu.matmul %110, %111, %cst_33 {dimension_numbers = #tpu.dot_dimension_numbers<[1], [0], [0], [1], [0, 0, 1, 1], [], []>} : vector<64x16xbf16>, vector<16x200xbf16>, vector<64x200xf32> -> vector<64x200xf32>
    %c0_34 = arith.constant 0 : index
    %c0_35 = arith.constant 0 : index
    %113 = vector.load %arg6[%c0_34, %c0_35] : memref<1x200xf32, #tpu.memory_space<vmem>>, vector<1x200xf32>
    %114 = vector.broadcast %113 : vector<1x200xf32> to vector<64x200xf32>
    %115 = arith.addf %112, %114 : vector<64x200xf32>
    %cst_36 = arith.constant 0.000000e+00 : f32
    %116 = vector.broadcast %cst_36 : f32 to vector<64x200xf32>
    %117 = arith.cmpf ogt, %115, %116 : vector<64x200xf32>
    %cst_37 = arith.constant 0.000000e+00 : f32
    %118 = vector.broadcast %cst_37 : f32 to vector<64x200xf32>
    %119 = arith.minimumf %115, %118 : vector<64x200xf32>
    %120 = math.exp %119 : vector<64x200xf32>
    %cst_38 = arith.constant 1.000000e+00 : f32
    %121 = vector.broadcast %cst_38 : f32 to vector<64x200xf32>
    %122 = arith.subf %120, %121 : vector<64x200xf32>
    %123 = arith.select %117, %115, %122 : vector<64x200xi1>, vector<64x200xf32>
    %124 = arith.truncf %123 : vector<64x200xf32> to vector<64x200xbf16>
    %c0_39 = arith.constant 0 : index
    %c0_40 = arith.constant 0 : index
    %125 = vector.load %arg7[%c0_39, %c0_40] : memref<200x128xbf16, #tpu.memory_space<vmem>>, vector<200x128xbf16>
    %cst_41 = arith.constant dense<0.000000e+00> : vector<64x128xf32>
    %126 = tpu.matmul %124, %125, %cst_41 {dimension_numbers = #tpu.dot_dimension_numbers<[1], [0], [0], [1], [0, 0, 1, 1], [], []>} : vector<64x200xbf16>, vector<200x128xbf16>, vector<64x128xf32> -> vector<64x128xf32>
    %c0_42 = arith.constant 0 : index
    %c0_43 = arith.constant 0 : index
    %127 = vector.load %arg8[%c0_42, %c0_43] : memref<1x128xf32, #tpu.memory_space<vmem>>, vector<1x128xf32>
    %128 = vector.broadcast %127 : vector<1x128xf32> to vector<64x128xf32>
    %129 = arith.addf %126, %128 : vector<64x128xf32>
    %c0_44 = arith.constant 0 : index
    %c0_45 = arith.constant 0 : index
    %130 = vector.load %arg9[%c0_44, %c0_45] : memref<64x128xf32, #tpu.memory_space<vmem>>, vector<64x128xf32>
    tpu.vector_store %arg9[%c0_44, %c0_45], %129 {strides = array<i32>} : memref<64x128xf32, #tpu.memory_space<vmem>>, vector<64x128xf32>,
    return
  }
  func.func @transform_0(%arg0: i32) -> (i32, i32) {
    %c0_i32 = arith.constant 0 : i32
    %c0_i32_0 = arith.constant 0 : i32
    %c0_i32_1 = arith.constant 0 : i32
    return %c0_i32, %c0_i32_0 : i32, i32
  }
  func.func @transform_1(%arg0: i32) -> (i32, i32) {
    %c0_i32 = arith.constant 0 : i32
    %c0_i32_0 = arith.constant 0 : i32
    %c0_i32_1 = arith.constant 0 : i32
    return %c0_i32, %c0_i32_0 : i32, i32
  }
  func.func @transform_2(%arg0: i32) -> (i32, i32) {
    %c0_i32 = arith.constant 0 : i32
    %c0_i32_0 = arith.constant 0 : i32
    %c0_i32_1 = arith.constant 0 : i32
    return %c0_i32, %c0_i32_0 : i32, i32
  }
  func.func @transform_3(%arg0: i32) -> (i32, i32) {
    %c0_i32 = arith.constant 0 : i32
    %c0_i32_0 = arith.constant 0 : i32
    %c0_i32_1 = arith.constant 0 : i32
    return %c0_i32, %c0_i32_0 : i32, i32
  }
  func.func @transform_4(%arg0: i32) -> (i32, i32) {
    %c0_i32 = arith.constant 0 : i32
    %c0_i32_0 = arith.constant 0 : i32
    %c0_i32_1 = arith.constant 0 : i32
    return %c0_i32, %c0_i32_0 : i32, i32
  }
  func.func @transform_5(%arg0: i32) -> (i32, i32) {
    %c0_i32 = arith.constant 0 : i32
    %c0_i32_0 = arith.constant 0 : i32
    %c0_i32_1 = arith.constant 0 : i32
    return %c0_i32, %c0_i32_0 : i32, i32
  }
  func.func @transform_6(%arg0: i32) -> (i32, i32) {
    %c0_i32 = arith.constant 0 : i32
    %c0_i32_0 = arith.constant 0 : i32
    %c0_i32_1 = arith.constant 0 : i32
    return %c0_i32, %c0_i32_0 : i32, i32
  }
  func.func @transform_7(%arg0: i32) -> (i32, i32) {
    %c0_i32 = arith.constant 0 : i32
    %c0_i32_0 = arith.constant 0 : i32
    %c0_i32_1 = arith.constant 0 : i32
    return %c0_i32, %c0_i32_0 : i32, i32
  }
  func.func @transform_8(%arg0: i32) -> (i32, i32) {
    %c0_i32 = arith.constant 0 : i32
    %c0_i32_0 = arith.constant 0 : i32
    %c0_i32_1 = arith.constant 0 : i32
    return %c0_i32, %c0_i32_0 : i32, i32
  }
}

</mosaic_0001>

<bundles_post_ra>
// kernel: gat_forward.1
= control target key start
LH: loop header
LB: loop body
LE: loop exit
PB: predicated region body
PF: predicated region fallthrough
CT: control target
= control target key end

     0   :  { %13 = vsyncpa [#allocation3], 0  ;;  %s6374_s0 = inlined_call_operand.vmem [shape: f32[64,32], index: 0, kind: input, shape index: {}]   ;;  %s6375_s1 = inlined_call_operand.vmem [shape: f32[64,64], index: 1, kind: input, shape index: {}]   ;;  %s6376_s2 = inlined_call_operand.hbm [shape: bf16[32,144], index: 2, kind: input, shape index: {}]   ;;  %s6377_s3 = inlined_call_operand.vmem [shape: bf16[128,18], index: 3, kind: input, shape index: {}]   ;;  %s6378_s4 = inlined_call_operand.vmem [shape: bf16[16,200], index: 4, kind: input, shape index: {}]   ;;  %s6379_s5 = inlined_call_operand.vmem [shape: f32[1,200], index: 5, kind: input, shape index: {}]   ;;  %s6380_s6 = inlined_call_operand.vmem [shape: bf16[200,128], index: 6, kind: input, shape index: {}]   ;;  %s6381_s7 = inlined_call_operand.hbm [shape: f32[1,128], index: 7, kind: input, shape index: {}]   ;;  %s6382_s8 = inlined_call_operand.vmem [shape: f32[64,128], index: 8, kind: output, shape index: {}]  }
   0x1   :  { %14 = vsyncpa [#allocation5], 0  ;;  %s4360_s27 = smov [#allocation2]   ;;  %s4312_s9 = scalar_lea.hbm %s6376_s2, 512 }
   0x2   :  { %s24_s28 = sshll.u32 %s4360_s27, 4  ;;  %p4313_p0 = scmp.ne.s32.totalorder %s6376_s2, %s4312_s9  ;;  %s25_s28 = int_to_ptr.vmem [resolvable:$true] %s24_s28 }
   0x3   :  { %p4316_p1 = scmp.lt.u32.totalorder %s4312_s9, %s6376_s2 }
   0x5   :  { %p4318_p2 = pnand %p4316_p1, %p4313_p0 }
   0x7   :  { %4321 = shalt.err (!%p4318_p2)
}
   0x8   :  { %s4322_s14 = scalar_lea.vmem %s25_s28, 512  ;;  %p4327_p4 = scmp.lt.s32.totalorder %s25_s28, %s25_s28 }
   0x9   :  { %p4323_p3 = scmp.ne.s32.totalorder %s25_s28, %s4322_s14  ;;  %p4328_p5 = scmp.lt.s32.totalorder %s4322_s14, %s4322_s14 }
   0xb   :  { %p4329_p6 = por %p4328_p5, %p4327_p4 }
   0xd   :  { %p4330_p7 = pnand %p4329_p6, %p4323_p3 }
   0xf   :  { %4333 = shalt.err (!%p4330_p7)
}
  0x10   :  { %s4361_s15 = smov 128   ;;  %s4362_s16 = smov 8  }
  0x11   :  { %30 = dma.hbm_to_vmem [thread:$0]  %s6376_s2, 512, %s25_s28, [#allocation3], %s4361_s15, %s4361_s15, %s4362_s16  }
  0x12   :  { %s4363_s19 = smov [#allocation4]   ;;  %s4334_s23 = scalar_lea.hbm %s6381_s7, 16 }
  0x13   :  { %s45_s20 = sshll.u32 %s4363_s19, 4  ;;  %p4335_p8 = scmp.ne.s32.totalorder %s6381_s7, %s4334_s23  ;;  %s46_s20 = int_to_ptr.vmem [resolvable:$true] %s45_s20 }
  0x14   :  { %p4338_p9 = scmp.lt.u32.totalorder %s4334_s23, %s6381_s7 }
  0x16   :  { %p4340_p10 = pnand %p4338_p9, %p4335_p8 }
  0x18   :  { %4343 = shalt.err (!%p4340_p10)
}
  0x19   :  { %s4344_s29 = scalar_lea.vmem %s46_s20, 16  ;;  %s4348_s2 = scalar_lea.vmem %s46_s20, 32 }
  0x1a   :  { %p4345_p11 = scmp.ne.s32.totalorder %s46_s20, %s4344_s29  ;;  %p4349_p12 = scmp.lt.s32.totalorder %s46_s20, %s46_s20 }
  0x1b   :  { %p4350_p13 = scmp.lt.s32.totalorder %s4348_s2, %s4344_s29 }
  0x1d   :  { %p4351_p0 = por %p4350_p13, %p4349_p12 }
  0x1f   :  { %p4352_p1 = pnand %p4351_p0, %p4345_p11 }
  0x21   :  { %4355 = shalt.err (!%p4352_p1)
}
  0x22   :  { %48 = dma.hbm_to_vmem [thread:$0]  %s6381_s7, 16, %s46_s20, [#allocation5]  }
  0x23   :  { %4356 = dma.done.wait [#allocation3], 512  }
  0x24   :  { %4357 = vsyncadd [#allocation3], 4294966784 }
  0x25   :  { %4358 = dma.done.wait [#allocation5], 16  }
  0x26   :  { %4359 = vsyncadd [#allocation5], 4294967280  ;;  %v6384_v0 = vmov 0   ;;  %v3946_v1 = vld [vmem:[#allocation2 + $0x4] ss:$8 sps:$4 sm:$0xff]   ;;  %v56_v5 = vld [vmem:[%s6374_s0] sm:$0xff]  ;;  %v226_v45 = vlaneseq }
  0x27   :  { %153 = vmatprep.mubr.bf16.mxu1 %v6384_v0  ;;  %v3948_v2 = vld [vmem:[#allocation2] ss:$8 sps:$4 sm:$0xff]   ;;  %121 = vmatprep.subr.bf16.mxu1 %v3946_v1  ;;  %v3949_v3 = vld [vmem:[#allocation2 + $0x14] ss:$8 sps:$4 sm:$0xff]   ;;  %v3951_v4 = vld [vmem:[#allocation2 + $0x10] ss:$8 sps:$4 sm:$0xff]  }
  0x28   :  { %122 = vmatpush1.bf16.msra.mxu1 %v3948_v2  ;;  %v57_v6 = vld [vmem:[%s6374_s0 + $0x8] sm:$0xff]  ;;  %vm108_vm0 = vcmask 261120   ;;  %v58_v8 = vld [vmem:[%s6374_s0 + $0x10] sm:$0xff]  ;;  %v59_v9 = vld [vmem:[%s6374_s0 + $0x18] sm:$0xff]  ;;  %s4365_s24 = smov 96   ;;  %s4366_s25 = smov 112  }
  0x29   :  { %123 = vmatprep.subr.bf16.mxu1 %v3949_v3  ;;  %v64_v7 = vpack.c.bf16 %v57_v6, %v56_v5  ;;  %v65_v10 = vpack.c.bf16 %v59_v9, %v58_v8  ;;  %v60_v11 = vld [vmem:[%s6374_s0 + $0x20] sm:$0xff]  ;;  %v61_v12 = vld [vmem:[%s6374_s0 + $0x28] sm:$0xff]  ;;  %v62_v14 = vld [vmem:[%s6374_s0 + $0x30] sm:$0xff]  ;;  %v4523_v46 = vshrl.u32 %v226_v45, 7  ;;  %v4368_v2 = vmov 1966171168  }
  0x2a   :  { %v66_v13 = vpack.c.bf16 %v61_v12, %v60_v11  ;;  %v63_v15 = vld [vmem:[%s6374_s0 + $0x38] sm:$0xff]  ;;  %s4367_s0 = smov 80   ;;  %v509_v3 = vunpack.c.l.s4 %v4368_v2  ;;  %v4586_v12 = vld [vmem:[%s6375_s1] sm:$0xff]  ;;  %vm932_vm3 = vcmask 523264   ;;  %s4370_s18 = smov 48  }
  0x2b   :  { %v67_v16 = vpack.c.bf16 %v63_v15, %v62_v14  ;;  %6464 = vst [vmem:[#allocation17_spill] sm:$0xff] %v4523_v46  ;;  %v4528_v48 = vsub.s32 0, %v4523_v46  ;;  %v6383_v49 = vsub.s32 1, %v4523_v46  ;;  %v333_v51 = vsub.s32 3, %v4523_v46  ;;  %6468 = vst [vmem:[#allocation21_spill] sm:$0xff] %v4586_v12  ;;  %v4634_v45 = vld [vmem:[%s6375_s1 + $0x20] sm:$0xff] }
  0x2c   :  { %124 = vmatpush1.bf16.msra.mxu1 %v3951_v4  ;;  %v298_v55 = vsub.s32 2, %v4523_v46  ;;  %v368_v57 = vsub.s32 4, %v4523_v46  ;;  %v403_v59 = vsub.s32 5, %v4523_v46  ;;  %v438_v61 = vsub.s32 6, %v4523_v46  ;;  %6471 = vst [vmem:[#allocation24_spill] sm:$0xff] %v4634_v45  ;;  %s4371_s19 = smov 32  }
  0x2d   :  { %6466 = vst [vmem:[#allocation19_spill] sm:$0xff] %v4528_v48  ;;  %v473_v63 = vsub.s32 7, %v4523_v46  ;;  %v510_v4 = vunpack.c.0.s8 %v509_v3  ;;  %vm76_vm1 = vcmp.gt.f32.partialorder %v4586_v12, 0.0  ;;  %vm80_vm9 = vcmp.gt.f32.partialorder %v4634_v45, 0.0  ;;  %s4372_s20 = smov 16  }
  0x2f   :  { %3580 = vmatmul.mubr.msk.bf16.vlgmr.msra.gmra.mrb[0].mxu1 %vm108_vm0, %v64_v7  ;;  %v4565_v5 = vsub.s32 %v510_v4, %v4523_v46  ;;  %v4665_v4 = vld [vmem:[%s6375_s1 + $0x38] sm:$0xff] }
  0x30   :  { %163 = vmatprep.mubr.bf16.mxu1 %v6384_v0  ;;  %6473 = vst [vmem:[#allocation26_spill] sm:$0xff] %v4665_v4  ;;  %vm83_vm13 = vcmp.gt.f32.partialorder %v4665_v4, 0.0 }
  0x37   :  { %3581 = vmatmul.mubr.msk.bf16.gmra.mrb[4].mxu1 %vm108_vm0, %v65_v10 }
  0x38   :  { %173 = vmatprep.mubr.bf16.mxu1 %v6384_v0 }
  0x3f   :  { %3582 = vmatmul.mubr.msk.bf16.gmra.mrb[8].mxu1 %vm108_vm0, %v66_v13 }
  0x40   :  { %183 = vmatprep.mubr.bf16.mxu1 %v6384_v0 }
  0x47   :  { %3583 = vmatmul.mubr.msk.bf16.gmra.mrb[12].mxu1 %vm108_vm0, %v67_v16 }
 0x102   :  { %v155_v17 = vpop.f32.mrb[0].mxu1 }
 0x103   :  { %v157_v18 = vpop.f32.mrb[1].mxu1 }
 0x104   :  { %v159_v19 = vpop.f32.mrb[2].mxu1 }
 0x105   :  { %v4476_v20 = vpack.c.bf16 %v159_v19, %v155_v17  ;;  %v161_v21 = vpop.f32.mrb[3].mxu1 }
 0x107   :  { %6455 = vst [vmem:[#allocation8_spill] sm:$0xff] %v4476_v20  ;;  %1843 = vrot.lane.b32.xlu1 %v4476_v20, %s4365_s24  ;;  %1754 = vrot.lane.b32.xlu0 %v4476_v20, %s4366_s25 }
 0x108   :  { %3760 = vmatprep.subr.bf16.mxu1 %v4476_v20 }
 0x109   :  { %3761 = vmatpush3.bf16.msra.mxu1 %v4476_v20 }
 0x10a   :  { %v165_v22 = vpop.f32.mrb[4].mxu1 }
 0x10b   :  { %1932 = vrot.lane.b32.xlu1 %v4476_v20, %s4367_s0  ;;  %v167_v23 = vpop.f32.mrb[5].mxu1 }
 0x10c   :  { %v169_v24 = vpop.f32.mrb[6].mxu1 }
 0x10d   :  { %v4486_v25 = vpack.c.bf16 %v169_v24, %v165_v22  ;;  %v171_v26 = vpop.f32.mrb[7].mxu1 }
 0x10f   :  { %6456 = vst [vmem:[#allocation9_spill] sm:$0xff] %v4486_v25  ;;  %1845 = vrot.lane.b32.xlu0 %v4486_v25, %s4365_s24  ;;  %1756 = vrot.lane.b32.xlu1 %v4486_v25, %s4366_s25 }
 0x110   :  { %3762 = vmatprep.subr.bf16.mxu1 %v4486_v25 }
 0x111   :  { %3763 = vmatpush3.bf16.msra.mxu1 %v4486_v25 }
 0x112   :  { %v175_v27 = vpop.f32.mrb[8].mxu1 }
 0x113   :  { %1934 = vrot.lane.b32.xlu1 %v4486_v25, %s4367_s0  ;;  %v177_v28 = vpop.f32.mrb[9].mxu1 }
 0x114   :  { %v179_v29 = vpop.f32.mrb[10].mxu1 }
 0x115   :  { %v4496_v30 = vpack.c.bf16 %v179_v29, %v175_v27  ;;  %v181_v31 = vpop.f32.mrb[11].mxu1 }
 0x117   :  { %6457 = vst [vmem:[#allocation10_spill] sm:$0xff] %v4496_v30  ;;  %1758 = vrot.lane.b32.xlu1 %v4496_v30, %s4366_s25  ;;  %3764 = vmatprep.subr.bf16.mxu1 %v4496_v30 }
 0x118   :  { %3765 = vmatpush3.bf16.msra.mxu1 %v4496_v30 }
 0x11a   :  { %v185_v32 = vpop.f32.mrb[12].mxu1 }
 0x11b   :  { %1847 = vrot.lane.b32.xlu1 %v4496_v30, %s4365_s24  ;;  %v187_v33 = vpop.f32.mrb[13].mxu1 }
 0x11c   :  { %v189_v34 = vpop.f32.mrb[14].mxu1 }
 0x11d   :  { %v4504_v35 = vpack.c.bf16 %v189_v34, %v185_v32  ;;  %v191_v36 = vpop.f32.mrb[15].mxu1 }
 0x11f   :  { %6458 = vst [vmem:[#allocation11_spill] sm:$0xff] %v4504_v35  ;;  %1936 = vrot.lane.b32.xlu1 %v4496_v30, %s4367_s0  ;;  %1760 = vrot.lane.b32.xlu0 %v4504_v35, %s4366_s25 }
 0x120   :  { %3766 = vmatprep.subr.bf16.mxu1 %v4504_v35 }
 0x121   :  { %3767 = vmatpush3.bf16.msra.mxu1 %v4504_v35 }
 0x13d   :  { %194 = vxpose.xlu0.b32.start [1/8] (short) (narrow) %v157_v18, 16 }
 0x141   :  { %195 = vxpose.xlu0.b32.cont [2/8] (short) (narrow) %v161_v21, 16  ;;  %v4603_v21 = vld [vmem:[%s6375_s1 + $0x10] sm:$0xff] }
 0x142   :  { %6469 = vst [vmem:[#allocation22_spill] sm:$0xff] %v4603_v21  ;;  %vm78_vm4 = vcmp.gt.f32.partialorder %v4603_v21, 0.0 }
 0x145   :  { %196 = vxpose.xlu0.b32.cont [3/8] (short) (narrow) %v167_v23, 16 }
 0x149   :  { %197 = vxpose.xlu0.b32.cont [4/8] (short) (narrow) %v171_v26, 16  ;;  %v4611_v26 = vld [vmem:[%s6375_s1 + $0x18] sm:$0xff] }
 0x14a   :  { %6470 = vst [vmem:[#allocation23_spill] sm:$0xff] %v4611_v26  ;;  %vm79_vm6 = vcmp.gt.f32.partialorder %v4611_v26, 0.0 }
 0x14d   :  { %198 = vxpose.xlu0.b32.cont [5/8] (short) (narrow) %v177_v28, 16 }
 0x151   :  { %199 = vxpose.xlu0.b32.cont [6/8] (short) (narrow) %v181_v31, 16 }
 0x155   :  { %200 = vxpose.xlu0.b32.cont [7/8] (short) (narrow) %v187_v33, 16 }
 0x159   :  { %201 = vxpose.xlu0.b32.end [8/8] (short) (narrow) %v191_v36, 16 }
 0x179   :  { %v1844_v37 = vpop.permute.xlu1 %1843  ;;  %v4512_v38 = vpop.permute.xlu0 %1754 }
 0x17a   :  { %6459 = vst [vmem:[#allocation12_spill] sm:$0xff] %v4512_v38  ;;  %3776 = vmatprep.subr.bf16.mxu1 %v4512_v38  ;;  %3792 = vmatprep.subr.bf16.mxu0 %v1844_v37 }
 0x17b   :  { %3793 = vmatpush3.bf16.msra.mxu0 %v1844_v37 }
 0x17d   :  { %v4515_v39 = vpop.permute.xlu1 %1932 }
 0x17e   :  { %6460 = vst [vmem:[#allocation13_spill] sm:$0xff] %v4515_v39 }
 0x181   :  { %v1846_v40 = vpop.permute.xlu0 %1845  ;;  %v4517_v41 = vpop.permute.xlu1 %1756 }
 0x182   :  { %6461 = vst [vmem:[#allocation14_spill] sm:$0xff] %v4517_v41  ;;  %3794 = vmatprep.subr.bf16.mxu0 %v1846_v40 }
 0x183   :  { %3795 = vmatpush3.bf16.msra.mxu0 %v1846_v40 }
 0x185   :  { %v4519_v42 = vpop.permute.xlu1 %1934 }
 0x186   :  { %6462 = vst [vmem:[#allocation15_spill] sm:$0xff] %v4519_v42 }
 0x189   :  { %v4521_v43 = vpop.permute.xlu1 %1758 }
 0x18a   :  { %6463 = vst [vmem:[#allocation16_spill] sm:$0xff] %v4521_v43 }
 0x18d   :  { %v1848_v44 = vpop.permute.xlu1 %1847 }
 0x18e   :  { %3796 = vmatprep.subr.bf16.mxu0 %v1848_v44 }
 0x18f   :  { %3797 = vmatpush3.bf16.msra.mxu0 %v1848_v44 }
 0x191   :  { %v4525_v47 = vpop.permute.xlu0 %1760  ;;  %v4576_v9 = vpop.permute.xlu1 %1936 }
 0x192   :  { %6465 = vst [vmem:[#allocation18_spill] sm:$0xff] %v4525_v47  ;;  %6467 = vst [vmem:[#allocation20_spill] sm:$0xff] %v4576_v9  ;;  %v4803_v9 = vld [vmem:[%s6375_s1 + $0x28] sm:$0xff] }
 0x193   :  { %6476 = vst [vmem:[#allocation29_spill] sm:$0xff] %v4803_v9 }
 0x1bd   :  { %v210_v50 = vpop.trf.xlu0 }
 0x1be   :  { %v229_v52 = vrot.slane %v210_v50, %v4528_v48  ;;  %v264_v53 = vrot.slane %v210_v50, %v6383_v49  ;;  %v334_v54 = vrot.slane %v210_v50, %v333_v51  ;;  %v299_v56 = vrot.slane %v210_v50, %v298_v55 }
 0x1bf   :  { %v4537_v58 = vrot.slane %v210_v50, %v368_v57  ;;  %v4542_v60 = vrot.slane %v210_v50, %v403_v59  ;;  %v4551_v62 = vrot.slane %v210_v50, %v438_v61  ;;  %v4556_v1 = vrot.slane %v210_v50, %v473_v63  ;;  %v4660_v63 = vld [vmem:[%s6375_s1 + $0x30] sm:$0xff] }
 0x1c0   :  { %266 = vbcast.lane.b32.xlu0 %v264_v53, 256  ;;  %231 = vbcast.lane.b32.xlu1 %v229_v52, 256  ;;  %6472 = vst [vmem:[#allocation25_spill] sm:$0xff] %v4660_v63  ;;  %vm82_vm11 = vcmp.gt.f32.partialorder %v4660_v63, 0.0 }
 0x1c1   :  { %v4567_v6 = vpop.trf.xlu0 }
 0x1c2   :  { %v514_v7 = vrot.slane %v4567_v6, %v4565_v5 }
 0x1c4   :  { %336 = vbcast.lane.b32.xlu0 %v334_v54, 256  ;;  %235 = vbcast.lane.b32.xlu1 %v229_v52, 264  ;;  %v4573_v8 = vrot.slane %v514_v7, %v4565_v5  ;;  %v522_v27 = vcombine.high %v514_v7, %v514_v7 }
 0x1c6   :  { %v4580_v10 = vrot.slane %v4573_v8, %v4528_v48  ;;  %v4623_v36 = vrot.slane %v522_v27, %v4565_v5 }
 0x1c8   :  { %344 = vbcast.lane.b32.xlu0 %v334_v54, 272  ;;  %239 = vbcast.lane.b32.xlu1 %v229_v52, 272 }
 0x1cc   :  { %317 = vbcast.lane.b32.xlu0 %v299_v56, 288  ;;  %243 = vbcast.lane.b32.xlu1 %v229_v52, 280 }
 0x1d0   :  { %325 = vbcast.lane.b32.xlu0 %v299_v56, 304  ;;  %247 = vbcast.lane.b32.xlu1 %v229_v52, 288 }
 0x1d4   :  { %352 = vbcast.lane.b32.xlu0 %v334_v54, 288  ;;  %251 = vbcast.lane.b32.xlu1 %v229_v52, 296 }
 0x1d8   :  { %360 = vbcast.lane.b32.xlu0 %v334_v54, 304  ;;  %255 = vbcast.lane.b32.xlu1 %v229_v52, 304 }
 0x1dc   :  { %371 = vbcast.lane.b32.xlu0 %v4537_v58, 256  ;;  %259 = vbcast.lane.b32.xlu1 %v229_v52, 312 }
 0x1e0   :  { %379 = vbcast.lane.b32.xlu0 %v4537_v58, 272  ;;  %270 = vbcast.lane.b32.xlu1 %v264_v53, 264 }
 0x1e4   :  { %406 = vbcast.lane.b32.xlu0 %v4542_v60, 256  ;;  %274 = vbcast.lane.b32.xlu1 %v264_v53, 272 }
 0x1e8   :  { %414 = vbcast.lane.b32.xlu0 %v4542_v60, 272  ;;  %278 = vbcast.lane.b32.xlu1 %v264_v53, 280 }
 0x1ec   :  { %387 = vbcast.lane.b32.xlu0 %v4537_v58, 288  ;;  %282 = vbcast.lane.b32.xlu1 %v264_v53, 288 }
 0x1f0   :  { %395 = vbcast.lane.b32.xlu0 %v4537_v58, 304  ;;  %286 = vbcast.lane.b32.xlu1 %v264_v53, 296 }
 0x1f4   :  { %422 = vbcast.lane.b32.xlu0 %v4542_v60, 288  ;;  %290 = vbcast.lane.b32.xlu1 %v264_v53, 304 }
 0x1f8   :  { %430 = vbcast.lane.b32.xlu0 %v4542_v60, 304  ;;  %294 = vbcast.lane.b32.xlu1 %v264_v53, 312 }
 0x1fc   :  { %441 = vbcast.lane.b32.xlu0 %v4551_v62, 256  ;;  %301 = vbcast.lane.b32.xlu1 %v299_v56, 256 }
 0x200   :  { %449 = vbcast.lane.b32.xlu0 %v4551_v62, 272  ;;  %305 = vbcast.lane.b32.xlu1 %v299_v56, 264 }
 0x204   :  { %476 = vbcast.lane.b32.xlu0 %v4556_v1, 256  ;;  %309 = vbcast.lane.b32.xlu1 %v299_v56, 272 }
 0x208   :  { %484 = vbcast.lane.b32.xlu0 %v4556_v1, 272  ;;  %313 = vbcast.lane.b32.xlu1 %v299_v56, 280 }
 0x20c   :  { %457 = vbcast.lane.b32.xlu0 %v4551_v62, 288  ;;  %340 = vbcast.lane.b32.xlu1 %v334_v54, 264 }
 0x210   :  { %492 = vbcast.lane.b32.xlu0 %v4556_v1, 288  ;;  %348 = vbcast.lane.b32.xlu1 %v334_v54, 280 }
 0x214   :  { %500 = vbcast.lane.b32.xlu0 %v4556_v1, 304  ;;  %321 = vbcast.lane.b32.xlu1 %v299_v56, 296 }
 0x218   :  { %329 = vbcast.lane.b32.xlu1 %v299_v56, 312 }
 0x21c   :  { %356 = vbcast.lane.b32.xlu1 %v334_v54, 296 }
 0x220   :  { %364 = vbcast.lane.b32.xlu1 %v334_v54, 312  ;;  %v4642_v54 = vrot.slane %v4623_v36, %v4528_v48 }
 0x224   :  { %375 = vbcast.lane.b32.xlu1 %v4537_v58, 264 }
 0x228   :  { %383 = vbcast.lane.b32.xlu1 %v4537_v58, 280 }
 0x22c   :  { %410 = vbcast.lane.b32.xlu1 %v4542_v60, 264 }
 0x230   :  { %418 = vbcast.lane.b32.xlu1 %v4542_v60, 280 }
 0x232   :  { %v232_v11 = vpop.permute.xlu1 %231  ;;  %v267_v50 = vpop.permute.xlu0 %266 }
 0x233   :  { %v596_v13 = vadd.f32 %v4580_v10, %v232_v11  ;;  %v604_v59 = vadd.f32 %v4642_v54, %v267_v50 }
 0x234   :  { %391 = vbcast.lane.b32.xlu1 %v4537_v58, 296 }
 0x235   :  { %v724_v14 = vmul.f32 0.2, %v596_v13  ;;  %vm660_vm2 = vcmp.gt.f32.partialorder %v596_v13, 0.0  ;;  %v732_v7 = vmul.f32 0.2, %v604_v59  ;;  %vm668_vm12 = vcmp.gt.f32.partialorder %v604_v59, 0.0 }
 0x236   :  { %v4591_v15 = vpop.permute.xlu1 %235 }
 0x237   :  { %v788_v16 = vsel %vm660_vm2, %v596_v13, %v724_v14 }
 0x238   :  { %399 = vbcast.lane.b32.xlu1 %v4537_v58, 312  ;;  %v4596_v17 = vsel %vm76_vm1, %v788_v16, -9e+15 }
 0x239   :  { %v933_v18 = vsel %vm932_vm3, %v4596_v17, -inf }
 0x23a   :  { %v240_v19 = vpop.permute.xlu1 %239  ;;  %934 = vmax.xlane.f32.xlu0 %v933_v18 }
 0x23b   :  { %v598_v22 = vadd.f32 %v4580_v10, %v240_v19 }
 0x23c   :  { %426 = vbcast.lane.b32.xlu1 %v4542_v60, 296 }
 0x23d   :  { %v726_v23 = vmul.f32 0.2, %v598_v22  ;;  %vm662_vm5 = vcmp.gt.f32.partialorder %v598_v22, 0.0 }
 0x23e   :  { %v244_v24 = vpop.permute.xlu1 %243 }
 0x23f   :  { %v599_v28 = vadd.f32 %v4580_v10, %v244_v24  ;;  %v790_v29 = vsel %vm662_vm5, %v598_v22, %v726_v23  ;;  %v796_v24 = vsel %vm668_vm12, %v604_v59, %v732_v7 }
 0x240   :  { %434 = vbcast.lane.b32.xlu1 %v4542_v60, 312  ;;  %v4617_v31 = vsel %vm78_vm4, %v790_v29, -9e+15  ;;  %v4653_v60 = vpop.permute.xlu0 %336 }
 0x241   :  { %v727_v32 = vmul.f32 0.2, %v599_v28  ;;  %v939_v33 = vsel %vm932_vm3, %v4617_v31, -inf  ;;  %vm663_vm7 = vcmp.gt.f32.partialorder %v599_v28, 0.0 }
 0x242   :  { %v248_v34 = vpop.permute.xlu1 %247  ;;  %940 = vmax.xlane.f32.xlu0 %v939_v33 }
 0x243   :  { %v600_v37 = vadd.f32 %v4580_v10, %v248_v34  ;;  %v791_v40 = vsel %vm663_vm7, %v599_v28, %v727_v32  ;;  %v4690_v32 = vsel %vm76_vm1, %v796_v24, -9e+15 }
 0x244   :  { %445 = vbcast.lane.b32.xlu1 %v4551_v62, 264  ;;  %v4629_v44 = vsel %vm79_vm6, %v791_v40, -9e+15  ;;  %v4674_v16 = vpop.permute.xlu0 %344  ;;  %v957_v40 = vsel %vm932_vm3, %v4690_v32, -inf }
 0x245   :  { %v728_v51 = vmul.f32 0.2, %v600_v37  ;;  %v942_v52 = vsel %vm932_vm3, %v4629_v44, -inf  ;;  %vm664_vm8 = vcmp.gt.f32.partialorder %v600_v37, 0.0 }
 0x246   :  { %v4638_v53 = vpop.permute.xlu1 %251  ;;  %943 = vmax.xlane.f32.xlu0 %v942_v52 }
 0x247   :  { %v792_v55 = vsel %vm664_vm8, %v600_v37, %v728_v51  ;;  %v601_v0 = vadd.f32 %v4580_v10, %v4638_v53 }
 0x248   :  { %453 = vbcast.lane.b32.xlu1 %v4551_v62, 280  ;;  %v4648_v56 = vsel %vm80_vm9, %v792_v55, -9e+15  ;;  %v4692_v33 = vpop.permute.xlu0 %317 }
 0x249   :  { %v945_v57 = vsel %vm932_vm3, %v4648_v56, -inf }
 0x24a   :  { %v256_v58 = vpop.permute.xlu1 %255  ;;  %946 = vmax.xlane.f32.xlu0 %v945_v57 }
 0x24b   :  { %v602_v61 = vadd.f32 %v4580_v10, %v256_v58 }
 0x24c   :  { %480 = vbcast.lane.b32.xlu1 %v4556_v1, 264  ;;  %v4705_v55 = vpop.permute.xlu0 %325 }
 0x24d   :  { %v730_v2 = vmul.f32 0.2, %v602_v61  ;;  %vm666_vm10 = vcmp.gt.f32.partialorder %v602_v61, 0.0 }
 0x24e   :  { %v260_v3 = vpop.permute.xlu1 %259 }
 0x24f   :  { %v603_v11 = vadd.f32 %v4580_v10, %v260_v3  ;;  %v794_v13 = vsel %vm666_vm10, %v602_v61, %v730_v2 }
 0x250   :  { %488 = vbcast.lane.b32.xlu1 %v4556_v1, 280  ;;  %v4672_v14 = vsel %vm82_vm11, %v794_v13, -9e+15 }
 0x251   :  { %v731_v18 = vmul.f32 0.2, %v603_v11  ;;  %v951_v19 = vsel %vm932_vm3, %v4672_v14, -inf  ;;  %vm667_vm14 = vcmp.gt.f32.partialorder %v603_v11, 0.0 }
 0x252   :  { %v4679_v22 = vpop.permute.xlu1 %270  ;;  %952 = vmax.xlane.f32.xlu0 %v951_v19  ;;  %v552_v19 = vcombine.high %v4573_v8, %v4573_v8 }
 0x253   :  { %v795_v23 = vsel %vm667_vm14, %v603_v11, %v731_v18 }
 0x254   :  { %461 = vbcast.lane.b32.xlu1 %v4551_v62, 296  ;;  %v4684_v27 = vsel %vm83_vm13, %v795_v23, -9e+15 }
 0x255   :  { %v954_v28 = vsel %vm932_vm3, %v4684_v27, -inf }
 0x256   :  { %v275_v29 = vpop.permute.xlu1 %274  ;;  %955 = vmax.xlane.f32.xlu0 %v954_v28 }
 0x257   :  { %v606_v34 = vadd.f32 %v4642_v54, %v275_v29 }
 0x258   :  { %465 = vbcast.lane.b32.xlu1 %v4551_v62, 304 }
 0x259   :  { %v734_v37 = vmul.f32 0.2, %v606_v34  ;;  %vm670_vm15 = vcmp.gt.f32.partialorder %v606_v34, 0.0 }
 0x25a   :  { %v4698_v50 = vpop.permute.xlu1 %278  ;;  %958 = vmax.xlane.f32.xlu0 %v957_v40 }
 0x25b   :  { %v798_v51 = vsel %vm670_vm15, %v606_v34, %v734_v37  ;;  %v4736_v37 = vrot.slane %v552_v19, %v4528_v48 }
 0x25c   :  { %469 = vbcast.lane.b32.xlu1 %v4551_v62, 312  ;;  %v4703_v52 = vsel %vm78_vm4, %v798_v51, -9e+15  ;;  %v4713_v62 = vpop.permute.xlu0 %352 }
 0x25d   :  { %v963_v57 = vsel %vm932_vm3, %v4703_v52, -inf }
 0x25e   :  { %v283_v58 = vpop.permute.xlu1 %282  ;;  %964 = vmax.xlane.f32.xlu0 %v963_v57 }
 0x25f   :  { %v608_v59 = vadd.f32 %v4642_v54, %v283_v58 }
 0x260   :  { %496 = vbcast.lane.b32.xlu1 %v4556_v1, 296  ;;  %v4725_v23 = vpop.permute.xlu0 %360 }
 0x261   :  { %v736_v61 = vmul.f32 0.2, %v608_v59  ;;  %vm672_vm2 = vcmp.gt.f32.partialorder %v608_v59, 0.0 }
 0x262   :  { %v4711_v2 = vpop.permute.xlu1 %286 }
 0x263   :  { %v800_v3 = vsel %vm672_vm2, %v608_v59, %v736_v61 }
 0x264   :  { %504 = vbcast.lane.b32.xlu1 %v4556_v1, 312  ;;  %v4718_v7 = vsel %vm80_vm9, %v800_v3, -9e+15  ;;  %v554_v1 = vcombine.high %v4623_v36, %v4623_v36  ;;  %v4743_v57 = vpop.permute.xlu0 %371 }
 0x265   :  { %v969_v11 = vsel %vm932_vm3, %v4718_v7, -inf }
 0x266   :  { %v291_v13 = vpop.permute.xlu1 %290  ;;  %970 = vmax.xlane.f32.xlu0 %v969_v11  ;;  %v4741_v51 = vrot.slane %v554_v1, %v4528_v48 }
 0x267   :  { %v610_v18 = vadd.f32 %v4642_v54, %v291_v13 }
 0x268   :  { %v620_v61 = vadd.f32 %v4741_v51, %v4653_v60  ;;  %v4754_v13 = vpop.permute.xlu0 %379  ;;  %v622_v1 = vadd.f32 %v4741_v51, %v4674_v16  ;;  %v597_v60 = vadd.f32 %v4580_v10, %v4591_v15  ;;  %v618_v10 = vadd.f32 %v4736_v37, %v4705_v55 }
 0x269   :  { %v738_v24 = vmul.f32 0.2, %v610_v18  ;;  %vm674_vm5 = vcmp.gt.f32.partialorder %v610_v18, 0.0 }
 0x26a   :  { %v4727_v28 = vpop.permute.xlu1 %294  ;;  %vm684_vm8 = vcmp.gt.f32.partialorder %v620_v61, 0.0  ;;  %vm686_vm12 = vcmp.gt.f32.partialorder %v622_v1, 0.0  ;;  %v725_v15 = vmul.f32 0.2, %v597_v60  ;;  %vm661_vm14 = vcmp.gt.f32.partialorder %v597_v60, 0.0 }
 0x26b   :  { %v802_v29 = vsel %vm674_vm5, %v610_v18, %v738_v24  ;;  %v748_v24 = vmul.f32 0.2, %v620_v61  ;;  %vm665_vm5 = vcmp.gt.f32.partialorder %v601_v0, 0.0 }
 0x26c   :  { %v4733_v34 = vsel %vm82_vm11, %v802_v29, -9e+15 }
 0x26d   :  { %v975_v8 = vsel %vm932_vm3, %v4733_v34, -inf  ;;  %v812_v49 = vsel %vm684_vm8, %v620_v61, %v748_v24  ;;  %vm682_vm8 = vcmp.gt.f32.partialorder %v618_v10, 0.0 }
 0x26e   :  { %v302_v40 = vpop.permute.xlu1 %301  ;;  %976 = vmax.xlane.f32.xlu0 %v975_v8  ;;  %v4789_v24 = vsel %vm76_vm1, %v812_v49, -9e+15  ;;  %v789_v49 = vsel %vm661_vm14, %v597_v60, %v725_v15  ;;  %v624_v60 = vadd.f32 %v4741_v51, %v4713_v62 }
 0x26f   :  { %v612_v36 = vadd.f32 %v4736_v37, %v302_v40  ;;  %v507_v40 = vcombine.high %v4567_v6, %v4567_v6  ;;  %6475 = vst [vmem:[#allocation28_spill] sm:$0xff] %v4789_v24 }
 0x271   :  { %v740_v58 = vmul.f32 0.2, %v612_v36  ;;  %vm676_vm7 = vcmp.gt.f32.partialorder %v612_v36, 0.0 }
 0x272   :  { %v4746_v59 = vpop.permute.xlu1 %305 }
 0x273   :  { %v804_v3 = vsel %vm676_vm7, %v612_v36, %v740_v58  ;;  %v750_v58 = vmul.f32 0.2, %v622_v1  ;;  %vm81_vm7 = vcmp.gt.f32.partialorder %v4803_v9, 0.0 }
 0x274   :  { %v4752_v11 = vsel %vm76_vm1, %v804_v3, -9e+15  ;;  %v616_v3 = vadd.f32 %v4736_v37, %v4692_v33  ;;  %v4782_v33 = vld [vmem:[%s6375_s1 + $0x8] sm:$0xff]  ;;  %s4369_s1 = smov 64  }
 0x275   :  { %v981_v18 = vsel %vm932_vm3, %v4752_v11, -inf  ;;  %6474 = vst [vmem:[#allocation27_spill] sm:$0xff] %v4782_v33  ;;  %v814_v53 = vsel %vm686_vm12, %v622_v1, %v750_v58  ;;  %vm77_vm15 = vcmp.gt.f32.partialorder %v4782_v33, 0.0  ;;  %v746_v58 = vmul.f32 0.2, %v618_v10 }
 0x276   :  { %v310_v19 = vpop.permute.xlu1 %309  ;;  %982 = vmax.xlane.f32.xlu0 %v981_v18  ;;  %v4769_v18 = vpop.permute.xlu0 %406  ;;  %vm680_vm2 = vcmp.gt.f32.partialorder %v616_v3, 0.0  ;;  %v4818_v42 = vsel %vm77_vm15, %v789_v49, -9e+15  ;;  %v752_v49 = vmul.f32 0.2, %v624_v60  ;;  %vm688_vm12 = vcmp.gt.f32.partialorder %v624_v60, 0.0 }
 0x277   :  { %v614_v29 = vadd.f32 %v4736_v37, %v310_v19 }
 0x279   :  { %v742_v8 = vmul.f32 0.2, %v614_v29  ;;  %vm678_vm10 = vcmp.gt.f32.partialorder %v614_v29, 0.0 }
 0x27a   :  { %v4765_v36 = vpop.permute.xlu1 %313  ;;  %v4796_v46 = vpop.permute.xlu0 %414 }
 0x27b   :  { %v806_v16 = vsel %vm678_vm10, %v614_v29, %v742_v8  ;;  %v521_v29 = vrot.slane %v507_v40, %v4565_v5  ;;  %v744_v8 = vmul.f32 0.2, %v616_v3  ;;  %v605_v40 = vadd.f32 %v4642_v54, %v4679_v22 }
 0x27c   :  { %v4773_v19 = vsel %vm78_vm4, %v806_v16, -9e+15  ;;  %v729_v16 = vmul.f32 0.2, %v601_v0  ;;  %v4812_v22 = vsel %vm78_vm4, %v814_v53, -9e+15 }
 0x27d   :  { %v987_v6 = vsel %vm932_vm3, %v4773_v19, -inf  ;;  %v4806_v55 = vrot.slane %v521_v29, %v4565_v5  ;;  %v808_v15 = vsel %vm680_vm2, %v616_v3, %v744_v8  ;;  %v733_v39 = vmul.f32 0.2, %v605_v40 }
 0x27e   :  { %v4785_v61 = vpop.permute.xlu1 %340  ;;  %988 = vmax.xlane.f32.xlu0 %v987_v6  ;;  %v1005_v6 = vsel %vm932_vm3, %v4789_v24, -inf  ;;  %v1011_v53 = vsel %vm932_vm3, %v4812_v22, -inf  ;;  %v793_v30 = vsel %vm665_vm5, %v601_v0, %v729_v16  ;;  %v523_v47 = vcombine.high %v521_v29, %v521_v29  ;;  %v4837_v25 = vpop.permute.xlu0 %387 }
 0x27f   :  { %v4827_v62 = vrot.slane %v4806_v55, %v4528_v48  ;;  %v4833_v8 = vsel %vm80_vm9, %v808_v15, -9e+15  ;;  %vm669_vm10 = vcmp.gt.f32.partialorder %v605_v40, 0.0  ;;  %v936_v0 = vsel %vm932_vm3, %v4818_v42, -inf }
 0x280   :  { %6477 = vst [vmem:[#allocation30_spill] sm:$0xff] %v4833_v8  ;;  %v810_v29 = vsel %vm682_vm8, %v618_v10, %v746_v58  ;;  %v4843_v16 = vsel %vm81_vm7, %v793_v30, -9e+15  ;;  %v609_v15 = vadd.f32 %v4642_v54, %v4711_v2  ;;  %v993_v43 = vsel %vm932_vm3, %v4833_v8, -inf }
 0x281   :  { %v4850_v41 = vrot.slane %v523_v47, %v4565_v5  ;;  %v4856_v10 = vsel %vm82_vm11, %v810_v29, -9e+15  ;;  %v628_v58 = vadd.f32 %v4827_v62, %v4743_v57  ;;  %v948_v2 = vsel %vm932_vm3, %v4843_v16, -inf }
 0x282   :  { %v4808_v1 = vpop.permute.xlu1 %348  ;;  %1006 = vmax.xlane.f32.xlu0 %v1005_v6  ;;  %v607_v6 = vadd.f32 %v4642_v54, %v4698_v50  ;;  %v626_v50 = vadd.f32 %v4741_v51, %v4725_v23  ;;  %v797_v23 = vsel %vm669_vm10, %v605_v40, %v733_v39  ;;  %6478 = vst [vmem:[#allocation31_spill] sm:$0xff] %v4856_v10  ;;  %v4866_v47 = vpop.permute.xlu0 %395  ;;  %v999_v40 = vsel %vm932_vm3, %v4856_v10, -inf }
 0x283   :  { %v4864_v39 = vsel %vm77_vm15, %v797_v23, -9e+15  ;;  %v611_v5 = vadd.f32 %v4642_v54, %v4727_v28  ;;  %v4874_v29 = vrot.slane %v4850_v41, %v4528_v48  ;;  %vm673_vm5 = vcmp.gt.f32.partialorder %v609_v15, 0.0 }
 0x284   :  { %vm671_vm14 = vcmp.gt.f32.partialorder %v607_v6, 0.0  ;;  %v754_v30 = vmul.f32 0.2, %v626_v50  ;;  %vm690_vm2 = vcmp.gt.f32.partialorder %v626_v50, 0.0  ;;  %v756_v23 = vmul.f32 0.2, %v628_v58 }
 0x285   :  { %v630_v54 = vadd.f32 %v4827_v62, %v4754_v13  ;;  %v960_v28 = vsel %vm932_vm3, %v4864_v39, -inf  ;;  %vm692_vm8 = vcmp.gt.f32.partialorder %v628_v58, 0.0  ;;  %vm675_vm10 = vcmp.gt.f32.partialorder %v611_v5, 0.0 }
 0x286   :  { %v4829_v3 = vpop.permute.xlu1 %321  ;;  %1012 = vmax.xlane.f32.xlu0 %v1011_v53  ;;  %v735_v53 = vmul.f32 0.2, %v607_v6 }
 0x288   :  { %937 = vmax.xlane.f32.xlu1 %v936_v0  ;;  %v816_v0 = vsel %vm688_vm12, %v624_v60, %v752_v49  ;;  %v799_v57 = vsel %vm671_vm14, %v607_v6, %v735_v53  ;;  %v818_v6 = vsel %vm690_vm2, %v626_v50, %v754_v30  ;;  %v758_v50 = vmul.f32 0.2, %v630_v54 }
 0x289   :  { %v4880_v49 = vsel %vm80_vm9, %v816_v0, -9e+15  ;;  %v4888_v53 = vsel %vm79_vm6, %v799_v57, -9e+15  ;;  %v613_v0 = vadd.f32 %v4736_v37, %v4746_v59  ;;  %v4898_v13 = vsel %vm82_vm11, %v818_v6, -9e+15  ;;  %v4902_v57 = vpop.permute.xlu0 %422 }
 0x28a   :  { %v4852_v38 = vpop.permute.xlu1 %329  ;;  %994 = vmax.xlane.f32.xlu0 %v993_v43  ;;  %v737_v43 = vmul.f32 0.2, %v609_v15  ;;  %6479 = vst [vmem:[#allocation32_spill] sm:$0xff] %v4880_v49  ;;  %6480 = vst [vmem:[#allocation33_spill] sm:$0xff] %v4898_v13  ;;  %v636_v30 = vadd.f32 %v4874_v29, %v4769_v18  ;;  %v966_v59 = vsel %vm932_vm3, %v4888_v53, -inf  ;;  %vm694_vm12 = vcmp.gt.f32.partialorder %v630_v54, 0.0 }
 0x28b   :  { %v615_v6 = vadd.f32 %v4736_v37, %v4765_v36  ;;  %vm677_vm14 = vcmp.gt.f32.partialorder %v613_v0, 0.0  ;;  %v822_v36 = vsel %vm694_vm12, %v630_v54, %v758_v50 }
 0x28c   :  { %949 = vmax.xlane.f32.xlu1 %v948_v2  ;;  %v739_v2 = vmul.f32 0.2, %v611_v5  ;;  %v801_v20 = vsel %vm673_vm5, %v609_v15, %v737_v43  ;;  %v741_v43 = vmul.f32 0.2, %v613_v0  ;;  %vm700_vm2 = vcmp.gt.f32.partialorder %v636_v30, 0.0 }
 0x28d   :  { %v4908_v15 = vsel %vm81_vm7, %v801_v20, -9e+15  ;;  %v638_v20 = vadd.f32 %v4874_v29, %v4796_v46  ;;  %v4936_v54 = vsel %vm78_vm4, %v822_v36, -9e+15  ;;  %vm679_vm5 = vcmp.gt.f32.partialorder %v615_v6, 0.0 }
 0x28e   :  { %v4876_v60 = vpop.permute.xlu1 %356  ;;  %1000 = vmax.xlane.f32.xlu0 %v999_v40  ;;  %v1017_v40 = vsel %vm932_vm3, %v4880_v49, -inf  ;;  %v803_v18 = vsel %vm675_vm10, %v611_v5, %v739_v2  ;;  %v431_v2 = vpop.permute.xlu0 %430  ;;  %v805_v49 = vsel %vm677_vm14, %v613_v0, %v741_v43  ;;  %6482 = vst [vmem:[#allocation35_spill] sm:$0xff] %v4936_v54  ;;  %v623_v43 = vadd.f32 %v4741_v51, %v4808_v1 }
 0x28f   :  { %v4926_v5 = vsel %vm83_vm13, %v803_v18, -9e+15  ;;  %v766_v50 = vmul.f32 0.2, %v638_v20  ;;  %v632_v18 = vadd.f32 %v4827_v62, %v4837_v25  ;;  %v4944_v0 = vsel %vm77_vm15, %v805_v49, -9e+15 }
 0x290   :  { %961 = vmax.xlane.f32.xlu1 %v960_v28  ;;  %v820_v28 = vsel %vm692_vm8, %v628_v58, %v756_v23  ;;  %v764_v23 = vmul.f32 0.2, %v636_v30  ;;  %vm702_vm8 = vcmp.gt.f32.partialorder %v638_v20, 0.0  ;;  %v1035_v36 = vsel %vm932_vm3, %v4936_v54, -inf }
 0x291   :  { %v4918_v58 = vsel %vm76_vm1, %v820_v28, -9e+15  ;;  %v621_v28 = vadd.f32 %v4741_v51, %v4785_v61  ;;  %v634_v49 = vadd.f32 %v4827_v62, %v4866_v47  ;;  %v984_v1 = vsel %vm932_vm3, %v4944_v0, -inf }
 0x292   :  { %v4894_v35 = vpop.permute.xlu1 %364  ;;  %1018 = vmax.xlane.f32.xlu0 %v1017_v40  ;;  %v1023_v40 = vsel %vm932_vm3, %v4898_v13, -inf  ;;  %6481 = vst [vmem:[#allocation34_spill] sm:$0xff] %v4918_v58  ;;  %v1029_v13 = vsel %vm932_vm3, %v4918_v58, -inf  ;;  %v828_v61 = vsel %vm700_vm2, %v636_v30, %v764_v23  ;;  %v760_v30 = vmul.f32 0.2, %v632_v18  ;;  %v442_v23 = vpop.permute.xlu0 %441 }
 0x293   :  { %v4954_v25 = vsel %vm76_vm1, %v828_v61, -9e+15  ;;  %vm685_vm10 = vcmp.gt.f32.partialorder %v621_v28, 0.0  ;;  %vm696_vm12 = vcmp.gt.f32.partialorder %v632_v18, 0.0  ;;  %v617_v61 = vadd.f32 %v4736_v37, %v4829_v3 }
 0x294   :  { %967 = vmax.xlane.f32.xlu1 %v966_v59  ;;  %v972_v59 = vsel %vm932_vm3, %v4908_v15, -inf  ;;  %6483 = vst [vmem:[#allocation36_spill] sm:$0xff] %v4954_v25  ;;  %v553_v47 = vcombine.high %v4806_v55, %v4806_v55  ;;  %vm687_vm14 = vcmp.gt.f32.partialorder %v623_v43, 0.0  ;;  %vm698_vm2 = vcmp.gt.f32.partialorder %v634_v49, 0.0 }
 0x296   :  { %v4914_v8 = vpop.permute.xlu1 %375  ;;  %1024 = vmax.xlane.f32.xlu0 %v1023_v40  ;;  %v743_v40 = vmul.f32 0.2, %v615_v6 }
 0x298   :  { %973 = vmax.xlane.f32.xlu1 %v972_v59  ;;  %v978_v59 = vsel %vm932_vm3, %v4926_v5, -inf  ;;  %v807_v58 = vsel %vm679_vm5, %v615_v6, %v743_v40  ;;  %v751_v40 = vmul.f32 0.2, %v623_v43  ;;  %vm681_vm5 = vcmp.gt.f32.partialorder %v617_v61, 0.0 }
 0x299   :  { %v4962_v6 = vsel %vm79_vm6, %v807_v58, -9e+15  ;;  %v762_v58 = vmul.f32 0.2, %v634_v49 }
 0x29a   :  { %v4932_v46 = vpop.permute.xlu1 %383  ;;  %1030 = vmax.xlane.f32.xlu0 %v1029_v13  ;;  %v749_v13 = vmul.f32 0.2, %v621_v28  ;;  %6484 = vst [vmem:[#allocation37_spill] sm:$0xff] %v4962_v6  ;;  %v990_v3 = vsel %vm932_vm3, %v4962_v6, -inf }
 0x29c   :  { %979 = vmax.xlane.f32.xlu1 %v978_v59  ;;  %v830_v59 = vsel %vm702_vm8, %v638_v20, %v766_v50  ;;  %v813_v54 = vsel %vm685_vm10, %v621_v28, %v749_v13  ;;  %v640_v50 = vadd.f32 %v4874_v29, %v4902_v57  ;;  %v450_v28 = vpop.permute.xlu0 %449  ;;  %v745_v13 = vmul.f32 0.2, %v617_v61 }
 0x29d   :  { %v4974_v20 = vsel %vm78_vm4, %v830_v59, -9e+15  ;;  %v4982_v55 = vsel %vm77_vm15, %v813_v54, -9e+15  ;;  %v619_v59 = vadd.f32 %v4736_v37, %v4852_v38  ;;  %v4989_v57 = vrot.slane %v553_v47, %v4528_v48 }
 0x29e   :  { %v4950_v24 = vpop.permute.xlu1 %410  ;;  %1036 = vmax.xlane.f32.xlu0 %v1035_v36  ;;  %v1053_v36 = vsel %vm932_vm3, %v4954_v25, -inf  ;;  %6485 = vst [vmem:[#allocation38_spill] sm:$0xff] %v4974_v20  ;;  %v815_v25 = vsel %vm687_vm14, %v623_v43, %v751_v40  ;;  %v1008_v38 = vsel %vm932_vm3, %v4982_v55, -inf  ;;  %v826_v37 = vsel %vm698_vm2, %v634_v49, %v762_v58 }
 0x29f   :  { %v5002_v43 = vsel %vm79_vm6, %v815_v25, -9e+15  ;;  %vm704_vm8 = vcmp.gt.f32.partialorder %v640_v50, 0.0  ;;  %v747_v40 = vmul.f32 0.2, %v619_v59  ;;  %v625_v47 = vadd.f32 %v4741_v51, %v4876_v60 }
 0x2a0   :  { %985 = vmax.xlane.f32.xlu1 %v984_v1  ;;  %v824_v1 = vsel %vm696_vm12, %v632_v18, %v760_v30  ;;  %v768_v18 = vmul.f32 0.2, %v640_v50  ;;  %v642_v30 = vadd.f32 %v4874_v29, %v431_v2  ;;  %v555_v2 = vcombine.high %v4850_v41, %v4850_v41 }
 0x2a1   :  { %v4995_v54 = vsel %vm80_vm9, %v824_v1, -9e+15  ;;  %v809_v1 = vsel %vm681_vm5, %v617_v61, %v745_v13  ;;  %v5014_v49 = vsel %vm82_vm11, %v826_v37, -9e+15  ;;  %vm683_vm10 = vcmp.gt.f32.partialorder %v619_v59, 0.0 }
 0x2a2   :  { %v4970_v10 = vpop.permute.xlu1 %418  ;;  %1054 = vmax.xlane.f32.xlu0 %v1053_v36  ;;  %v1059_v36 = vsel %vm932_vm3, %v4974_v20, -inf  ;;  %6486 = vst [vmem:[#allocation39_spill] sm:$0xff] %v4995_v54  ;;  %6487 = vst [vmem:[#allocation40_spill] sm:$0xff] %v5014_v49  ;;  %v770_v25 = vmul.f32 0.2, %v642_v30  ;;  %v644_v58 = vadd.f32 %v4989_v57, %v442_v23  ;;  %v1014_v60 = vsel %vm932_vm3, %v5002_v43, -inf }
 0x2a3   :  { %v5021_v41 = vsel %vm81_vm7, %v809_v1, -9e+15  ;;  %vm706_vm12 = vcmp.gt.f32.partialorder %v642_v30, 0.0  ;;  %v753_v61 = vmul.f32 0.2, %v625_v47  ;;  %v627_v13 = vadd.f32 %v4741_v51, %v4894_v35 }
 0x2a4   :  { %991 = vmax.xlane.f32.xlu1 %v990_v3  ;;  %v1041_v3 = vsel %vm932_vm3, %v4995_v54, -inf  ;;  %v832_v54 = vsel %vm704_vm8, %v640_v50, %v768_v18  ;;  %v1047_v37 = vsel %vm932_vm3, %v5014_v49, -inf  ;;  %v5028_v23 = vrot.slane %v555_v2, %v4528_v48 }
 0x2a5   :  { %v5034_v50 = vsel %vm80_vm9, %v832_v54, -9e+15  ;;  %vm689_vm14 = vcmp.gt.f32.partialorder %v625_v47, 0.0  ;;  %v772_v18 = vmul.f32 0.2, %v644_v58  ;;  %v646_v1 = vadd.f32 %v4989_v57, %v450_v28 }
 0x2a6   :  { %v4991_v6 = vpop.permute.xlu1 %391  ;;  %1060 = vmax.xlane.f32.xlu0 %v1059_v36  ;;  %6488 = vst [vmem:[#allocation41_spill] sm:$0xff] %v5034_v50  ;;  %v996_v35 = vsel %vm932_vm3, %v5021_v41, -inf  ;;  %v834_v51 = vsel %vm706_vm12, %v642_v30, %v770_v25  ;;  %vm708_vm2 = vcmp.gt.f32.partialorder %v644_v58, 0.0  ;;  %v755_v2 = vmul.f32 0.2, %v627_v13 }
 0x2a7   :  { %v629_v54 = vadd.f32 %v4827_v62, %v4914_v8  ;;  %v5051_v30 = vsel %vm82_vm11, %v834_v51, -9e+15  ;;  %vm691_vm5 = vcmp.gt.f32.partialorder %v627_v13, 0.0  ;;  %v774_v25 = vmul.f32 0.2, %v646_v1 }
 0x2a8   :  { %1009 = vmax.xlane.f32.xlu1 %v1008_v38  ;;  %v477_v38 = vpop.permute.xlu0 %476  ;;  %6489 = vst [vmem:[#allocation42_spill] sm:$0xff] %v5051_v30  ;;  %v836_v48 = vsel %vm708_vm2, %v644_v58, %v772_v18  ;;  %vm710_vm8 = vcmp.gt.f32.partialorder %v646_v1, 0.0  ;;  %v1071_v51 = vsel %vm932_vm3, %v5051_v30, -inf }
 0x2a9   :  { %v5068_v58 = vsel %vm76_vm1, %v836_v48, -9e+15  ;;  %v637_v48 = vadd.f32 %v4874_v29, %v4950_v24 }
 0x2aa   :  { %v5010_v36 = vpop.permute.xlu1 %399  ;;  %1042 = vmax.xlane.f32.xlu0 %v1041_v3  ;;  %v811_v3 = vsel %vm683_vm10, %v619_v59, %v747_v40  ;;  %6490 = vst [vmem:[#allocation43_spill] sm:$0xff] %v5068_v58  ;;  %vm693_vm10 = vcmp.gt.f32.partialorder %v629_v54, 0.0 }
 0x2ab   :  { %v5041_v59 = vsel %vm83_vm13, %v811_v3, -9e+15  ;;  %v652_v3 = vadd.f32 %v5028_v23, %v477_v38 }
 0x2ac   :  { %1015 = vmax.xlane.f32.xlu1 %v1014_v60  ;;  %v485_v40 = vpop.permute.xlu0 %484  ;;  %v1065_v60 = vsel %vm932_vm3, %v5034_v50, -inf }
 0x2ad   :  { %v780_v38 = vmul.f32 0.2, %v652_v3  ;;  %v654_v18 = vadd.f32 %v5028_v23, %v485_v40  ;;  %vm716_vm12 = vcmp.gt.f32.partialorder %v652_v3, 0.0 }
 0x2ae   :  { %v5030_v20 = vpop.permute.xlu1 %426  ;;  %1048 = vmax.xlane.f32.xlu0 %v1047_v37  ;;  %v817_v37 = vsel %vm689_vm14, %v625_v47, %v753_v61  ;;  %v757_v47 = vmul.f32 0.2, %v629_v54  ;;  %v631_v61 = vadd.f32 %v4827_v62, %v4932_v46  ;;  %v838_v46 = vsel %vm710_vm8, %v646_v1, %v774_v25 }
 0x2af   :  { %v5058_v8 = vsel %vm81_vm7, %v817_v37, -9e+15  ;;  %v5085_v1 = vsel %vm78_vm4, %v838_v46, -9e+15  ;;  %v782_v25 = vmul.f32 0.2, %v654_v18  ;;  %v844_v49 = vsel %vm716_vm12, %v652_v3, %v780_v38 }
 0x2b0   :  { %997 = vmax.xlane.f32.xlu1 %v996_v35  ;;  %v1002_v35 = vsel %vm932_vm3, %v5041_v59, -inf  ;;  %v458_v37 = vpop.permute.xlu0 %457  ;;  %v821_v30 = vsel %vm693_vm10, %v629_v54, %v757_v47  ;;  %6491 = vst [vmem:[#allocation44_spill] sm:$0xff] %v5085_v1  ;;  %vm695_vm14 = vcmp.gt.f32.partialorder %v631_v61, 0.0  ;;  %vm718_vm2 = vcmp.gt.f32.partialorder %v654_v18, 0.0 }
 0x2b1   :  { %v5092_v24 = vsel %vm77_vm15, %v821_v30, -9e+15  ;;  %v765_v47 = vmul.f32 0.2, %v637_v48  ;;  %v639_v46 = vadd.f32 %v4874_v29, %v4970_v10  ;;  %v5102_v3 = vsel %vm76_vm1, %v844_v49, -9e+15 }
 0x2b2   :  { %v5047_v28 = vpop.permute.xlu1 %434  ;;  %1066 = vmax.xlane.f32.xlu0 %v1065_v60  ;;  %v819_v60 = vsel %vm691_vm5, %v627_v13, %v755_v2  ;;  %v759_v2 = vmul.f32 0.2, %v631_v61  ;;  %6492 = vst [vmem:[#allocation45_spill] sm:$0xff] %v5102_v3  ;;  %vm701_vm5 = vcmp.gt.f32.partialorder %v637_v48, 0.0  ;;  %v1032_v38 = vsel %vm932_vm3, %v5092_v24, -inf }
 0x2b3   :  { %v5075_v13 = vsel %vm83_vm13, %v819_v60, -9e+15  ;;  %v648_v60 = vadd.f32 %v4989_v57, %v458_v37  ;;  %v1101_v49 = vsel %vm932_vm3, %v5102_v3, -inf  ;;  %vm703_vm10 = vcmp.gt.f32.partialorder %v639_v46, 0.0 }
 0x2b4   :  { %1003 = vmax.xlane.f32.xlu1 %v1002_v35  ;;  %v1020_v35 = vsel %vm932_vm3, %v5058_v8, -inf  ;;  %v493_v54 = vpop.permute.xlu0 %492 }
 0x2b5   :  { %v776_v30 = vmul.f32 0.2, %v648_v60  ;;  %vm712_vm8 = vcmp.gt.f32.partialorder %v648_v60, 0.0  ;;  %v656_v21 = vadd.f32 %v5028_v23, %v493_v54  ;;  %v641_v54 = vadd.f32 %v4874_v29, %v5030_v20 }
 0x2b6   :  { %v5064_v50 = vpop.permute.xlu1 %445  ;;  %1072 = vmax.xlane.f32.xlu0 %v1071_v51  ;;  %v1077_v51 = vsel %vm932_vm3, %v5068_v58, -inf  ;;  %v823_v58 = vsel %vm695_vm14, %v631_v61, %v759_v2  ;;  %v767_v61 = vmul.f32 0.2, %v639_v46  ;;  %v633_v2 = vadd.f32 %v4827_v62, %v4991_v6 }
 0x2b7   :  { %v5108_v10 = vsel %vm79_vm6, %v823_v58, -9e+15  ;;  %v635_v6 = vadd.f32 %v4827_v62, %v5010_v36 }
 0x2b8   :  { %1021 = vmax.xlane.f32.xlu1 %v1020_v35  ;;  %v1026_v35 = vsel %vm932_vm3, %v5075_v13, -inf  ;;  %v1038_v58 = vsel %vm932_vm3, %v5108_v10, -inf  ;;  %vm697_vm12 = vcmp.gt.f32.partialorder %v633_v2, 0.0 }
 0x2b9   :  { %vm699_vm14 = vcmp.gt.f32.partialorder %v635_v6, 0.0 }
 0x2ba   :  { %v5081_v40 = vpop.permute.xlu1 %453  ;;  %1078 = vmax.xlane.f32.xlu0 %v1077_v51  ;;  %v1083_v51 = vsel %vm932_vm3, %v5085_v1, -inf }
 0x2bc   :  { %1027 = vmax.xlane.f32.xlu1 %v1026_v35  ;;  %v846_v35 = vsel %vm718_vm2, %v654_v18, %v782_v25  ;;  %v501_v25 = vpop.permute.xlu0 %500  ;;  %vm720_vm2 = vcmp.gt.f32.partialorder %v656_v21, 0.0 }
 0x2bd   :  { %v5118_v18 = vsel %vm78_vm4, %v846_v35, -9e+15  ;;  %v831_v35 = vsel %vm703_vm10, %v639_v46, %v767_v61 }
 0x2be   :  { %v5098_v37 = vpop.permute.xlu1 %480  ;;  %1084 = vmax.xlane.f32.xlu0 %v1083_v51  ;;  %v829_v51 = vsel %vm701_vm5, %v637_v48, %v765_v47  ;;  %6493 = vst [vmem:[#allocation46_spill] sm:$0xff] %v5118_v18  ;;  %v761_v47 = vmul.f32 0.2, %v633_v2  ;;  %v5142_v46 = vsel %vm79_vm6, %v831_v35, -9e+15 }
 0x2bf   :  { %v5126_v48 = vsel %vm77_vm15, %v829_v51, -9e+15 }
 0x2c0   :  { %1033 = vmax.xlane.f32.xlu1 %v1032_v38  ;;  %v840_v38 = vsel %vm712_vm8, %v648_v60, %v776_v30  ;;  %v1056_v36 = vsel %vm932_vm3, %v5126_v48, -inf  ;;  %v763_v30 = vmul.f32 0.2, %v635_v6  ;;  %vm705_vm8 = vcmp.gt.f32.partialorder %v641_v54, 0.0 }
 0x2c1   :  { %v5135_v60 = vsel %vm80_vm9, %v840_v38, -9e+15  ;;  %v784_v38 = vmul.f32 0.2, %v656_v21 }
 0x2c2   :  { %v5114_v12 = vpop.permute.xlu1 %488  ;;  %1102 = vmax.xlane.f32.xlu0 %v1101_v49  ;;  %v1107_v49 = vsel %vm932_vm3, %v5118_v18, -inf  ;;  %6494 = vst [vmem:[#allocation47_spill] sm:$0xff] %v5135_v60  ;;  %v1089_v61 = vsel %vm932_vm3, %v5135_v60, -inf  ;;  %v658_v18 = vadd.f32 %v5028_v23, %v501_v25 }
 0x2c3   :  { %v848_v25 = vsel %vm720_vm2, %v656_v21, %v784_v38 }
 0x2c4   :  { %1039 = vmax.xlane.f32.xlu1 %v1038_v58  ;;  %v825_v58 = vsel %vm697_vm12, %v633_v2, %v761_v47  ;;  %v769_v2 = vmul.f32 0.2, %v641_v54  ;;  %v643_v47 = vadd.f32 %v4874_v29, %v5047_v28  ;;  %vm722_vm10 = vcmp.gt.f32.partialorder %v658_v18, 0.0 }
 0x2c5   :  { %v5154_v20 = vsel %vm81_vm7, %v825_v58, -9e+15  ;;  %v645_v28 = vadd.f32 %v4989_v57, %v5064_v50 }
 0x2c6   :  { %v5131_v3 = vpop.permute.xlu1 %461  ;;  %1108 = vmax.xlane.f32.xlu0 %v1107_v49  ;;  %v1044_v1 = vsel %vm932_vm3, %v5154_v20, -inf  ;;  %v771_v21 = vmul.f32 0.2, %v643_v47  ;;  %v833_v38 = vsel %vm705_vm8, %v641_v54, %v769_v2  ;;  %vm707_vm12 = vcmp.gt.f32.partialorder %v643_v47, 0.0 }
 0x2c7   :  { %v935_v62 = vpop.xlane.xlu0 %934  ;;  %v5184_v50 = vsel %vm81_vm7, %v833_v38, -9e+15  ;;  %v773_v54 = vmul.f32 0.2, %v645_v28 }
 0x2c8   :  { %v1125_v51 = vsub.f32 %v4596_v17, %v935_v62  ;;  %1057 = vmax.xlane.f32.xlu1 %v1056_v36  ;;  %v1062_v62 = vsel %vm932_vm3, %v5142_v46, -inf  ;;  %v827_v36 = vsel %vm699_vm14, %v635_v6, %v763_v30  ;;  %v835_v2 = vsel %vm707_vm12, %v643_v47, %v771_v21 }
 0x2c9   :  { %v5167_v29 = vsel %vm83_vm13, %v827_v36, -9e+15  ;;  %vm709_vm14 = vcmp.gt.f32.partialorder %v645_v28, 0.0  ;;  %v653_v47 = vadd.f32 %v5028_v23, %v5098_v37  ;;  %v655_v37 = vadd.f32 %v5028_v23, %v5114_v12 }
 0x2ca   :  { %v466_v49 = vpop.permute.xlu1 %465  ;;  %1090 = vmax.xlane.f32.xlu0 %v1089_v61  ;;  %v1189_v35 = vmul.f32 1.442695, %v1125_v51  ;;  %v837_v21 = vsel %vm709_vm14, %v645_v28, %v773_v54 }
 0x2cb   :  { %v650_v17 = vadd.f32 %v4989_v57, %v466_v49  ;;  %v786_v49 = vmul.f32 0.2, %v658_v18  ;;  %v783_v12 = vmul.f32 0.2, %v655_v37  ;;  %vm719_vm8 = vcmp.gt.f32.partialorder %v655_v37, 0.0 }
 0x2cc   :  { %1063 = vmax.xlane.f32.xlu1 %v1062_v62  ;;  %3976 = vpow2.f32 %v1189_v35  ;;  %v647_v35 = vadd.f32 %v4989_v57, %v5081_v40  ;;  %v5199_v40 = vsel %vm83_vm13, %v835_v2, -9e+15 }
 0x2cd   :  { %v778_v61 = vmul.f32 0.2, %v650_v17  ;;  %vm714_vm5 = vcmp.gt.f32.partialorder %v650_v17, 0.0  ;;  %v850_v62 = vsel %vm722_vm10, %v658_v18, %v786_v49 }
 0x2ce   :  { %vm711_vm2 = vcmp.gt.f32.partialorder %v647_v35, 0.0 }
 0x2cf   :  { %v941_v60 = vpop.xlane.xlu0 %940  ;;  %v842_v51 = vsel %vm714_vm5, %v650_v17, %v778_v61  ;;  %v5192_v61 = vsel %vm82_vm11, %v850_v62, -9e+15  ;;  %vm717_vm5 = vcmp.gt.f32.partialorder %v653_v47, 0.0 }
 0x2d0   :  { %v1127_v58 = vsub.f32 %v4617_v31, %v941_v60  ;;  %1045 = vmax.xlane.f32.xlu1 %v1044_v1  ;;  %v5163_v6 = vsel %vm82_vm11, %v842_v51, -9e+15  ;;  %v5175_v31 = vsel %vm80_vm9, %v848_v25, -9e+15  ;;  %v1050_v60 = vsel %vm932_vm3, %v5167_v29, -inf }
 0x2d1   :  { %v1095_v30 = vsel %vm932_vm3, %v5163_v6, -inf  ;;  %v1113_v36 = vsel %vm932_vm3, %v5175_v31, -inf  ;;  %v1068_v25 = vsel %vm932_vm3, %v5184_v50, -inf  ;;  %v775_v51 = vmul.f32 0.2, %v647_v35 }
 0x2d2   :  { %v1193_v17 = vmul.f32 1.442695, %v1127_v58  ;;  %1096 = vmax.xlane.f32.xlu0 %v1095_v30  ;;  %v1119_v58 = vsel %vm932_vm3, %v5192_v61, -inf }
 0x2d3   :  { %v5177_v1 = vpop.xlane.xlu0 %943  ;;  %v839_v62 = vsel %vm711_vm2, %v647_v35, %v775_v51  ;;  %v649_v35 = vadd.f32 %v4989_v57, %v5131_v3 }
 0x2d4   :  { %3978 = vpow2.f32 %v1193_v17  ;;  %1051 = vmax.xlane.f32.xlu1 %v1050_v60  ;;  %v5211_v17 = vsel %vm77_vm15, %v837_v21, -9e+15  ;;  %v781_v60 = vmul.f32 0.2, %v653_v47 }
 0x2d5   :  { %v777_v3 = vmul.f32 0.2, %v649_v35  ;;  %vm713_vm10 = vcmp.gt.f32.partialorder %v649_v35, 0.0 }
 0x2d6   :  { %1114 = vmax.xlane.f32.xlu0 %v1113_v36  ;;  %v5205_v30 = vpop.eup %3976  ;;  %v470_v36 = vpop.permute.xlu1 %469 }
 0x2d7   :  { %v947_v18 = vpop.xlane.xlu0 %946  ;;  %v1317_v28 = vsel %vm932_vm3, %v5205_v30, 0.0 }
 0x2d8   :  { %v1129_v49 = vsub.f32 %v4648_v56, %v947_v18  ;;  %1069 = vmax.xlane.f32.xlu1 %v1068_v25  ;;  %v1074_v56 = vsel %vm932_vm3, %v5199_v40, -inf  ;;  %v1080_v18 = vsel %vm932_vm3, %v5211_v17, -inf }
 0x2da   :  { %v1197_v38 = vmul.f32 1.442695, %v1129_v49  ;;  %1120 = vmax.xlane.f32.xlu0 %v1119_v58  ;;  %v5224_v49 = vsel %vm79_vm6, %v839_v62, -9e+15  ;;  %v845_v58 = vsel %vm717_vm5, %v653_v47, %v781_v60  ;;  %v651_v62 = vadd.f32 %v4989_v57, %v470_v36 }
 0x2db   :  { %v841_v36 = vsel %vm713_vm10, %v649_v35, %v777_v3  ;;  %vm2601_vm5 = vcmask 130048   ;;  %vm2635_vm10 = vcmask 654336  }
 0x2dc   :  { %3980 = vpow2.f32 %v1197_v38  ;;  %1075 = vmax.xlane.f32.xlu1 %v1074_v56  ;;  %v497_v56 = vpop.permute.xlu1 %496  ;;  %v779_v57 = vmul.f32 0.2, %v651_v62  ;;  %vm715_vm12 = vcmp.gt.f32.partialorder %v651_v62, 0.0 }
 0x2de   :  { %v5217_v54 = vpop.eup %3978  ;;  %1318 = vadd.xlane.f32.xlu0 %v1317_v28  ;;  %v5236_v28 = vsel %vm77_vm15, %v845_v58, -9e+15 }
 0x2df   :  { %v953_v2 = vpop.xlane.xlu0 %952  ;;  %v1323_v51 = vsel %vm932_vm3, %v5217_v54, 0.0 }
 0x2e0   :  { %v1131_v25 = vsub.f32 %v4672_v14, %v953_v2  ;;  %1081 = vmax.xlane.f32.xlu1 %v1080_v18  ;;  %v1086_v14 = vsel %vm932_vm3, %v5224_v49, -inf  ;;  %v847_v2 = vsel %vm719_vm8, %v655_v37, %v783_v12  ;;  %v1104_v18 = vsel %vm932_vm3, %v5236_v28, -inf  ;;  %v505_v12 = vpop.permute.xlu1 %504 }
 0x2e1   :  { %v5248_v58 = vsel %vm79_vm6, %v847_v2, -9e+15  ;;  %v657_v37 = vadd.f32 %v5028_v23, %v497_v56  ;;  %v843_v56 = vsel %vm715_vm12, %v651_v62, %v779_v57  ;;  %vm2618_vm8 = vcmask 392192  }
 0x2e2   :  { %v1201_v21 = vmul.f32 1.442695, %v1131_v25  ;;  %1324 = vadd.xlane.f32.xlu0 %v1323_v51  ;;  %v1110_v63 = vsel %vm932_vm3, %v5248_v58, -inf  ;;  %vm2644_vm12 = vcmask 785408  }
 0x2e3   :  { %v5230_v38 = vpop.xlane.xlu0 %955  ;;  %v785_v2 = vmul.f32 0.2, %v657_v37  ;;  %vm721_vm14 = vcmp.gt.f32.partialorder %v657_v37, 0.0 }
 0x2e4   :  { %3982 = vpow2.f32 %v1201_v21  ;;  %1087 = vmax.xlane.f32.xlu1 %v1086_v14 }
 0x2e6   :  { %v5239_v47 = vpop.eup %3980 }
 0x2e7   :  { %v959_v60 = vpop.xlane.xlu0 %958  ;;  %v1329_v25 = vsel %vm932_vm3, %v5239_v47, 0.0 }
 0x2e8   :  { %v1133_v51 = vsub.f32 %v4690_v32, %v959_v60  ;;  %1105 = vmax.xlane.f32.xlu1 %v1104_v18  ;;  %1330 = vadd.xlane.f32.xlu0 %v1329_v25  ;;  %v5256_v60 = vsel %vm81_vm7, %v841_v36, -9e+15  ;;  %v659_v18 = vadd.f32 %v5028_v23, %v505_v12  ;;  %v849_v23 = vsel %vm721_vm14, %v657_v37, %v785_v2 }
 0x2e9   :  { %v1092_v25 = vsel %vm932_vm3, %v5256_v60, -inf  ;;  %v5274_v12 = vsel %vm81_vm7, %v849_v23, -9e+15  ;;  %vm2653_vm14 = vcmask 916480  }
 0x2ea   :  { %v1205_v21 = vmul.f32 1.442695, %v1133_v51  ;;  %vm723_vm2 = vcmp.gt.f32.partialorder %v659_v18, 0.0 }
 0x2eb   :  { %v965_v14 = vpop.xlane.xlu0 %964 }
 0x2ec   :  { %3984 = vpow2.f32 %v1205_v21  ;;  %v1135_v32 = vsub.f32 %v4703_v52, %v965_v14  ;;  %1111 = vmax.xlane.f32.xlu1 %v1110_v63  ;;  %v5267_v63 = vsel %vm83_vm13, %v843_v56, -9e+15  ;;  %v787_v52 = vmul.f32 0.2, %v659_v18 }
 0x2ed   :  { %v1098_v57 = vsel %vm932_vm3, %v5267_v63, -inf  ;;  %v1116_v56 = vsel %vm932_vm3, %v5274_v12, -inf }
 0x2ee   :  { %v5259_v35 = vpop.eup %3982  ;;  %v1209_v3 = vmul.f32 1.442695, %v1135_v32  ;;  %v851_v21 = vsel %vm723_vm2, %v659_v18, %v787_v52 }
 0x2ef   :  { %v1335_v51 = vsel %vm932_vm3, %v5259_v35, 0.0 }
 0x2f0   :  { %3986 = vpow2.f32 %v1209_v3  ;;  %1093 = vmax.xlane.f32.xlu1 %v1092_v25  ;;  %1336 = vadd.xlane.f32.xlu0 %v1335_v51 }
 0x2f3   :  { %v971_v62 = vpop.xlane.xlu0 %970 }
 0x2f4   :  { %v1137_v36 = vsub.f32 %v4718_v7, %v971_v62  ;;  %1099 = vmax.xlane.f32.xlu1 %v1098_v57  ;;  %v5284_v7 = vsel %vm83_vm13, %v851_v21, -9e+15 }
 0x2f5   :  { %v1122_v18 = vsel %vm932_vm3, %v5284_v7, -inf }
 0x2f6   :  { %v5276_v14 = vpop.eup %3984  ;;  %v1213_v32 = vmul.f32 1.442695, %v1137_v36 }
 0x2f7   :  { %v1341_v37 = vsel %vm932_vm3, %v5276_v14, 0.0 }
 0x2f8   :  { %3988 = vpow2.f32 %v1213_v32  ;;  %1117 = vmax.xlane.f32.xlu1 %v1116_v56  ;;  %1342 = vadd.xlane.f32.xlu0 %v1341_v37  ;;  %v1128_v37 = vsub.f32 %v4629_v44, %v5177_v1 }
 0x2fa   :  { %v5286_v2 = vpop.eup %3986 }
 0x2fb   :  { %v977_v3 = vpop.xlane.xlu0 %976  ;;  %v1347_v25 = vsel %vm932_vm3, %v5286_v2, 0.0 }
 0x2fc   :  { %v1139_v51 = vsub.f32 %v4733_v34, %v977_v3  ;;  %1123 = vmax.xlane.f32.xlu1 %v1122_v18  ;;  %1348 = vadd.xlane.f32.xlu0 %v1347_v25 }
 0x2fe   :  { %v1217_v52 = vmul.f32 1.442695, %v1139_v51 }
 0x300   :  { %3990 = vpow2.f32 %v1217_v52  ;;  %v1195_v52 = vmul.f32 1.442695, %v1128_v37 }
 0x302   :  { %v5293_v23 = vpop.eup %3988 }
 0x303   :  { %v1353_v62 = vsel %vm932_vm3, %v5293_v23, 0.0  ;;  %v983_v57 = vpop.xlane.xlu0 %982 }
 0x304   :  { %1354 = vadd.xlane.f32.xlu0 %v1353_v62 }
 0x30a   :  { %v5297_v36 = vpop.eup %3990 }
 0x30b   :  { %v5299_v21 = vpop.xlane.xlu0 %988  ;;  %v1359_v32 = vsel %vm932_vm3, %v5297_v36, 0.0 }
 0x30c   :  { %1360 = vadd.xlane.f32.xlu0 %v1359_v32  ;;  %v1132_v32 = vsub.f32 %v4684_v27, %v5230_v38 }
 0x30e   :  { %v1203_v44 = vmul.f32 1.442695, %v1132_v32 }
 0x30f   :  { %v5303_v34 = vpop.xlane.xlu0 %1006 }
 0x313   :  { %v1013_v56 = vpop.xlane.xlu0 %1012 }
 0x314   :  { %v1151_v3 = vsub.f32 %v4812_v22, %v1013_v56 }
 0x315   :  { %v938_v18 = vpop.xlane.xlu1 %937 }
 0x316   :  { %v1241_v25 = vmul.f32 1.442695, %v1151_v3  ;;  %v1126_v51 = vsub.f32 %v4818_v42, %v938_v18 }
 0x318   :  { %3992 = vpow2.f32 %v1241_v25  ;;  %v1191_v62 = vmul.f32 1.442695, %v1126_v51 }
 0x319   :  { %v950_v4 = vpop.xlane.xlu1 %949 }
 0x31a   :  { %3994 = vpow2.f32 %v1191_v62  ;;  %v1130_v9 = vsub.f32 %v4843_v16, %v950_v4 }
 0x31b   :  { %3996 = vpow2.f32 %v1195_v52 }
 0x31c   :  { %v1199_v45 = vmul.f32 1.442695, %v1130_v9 }
 0x31d   :  { %v962_v26 = vpop.xlane.xlu1 %961 }
 0x31e   :  { %3998 = vpow2.f32 %v1199_v45  ;;  %v1134_v22 = vsub.f32 %v4864_v39, %v962_v26 }
 0x31f   :  { %4000 = vpow2.f32 %v1203_v44 }
 0x320   :  { %v1207_v4 = vmul.f32 1.442695, %v1134_v22 }
 0x321   :  { %v968_v1 = vpop.xlane.xlu1 %967 }
 0x322   :  { %v5313_v56 = vpop.eup %3992  ;;  %v1136_v16 = vsub.f32 %v4888_v53, %v968_v1  ;;  %4002 = vpow2.f32 %v1207_v4 }
 0x323   :  { %v1395_v42 = vsel %vm932_vm3, %v5313_v56, 0.0 }
 0x324   :  { %v5317_v37 = vpop.eup %3994  ;;  %1396 = vadd.xlane.f32.xlu0 %v1395_v42  ;;  %v1211_v26 = vmul.f32 1.442695, %v1136_v16  ;;  %v5339_v42 = vpop.xlane.xlu0 %994 }
 0x325   :  { %v974_v27 = vpop.xlane.xlu1 %973  ;;  %v1320_v9 = vsel %vm932_vm3, %v5317_v37, 0.0  ;;  %v5322_v45 = vpop.eup %3996 }
 0x326   :  { %1321 = vadd.xlane.f32.xlu1 %v1320_v9  ;;  %v1138_v39 = vsub.f32 %v4908_v15, %v974_v27  ;;  %v1326_v3 = vsel %vm932_vm3, %v5322_v45, 0.0  ;;  %4004 = vpow2.f32 %v1211_v26  ;;  %v1141_v15 = vsub.f32 %v4752_v11, %v983_v57 }
 0x327   :  { %v1143_v57 = vsub.f32 %v4773_v19, %v5299_v21 }
 0x328   :  { %v5327_v18 = vpop.eup %3998  ;;  %v1215_v53 = vmul.f32 1.442695, %v1138_v39  ;;  %v1001_v9 = vpop.xlane.xlu0 %1000 }
 0x329   :  { %v980_v38 = vpop.xlane.xlu1 %979  ;;  %v1332_v52 = vsel %vm932_vm3, %v5327_v18, 0.0  ;;  %v5332_v62 = vpop.eup %4000 }
 0x32a   :  { %1327 = vadd.xlane.f32.xlu1 %v1326_v3  ;;  %v1140_v25 = vsub.f32 %v4926_v5, %v980_v38  ;;  %4006 = vpow2.f32 %v1215_v53  ;;  %v1338_v22 = vsel %vm932_vm3, %v5332_v62, 0.0  ;;  %v1221_v5 = vmul.f32 1.442695, %v1141_v15 }
 0x32c   :  { %v1219_v32 = vmul.f32 1.442695, %v1140_v25  ;;  %v5337_v1 = vpop.eup %4002  ;;  %v1225_v25 = vmul.f32 1.442695, %v1143_v57 }
 0x32d   :  { %v986_v51 = vpop.xlane.xlu1 %985  ;;  %v1344_v27 = vsel %vm932_vm3, %v5337_v1, 0.0 }
 0x32e   :  { %1333 = vadd.xlane.f32.xlu1 %v1332_v52  ;;  %4008 = vpow2.f32 %v1219_v32  ;;  %v1142_v4 = vsub.f32 %v4944_v0, %v986_v51  ;;  %v6495_v0 = vld [vmem:[#allocation31_spill] sm:$0xff]  ;;  %v6496_v51 = vld [vmem:[#allocation37_spill] sm:$0xff] }
 0x32f   :  { %4010 = vpow2.f32 %v1221_v5  ;;  %v1147_v53 = vsub.f32 %v6495_v0, %v1001_v9 }
 0x330   :  { %v5344_v11 = vpop.eup %4004  ;;  %v1223_v26 = vmul.f32 1.442695, %v1142_v4 }
 0x331   :  { %v992_v44 = vpop.xlane.xlu1 %991  ;;  %v1350_v38 = vsel %vm932_vm3, %v5344_v11, 0.0  ;;  %v1233_v4 = vmul.f32 1.442695, %v1147_v53 }
 0x332   :  { %1339 = vadd.xlane.f32.xlu1 %v1338_v22  ;;  %4012 = vpow2.f32 %v1223_v26  ;;  %v1144_v52 = vsub.f32 %v6496_v51, %v992_v44  ;;  %v6497_v22 = vld [vmem:[#allocation28_spill] sm:$0xff] }
 0x333   :  { %v1149_v5 = vsub.f32 %v6497_v22, %v5303_v34  ;;  %4014 = vpow2.f32 %v1225_v25  ;;  %v6498_v51 = vld [vmem:[#allocation32_spill] sm:$0xff] }
 0x334   :  { %v5350_v3 = vpop.eup %4006  ;;  %v1227_v9 = vmul.f32 1.442695, %v1144_v52 }
 0x335   :  { %v1010_v16 = vpop.xlane.xlu1 %1009  ;;  %v1356_v32 = vsel %vm932_vm3, %v5350_v3, 0.0 }
 0x336   :  { %1345 = vadd.xlane.f32.xlu1 %v1344_v27  ;;  %v1019_v27 = vpop.xlane.xlu0 %1018  ;;  %v1150_v34 = vsub.f32 %v4982_v55, %v1010_v16 }
 0x338   :  { %v5356_v19 = vpop.eup %4008 }
 0x339   :  { %v1016_v39 = vpop.xlane.xlu1 %1015  ;;  %v1362_v44 = vsel %vm932_vm3, %v5356_v19, 0.0 }
 0x33a   :  { %1351 = vadd.xlane.f32.xlu1 %v1350_v38  ;;  %v5363_v38 = vpop.eup %4010  ;;  %v1025_v25 = vpop.xlane.xlu0 %1024 }
 0x33d   :  { %v998_v15 = vpop.xlane.xlu1 %997 }
 0x33e   :  { %v1146_v21 = vsub.f32 %v5021_v41, %v998_v15  ;;  %1357 = vadd.xlane.f32.xlu1 %v1356_v32  ;;  %v1237_v41 = vmul.f32 1.442695, %v1149_v5  ;;  %v1153_v15 = vsub.f32 %v6498_v51, %v1019_v27  ;;  %v1365_v32 = vsel %vm932_vm3, %v5363_v38, 0.0 }
 0x33f   :  { %v1239_v5 = vmul.f32 1.442695, %v1150_v34 }
 0x340   :  { %v1231_v57 = vmul.f32 1.442695, %v1146_v21  ;;  %v5370_v21 = vpop.eup %4012  ;;  %v1245_v22 = vmul.f32 1.442695, %v1153_v15 }
 0x341   :  { %v1004_v26 = vpop.xlane.xlu1 %1003  ;;  %v1368_v55 = vsel %vm932_vm3, %v5370_v21, 0.0  ;;  %v5376_v16 = vpop.eup %4014 }
 0x342   :  { %4016 = vpow2.f32 %v1231_v57  ;;  %v1148_v0 = vsub.f32 %v5041_v59, %v1004_v26  ;;  %1363 = vadd.xlane.f32.xlu1 %v1362_v44  ;;  %v1152_v59 = vsub.f32 %v5002_v43, %v1016_v39  ;;  %6499 = vst [vmem:[#allocation31_spill] sm:$0xff] %v5376_v16  ;;  %v1031_v26 = vpop.xlane.xlu0 %1030  ;;  %v6502_v43 = vld [vmem:[#allocation33_spill] sm:$0xff]  ;;  %v1371_v15 = vsel %vm932_vm3, %v5376_v16, 0.0 }
 0x343   :  { %4018 = vpow2.f32 %v1233_v4  ;;  %v1155_v39 = vsub.f32 %v6502_v43, %v1025_v25 }
 0x344   :  { %4020 = vpow2.f32 %v1227_v9  ;;  %v1235_v53 = vmul.f32 1.442695, %v1148_v0  ;;  %v6500_v9 = vld [vmem:[#allocation30_spill] sm:$0xff]  ;;  %v1243_v44 = vmul.f32 1.442695, %v1152_v59 }
 0x345   :  { %v1022_v52 = vpop.xlane.xlu1 %1021  ;;  %4022 = vpow2.f32 %v1237_v41  ;;  %v1145_v57 = vsub.f32 %v6500_v9, %v5339_v42  ;;  %v1249_v25 = vmul.f32 1.442695, %v1155_v39 }
 0x346   :  { %1366 = vadd.xlane.f32.xlu1 %v1365_v32  ;;  %4024 = vpow2.f32 %v1235_v53  ;;  %v1154_v4 = vsub.f32 %v5058_v8, %v1022_v52  ;;  %v1037_v59 = vpop.xlane.xlu0 %1036 }
 0x347   :  { %4026 = vpow2.f32 %v1245_v22  ;;  %v1229_v42 = vmul.f32 1.442695, %v1145_v57 }
 0x348   :  { %4028 = vpow2.f32 %v1239_v5  ;;  %v1247_v41 = vmul.f32 1.442695, %v1154_v4 }
 0x349   :  { %v1028_v27 = vpop.xlane.xlu1 %1027  ;;  %4030 = vpow2.f32 %v1243_v44 }
 0x34a   :  { %1369 = vadd.xlane.f32.xlu1 %v1368_v55  ;;  %v1156_v52 = vsub.f32 %v5075_v13, %v1028_v27  ;;  %4032 = vpow2.f32 %v1247_v41  ;;  %v6506_v13 = vld [vmem:[#allocation34_spill] sm:$0xff] }
 0x34b   :  { %4034 = vpow2.f32 %v1229_v42  ;;  %v1157_v27 = vsub.f32 %v6506_v13, %v1031_v26  ;;  %v6507_v26 = vld [vmem:[#allocation35_spill] sm:$0xff] }
 0x34c   :  { %v5380_v0 = vpop.eup %4016  ;;  %v1251_v57 = vmul.f32 1.442695, %v1156_v52  ;;  %4036 = vpow2.f32 %v1249_v25  ;;  %v1159_v42 = vsub.f32 %v6507_v26, %v1037_v59  ;;  %v1055_v52 = vpop.xlane.xlu0 %1054 }
 0x34d   :  { %6501 = vst [vmem:[#allocation37_spill] sm:$0xff] %v5380_v0  ;;  %v5383_v8 = vpop.eup %4018  ;;  %v1034_v51 = vpop.xlane.xlu1 %1033  ;;  %v1380_v34 = vsel %vm932_vm3, %v5380_v0, 0.0 }
 0x34e   :  { %6503 = vst [vmem:[#allocation28_spill] sm:$0xff] %v5383_v8  ;;  %v5389_v53 = vpop.eup %4020  ;;  %1372 = vadd.xlane.f32.xlu1 %v1371_v15  ;;  %1381 = vadd.xlane.f32.xlu0 %v1380_v34  ;;  %v1158_v32 = vsub.f32 %v5092_v24, %v1034_v51  ;;  %v1383_v55 = vsel %vm932_vm3, %v5383_v8, 0.0  ;;  %v1253_v34 = vmul.f32 1.442695, %v1157_v27  ;;  %4038 = vpow2.f32 %v1251_v57 }
 0x34f   :  { %6504 = vst [vmem:[#allocation32_spill] sm:$0xff] %v5389_v53  ;;  %v5393_v22 = vpop.eup %4022  ;;  %v1374_v4 = vsel %vm932_vm3, %v5389_v53, 0.0  ;;  %v1257_v59 = vmul.f32 1.442695, %v1159_v42 }
 0x350   :  { %v5399_v9 = vpop.eup %4024  ;;  %v1255_v24 = vmul.f32 1.442695, %v1158_v32  ;;  %v1389_v39 = vsel %vm932_vm3, %v5393_v22, 0.0 }
 0x351   :  { %v1040_v5 = vpop.xlane.xlu1 %1039  ;;  %6505 = vst [vmem:[#allocation30_spill] sm:$0xff] %v5399_v9  ;;  %v5402_v44 = vpop.eup %4026  ;;  %v1386_v41 = vsel %vm932_vm3, %v5399_v9, 0.0 }
 0x352   :  { %1375 = vadd.xlane.f32.xlu1 %v1374_v4  ;;  %1384 = vadd.xlane.f32.xlu0 %v1383_v55  ;;  %v5408_v51 = vpop.eup %4028  ;;  %4040 = vpow2.f32 %v1255_v24  ;;  %v1401_v13 = vsel %vm932_vm3, %v5402_v44, 0.0  ;;  %v1160_v27 = vsub.f32 %v5108_v10, %v1040_v5  ;;  %v6510_v5 = vld [vmem:[#allocation36_spill] sm:$0xff] }
 0x353   :  { %v5412_v32 = vpop.eup %4030  ;;  %v1392_v55 = vsel %vm932_vm3, %v5408_v51, 0.0  ;;  %4042 = vpow2.f32 %v1253_v34  ;;  %v1165_v34 = vsub.f32 %v6510_v5, %v1055_v52 }
 0x354   :  { %v5418_v33 = vpop.eup %4032  ;;  %v1259_v10 = vmul.f32 1.442695, %v1160_v27  ;;  %v6512_v27 = vld [vmem:[#allocation38_spill] sm:$0xff] }
 0x355   :  { %v1058_v43 = vpop.xlane.xlu1 %1057  ;;  %v5422_v24 = vpop.eup %4034 }
 0x356   :  { %v1166_v15 = vsub.f32 %v5126_v48, %v1058_v43  ;;  %1390 = vadd.xlane.f32.xlu1 %v1389_v39  ;;  %1387 = vadd.xlane.f32.xlu0 %v1386_v41  ;;  %6508 = vst [vmem:[#allocation33_spill] sm:$0xff] %v5422_v24  ;;  %v1061_v43 = vpop.xlane.xlu0 %1060  ;;  %v1398_v41 = vsel %vm932_vm3, %v5412_v32, 0.0  ;;  %v5428_v26 = vpop.eup %4036 }
 0x357   :  { %6509 = vst [vmem:[#allocation34_spill] sm:$0xff] %v5428_v26  ;;  %v1167_v52 = vsub.f32 %v6512_v27, %v1061_v43 }
 0x358   :  { %v1271_v25 = vmul.f32 1.442695, %v1166_v15  ;;  %v1404_v15 = vsel %vm932_vm3, %v5418_v33, 0.0 }
 0x359   :  { %v1064_v4 = vpop.xlane.xlu1 %1063 }
 0x35a   :  { %v1168_v48 = vsub.f32 %v5142_v46, %v1064_v4  ;;  %1393 = vadd.xlane.f32.xlu1 %v1392_v55  ;;  %1402 = vadd.xlane.f32.xlu0 %v1401_v13  ;;  %4044 = vpow2.f32 %v1271_v25  ;;  %v5432_v25 = vpop.eup %4038  ;;  %v1377_v55 = vsel %vm932_vm3, %v5422_v24, 0.0  ;;  %v1407_v13 = vsel %vm932_vm3, %v5428_v26, 0.0  ;;  %v6533_v24 = vld [vmem:[#allocation43_spill] sm:$0xff] }
 0x35b   :  { %4046 = vpow2.f32 %v1257_v59  ;;  %v1269_v59 = vmul.f32 1.442695, %v1165_v34  ;;  %v6515_v34 = vld [vmem:[#allocation39_spill] sm:$0xff] }
 0x35c   :  { %v1275_v57 = vmul.f32 1.442695, %v1168_v48  ;;  %v5438_v48 = vpop.eup %4040 }
 0x35d   :  { %v1046_v39 = vpop.xlane.xlu1 %1045  ;;  %6511 = vst [vmem:[#allocation35_spill] sm:$0xff] %v5438_v48 }
 0x35e   :  { %v1162_v46 = vsub.f32 %v5154_v20, %v1046_v39  ;;  %1399 = vadd.xlane.f32.xlu1 %v1398_v41  ;;  %1405 = vadd.xlane.f32.xlu0 %v1404_v15  ;;  %4048 = vpow2.f32 %v1275_v57  ;;  %v1043_v20 = vpop.xlane.xlu0 %1042  ;;  %v5441_v57 = vpop.eup %4042  ;;  %v1416_v41 = vsel %vm932_vm3, %v5438_v48, 0.0  ;;  %v1410_v15 = vsel %vm932_vm3, %v5432_v25, 0.0 }
 0x35f   :  { %4050 = vpow2.f32 %v1259_v10  ;;  %6513 = vst [vmem:[#allocation36_spill] sm:$0xff] %v5441_v57  ;;  %v1273_v10 = vmul.f32 1.442695, %v1167_v52  ;;  %v1161_v43 = vsub.f32 %v6515_v34, %v1043_v20  ;;  %v1413_v8 = vsel %vm932_vm3, %v5441_v57, 0.0 }
 0x360   :  { %v1263_v42 = vmul.f32 1.442695, %v1162_v46 }
 0x361   :  { %v1052_v4 = vpop.xlane.xlu1 %1051  ;;  %v1261_v20 = vmul.f32 1.442695, %v1161_v43 }
 0x362   :  { %1378 = vadd.xlane.f32.xlu1 %v1377_v55  ;;  %1408 = vadd.xlane.f32.xlu0 %v1407_v13  ;;  %4052 = vpow2.f32 %v1263_v42  ;;  %v1049_v13 = vpop.xlane.xlu0 %1048 }
 0x363   :  { %4054 = vpow2.f32 %v1269_v59  ;;  %v6518_v59 = vld [vmem:[#allocation40_spill] sm:$0xff] }
 0x364   :  { %v5447_v46 = vpop.eup %4044  ;;  %v1163_v52 = vsub.f32 %v6518_v59, %v1049_v13 }
 0x365   :  { %v1070_v39 = vpop.xlane.xlu1 %1069  ;;  %6514 = vst [vmem:[#allocation38_spill] sm:$0xff] %v5447_v46  ;;  %v5451_v55 = vpop.eup %4046  ;;  %v1440_v48 = vsel %vm932_vm3, %v5447_v46, 0.0  ;;  %v6534_v46 = vld [vmem:[#allocation44_spill] sm:$0xff] }
 0x366   :  { %v1170_v5 = vsub.f32 %v5184_v50, %v1070_v39  ;;  %1417 = vadd.xlane.f32.xlu1 %v1416_v41  ;;  %1411 = vadd.xlane.f32.xlu0 %v1410_v15  ;;  %6516 = vst [vmem:[#allocation39_spill] sm:$0xff] %v5451_v55 }
 0x368   :  { %v1279_v42 = vmul.f32 1.442695, %v1170_v5  ;;  %v5457_v9 = vpop.eup %4048  ;;  %v1419_v5 = vsel %vm932_vm3, %v5451_v55, 0.0 }
 0x369   :  { %v1076_v27 = vpop.xlane.xlu1 %1075  ;;  %6517 = vst [vmem:[#allocation48_spill] sm:$0xff] %v5457_v9  ;;  %v5461_v41 = vpop.eup %4050  ;;  %v1446_v15 = vsel %vm932_vm3, %v5457_v9, 0.0 }
 0x36a   :  { %4056 = vpow2.f32 %v1279_v42  ;;  %v1172_v50 = vsub.f32 %v5199_v40, %v1076_v27  ;;  %1441 = vadd.xlane.f32.xlu1 %v1440_v48  ;;  %1414 = vadd.xlane.f32.xlu0 %v1413_v8  ;;  %6519 = vst [vmem:[#allocation40_spill] sm:$0xff] %v5461_v41  ;;  %v1067_v40 = vpop.xlane.xlu0 %1066  ;;  %v1265_v8 = vmul.f32 1.442695, %v1163_v52  ;;  %v1164_v48 = vsub.f32 %v5167_v29, %v1052_v4  ;;  %v6522_v27 = vld [vmem:[#allocation41_spill] sm:$0xff] }
 0x36b   :  { %4058 = vpow2.f32 %v1273_v10  ;;  %v1422_v43 = vsel %vm932_vm3, %v5461_v41, 0.0 }
 0x36c   :  { %v1283_v39 = vmul.f32 1.442695, %v1172_v50  ;;  %v5467_v34 = vpop.eup %4052  ;;  %v1169_v50 = vsub.f32 %v6522_v27, %v1067_v40  ;;  %v1267_v59 = vmul.f32 1.442695, %v1164_v48 }
 0x36d   :  { %6520 = vst [vmem:[#allocation49_spill] sm:$0xff] %v5467_v34  ;;  %v1428_v10 = vsel %vm932_vm3, %v5467_v34, 0.0  ;;  %v5474_v42 = vpop.eup %4054 }
 0x36e   :  { %4060 = vpow2.f32 %v1283_v39  ;;  %1447 = vadd.xlane.f32.xlu1 %v1446_v15  ;;  %1420 = vadd.xlane.f32.xlu0 %v1419_v5  ;;  %v1437_v4 = vsel %vm932_vm3, %v5474_v42, 0.0  ;;  %v1277_v15 = vmul.f32 1.442695, %v1169_v50  ;;  %v6525_v5 = vld [vmem:[#allocation42_spill] sm:$0xff] }
 0x36f   :  { %4062 = vpow2.f32 %v1261_v20  ;;  %v1073_v20 = vpop.xlane.xlu0 %1072 }
 0x370   :  { %4064 = vpow2.f32 %v1265_v8 }
 0x371   :  { %4066 = vpow2.f32 %v1267_v59 }
 0x372   :  { %1429 = vadd.xlane.f32.xlu1 %v1428_v10  ;;  %1423 = vadd.xlane.f32.xlu0 %v1422_v43  ;;  %v1171_v10 = vsub.f32 %v6525_v5, %v1073_v20  ;;  %4068 = vpow2.f32 %v1277_v15  ;;  %v1082_v5 = vpop.xlane.xlu1 %1081 }
 0x373   :  { %v1079_v27 = vpop.xlane.xlu0 %1078 }
 0x374   :  { %v5476_v13 = vpop.eup %4056  ;;  %v1281_v43 = vmul.f32 1.442695, %v1171_v10  ;;  %v1173_v53 = vsub.f32 %v6533_v24, %v1079_v27 }
 0x375   :  { %6521 = vst [vmem:[#allocation50_spill] sm:$0xff] %v5476_v13  ;;  %v1452_v29 = vsel %vm932_vm3, %v5476_v13, 0.0  ;;  %v5483_v52 = vpop.eup %4058 }
 0x376   :  { %6523 = vst [vmem:[#allocation41_spill] sm:$0xff] %v5483_v52  ;;  %1453 = vadd.xlane.f32.xlu1 %v1452_v29  ;;  %1438 = vadd.xlane.f32.xlu0 %v1437_v4  ;;  %v1443_v8 = vsel %vm932_vm3, %v5483_v52, 0.0  ;;  %4070 = vpow2.f32 %v1281_v43 }
 0x377   :  { %v1085_v4 = vpop.xlane.xlu0 %1084 }
 0x378   :  { %v5485_v39 = vpop.eup %4060 }
 0x379   :  { %6524 = vst [vmem:[#allocation51_spill] sm:$0xff] %v5485_v39  ;;  %v1458_v40 = vsel %vm932_vm3, %v5485_v39, 0.0  ;;  %v5492_v48 = vpop.eup %4062 }
 0x37a   :  { %6526 = vst [vmem:[#allocation42_spill] sm:$0xff] %v5492_v48  ;;  %1459 = vadd.xlane.f32.xlu1 %v1458_v40  ;;  %1444 = vadd.xlane.f32.xlu0 %v1443_v8  ;;  %v1425_v29 = vsel %vm932_vm3, %v5492_v48, 0.0  ;;  %v5496_v50 = vpop.eup %4064 }
 0x37b   :  { %6527 = vst [vmem:[#allocation52_spill] sm:$0xff] %v5496_v50  ;;  %v1431_v59 = vsel %vm932_vm3, %v5496_v50, 0.0  ;;  %v5500_v20 = vpop.eup %4066  ;;  %v5506_v40 = vpop.xlane.xlu0 %1102  ;;  %v6531_v50 = vld [vmem:[#allocation11_spill] sm:$0xff] }
 0x37c   :  { %6528 = vst [vmem:[#allocation53_spill] sm:$0xff] %v5500_v20  ;;  %v1434_v15 = vsel %vm932_vm3, %v5500_v20, 0.0  ;;  %v5504_v10 = vpop.eup %4068 }
 0x37d   :  { %6529 = vst [vmem:[#allocation54_spill] sm:$0xff] %v5504_v10  ;;  %v1449_v8 = vsel %vm932_vm3, %v5504_v10, 0.0 }
 0x37e   :  { %1426 = vadd.xlane.f32.xlu0 %v1425_v29  ;;  %v1088_v29 = vpop.xlane.xlu1 %1087 }
 0x37f   :  { %v5516_v20 = vpop.xlane.xlu0 %1108 }
 0x380   :  { %v5510_v43 = vpop.eup %4070 }
 0x381   :  { %6530 = vst [vmem:[#allocation55_spill] sm:$0xff] %v5510_v43 }
 0x382   :  { %1432 = vadd.xlane.f32.xlu0 %v1431_v59  ;;  %v1455_v59 = vsel %vm932_vm3, %v5510_v43, 0.0  ;;  %v1106_v34 = vpop.xlane.xlu1 %1105 }
 0x383   :  { %v1182_v10 = vsub.f32 %v5236_v28, %v1106_v34 }
 0x385   :  { %v1303_v52 = vmul.f32 1.442695, %v1182_v10 }
 0x386   :  { %1435 = vadd.xlane.f32.xlu0 %v1434_v15  ;;  %v6532_v15 = vld [vmem:[#allocation8_spill] sm:$0xff]  ;;  %v1112_v55 = vpop.xlane.xlu1 %1111 }
 0x387   :  { %v1184_v57 = vsub.f32 %v5248_v58, %v1112_v55  ;;  %v1176_v55 = vsub.f32 %v5224_v49, %v1088_v29  ;;  %v6536_v29 = vld [vmem:[#allocation46_spill] sm:$0xff] }
 0x38a   :  { %1450 = vadd.xlane.f32.xlu0 %v1449_v8  ;;  %v5522_v8 = vpop.xlane.xlu0 %1090  ;;  %v5526_v41 = vpop.xlane.xlu1 %1093 }
 0x38b   :  { %1938 = vrot.lane.b32.xlu1 %v6531_v50, %s4367_s0 }
 0x38e   :  { %1456 = vadd.xlane.f32.xlu0 %v1455_v59  ;;  %v5524_v48 = vpop.xlane.xlu0 %1096  ;;  %v1174_v59 = vsub.f32 %v5211_v17, %v1082_v5  ;;  %v5531_v43 = vpop.xlane.xlu1 %1099  ;;  %v1307_v17 = vmul.f32 1.442695, %v1184_v57 }
 0x38f   :  { %2021 = vrot.lane.b32.xlu1 %v6532_v15, %s4369_s1 }
 0x390   :  { %v1287_v9 = vmul.f32 1.442695, %v1174_v59 }
 0x392   :  { %v5528_v39 = vpop.xlane.xlu0 %1114  ;;  %4072 = vpow2.f32 %v1287_v9  ;;  %v5539_v0 = vpop.xlane.xlu1 %1117 }
 0x393   :  { %2110 = vrot.lane.b32.xlu1 %v6532_v15, %s4370_s18  ;;  %4074 = vpow2.f32 %v1303_v52  ;;  %v1285_v15 = vmul.f32 1.442695, %v1173_v53  ;;  %v1291_v52 = vmul.f32 1.442695, %v1176_v55 }
 0x394   :  { %4076 = vpow2.f32 %v1307_v17 }
 0x396   :  { %v5535_v13 = vpop.xlane.xlu0 %1120  ;;  %v5542_v5 = vpop.xlane.xlu1 %1123 }
 0x39a   :  { %v1319_v16 = vpop.xlane.xlu0 %1318 }
 0x39b   :  { %4078 = vrcp.f32 %v1319_v16  ;;  %v6535_v16 = vld [vmem:[#allocation45_spill] sm:$0xff] }
 0x39c   :  { %v5545_v28 = vpop.eup %4072 }
 0x39d   :  { %v1464_v24 = vsel %vm932_vm3, %v5545_v28, 0.0  ;;  %v5550_v57 = vpop.eup %4074 }
 0x39e   :  { %v1325_v26 = vpop.xlane.xlu0 %1324  ;;  %v1488_v49 = vsel %vm932_vm3, %v5550_v57, 0.0 }
 0x3a2   :  { %v1331_v34 = vpop.xlane.xlu0 %1330 }
 0x3a4   :  { %1849 = vrot.lane.b32.xlu0 %v6531_v50, %s4365_s24  ;;  %v1175_v50 = vsub.f32 %v6534_v46, %v1085_v4  ;;  %v1181_v46 = vsub.f32 %v6535_v16, %v5506_v40 }
 0x3a6   :  { %v1289_v58 = vmul.f32 1.442695, %v1175_v50  ;;  %v1337_v27 = vpop.xlane.xlu0 %1336  ;;  %v5556_v50 = vpop.eup %4076  ;;  %v1301_v10 = vmul.f32 1.442695, %v1181_v46 }
 0x3a7   :  { %v4079_v4 = vpop.eup %4078  ;;  %v1494_v40 = vsel %vm932_vm3, %v5556_v50, 0.0 }
 0x3a8   :  { %v1573_v55 = vmul.f32 %v4079_v4, %v5205_v30 }
 0x3aa   :  { %v1343_v59 = vpop.xlane.xlu0 %1342 }
 0x3b3   :  { %v1322_v9 = vpop.xlane.xlu1 %1321 }
 0x3b4   :  { %4080 = vrcp.f32 %v1322_v9 }
 0x3b5   :  { %4082 = vpow2.f32 %v1285_v15  ;;  %v1183_v15 = vsub.f32 %v6536_v29, %v5516_v20 }
 0x3b6   :  { %4084 = vrcp.f32 %v1325_v26 }
 0x3b7   :  { %v1328_v53 = vpop.xlane.xlu1 %1327  ;;  %1465 = vadd.xlane.f32.xlu1 %v1464_v24 }
 0x3b8   :  { %4086 = vrcp.f32 %v1328_v53  ;;  %v1305_v53 = vmul.f32 1.442695, %v1183_v15 }
 0x3b9   :  { %4088 = vpow2.f32 %v1289_v58 }
 0x3ba   :  { %4090 = vrcp.f32 %v1331_v34 }
 0x3bb   :  { %v1334_v26 = vpop.xlane.xlu1 %1333  ;;  %1489 = vadd.xlane.f32.xlu1 %v1488_v49  ;;  %v1349_v49 = vpop.xlane.xlu0 %1348 }
 0x3bc   :  { %4092 = vrcp.f32 %v1334_v26 }
 0x3bd   :  { %4094 = vpow2.f32 %v1291_v52 }
 0x3be   :  { %v4081_v17 = vpop.eup %4080  ;;  %4096 = vrcp.f32 %v1337_v27 }
 0x3bf   :  { %v5562_v9 = vpop.eup %4082  ;;  %v1340_v58 = vpop.xlane.xlu1 %1339  ;;  %1495 = vadd.xlane.f32.xlu1 %v1494_v40  ;;  %v1574_v34 = vmul.f32 %v4081_v17, %v5317_v37 }
 0x3c0   :  { %v4085_v24 = vpop.eup %4084  ;;  %4098 = vrcp.f32 %v1340_v58  ;;  %v1461_v46 = vsel %vm932_vm3, %v5562_v9, 0.0  ;;  %v6537_v58 = vld [vmem:[#allocation12_spill] sm:$0xff] }
 0x3c1   :  { %4100 = vpow2.f32 %v1301_v10  ;;  %v1637_v20 = vpack.c.bf16 %v1574_v34, %v1573_v55  ;;  %v1575_v27 = vmul.f32 %v4085_v24, %v5217_v54  ;;  %v6538_v55 = vld [vmem:[#allocation14_spill] sm:$0xff] }
 0x3c2   :  { %v4087_v16 = vpop.eup %4086  ;;  %4102 = vrcp.f32 %v1343_v59  ;;  %v1355_v59 = vpop.xlane.xlu0 %1354 }
 0x3c3   :  { %v5568_v52 = vpop.eup %4088  ;;  %v1576_v26 = vmul.f32 %v4087_v16, %v5322_v45  ;;  %v1346_v30 = vpop.xlane.xlu1 %1345  ;;  %1462 = vadd.xlane.f32.xlu0 %v1461_v46  ;;  %3768 = vmatprep.mubr.msk.bf16.mxu1 %vm932_vm3, %v1637_v20 }
 0x3c4   :  { %v4091_v37 = vpop.eup %4090  ;;  %4104 = vrcp.f32 %v1346_v30  ;;  %v1467_v29 = vsel %vm932_vm3, %v5568_v52, 0.0 }
 0x3c5   :  { %4106 = vpow2.f32 %v1305_v53  ;;  %v1638_v4 = vpack.c.bf16 %v1576_v26, %v1575_v27  ;;  %v1577_v45 = vmul.f32 %v4091_v37, %v5239_v47 }
 0x3c6   :  { %v4093_v10 = vpop.eup %4092  ;;  %4108 = vrcp.f32 %v1349_v49  ;;  %v1361_v16 = vpop.xlane.xlu0 %1360  ;;  %v6539_v49 = vld [vmem:[#allocation16_spill] sm:$0xff] }
 0x3c7   :  { %v5575_v15 = vpop.eup %4094  ;;  %v1352_v54 = vpop.xlane.xlu1 %1351  ;;  %1468 = vadd.xlane.f32.xlu0 %v1467_v29  ;;  %3769 = vmatmul.mubr.msk.bf16.vlgmr.msra.gmra.mrb[16].mxu1 %vm932_vm3, %v1638_v4  ;;  %v1578_v17 = vmul.f32 %v4093_v10, %v5327_v18 }
 0x3c8   :  { %v4097_v40 = vpop.eup %4096  ;;  %4110 = vrcp.f32 %v1352_v54  ;;  %3777 = vmatpush3.bf16.msra.mxu1 %v6537_v58  ;;  %v1470_v53 = vsel %vm932_vm3, %v5575_v15, 0.0  ;;  %v6541_v54 = vld [vmem:[#allocation18_spill] sm:$0xff] }
 0x3c9   :  { %3778 = vmatprep.subr.bf16.mxu1 %v6538_v55  ;;  %v1639_v34 = vpack.c.bf16 %v1578_v17, %v1577_v45  ;;  %4112 = vrcp.f32 %v1355_v59  ;;  %v1579_v47 = vmul.f32 %v4097_v40, %v5259_v35  ;;  %v6540_v59 = vld [vmem:[#allocation9_spill] sm:$0xff] }
 0x3ca   :  { %v4099_v24 = vpop.eup %4098 }
 0x3cb   :  { %v5584_v20 = vpop.eup %4100  ;;  %v1358_v46 = vpop.xlane.xlu1 %1357  ;;  %1471 = vadd.xlane.f32.xlu0 %v1470_v53  ;;  %3772 = vmatprep.mubr.msk.bf16.mxu1 %vm932_vm3, %v1639_v34  ;;  %v1580_v18 = vmul.f32 %v4099_v24, %v5332_v62  ;;  %v6542_v34 = vld [vmem:[#allocation10_spill] sm:$0xff]  ;;  %v6543_v53 = vld [vmem:[#allocation13_spill] sm:$0xff] }
 0x3cc   :  { %v4103_v27 = vpop.eup %4102  ;;  %4114 = vrcp.f32 %v1358_v46  ;;  %3779 = vmatpush3.bf16.msra.mxu1 %v6538_v55  ;;  %v1485_v37 = vsel %vm932_vm3, %v5584_v20, 0.0  ;;  %v5611_v46 = vpop.xlane.xlu0 %1396 }
 0x3cd   :  { %3780 = vmatprep.subr.bf16.mxu1 %v6539_v49  ;;  %v1640_v26 = vpack.c.bf16 %v1580_v18, %v1579_v47  ;;  %4116 = vrcp.f32 %v1361_v16  ;;  %v1581_v35 = vmul.f32 %v4103_v27, %v5276_v14  ;;  %v6544_v27 = vld [vmem:[#allocation15_spill] sm:$0xff] }
 0x3ce   :  { %v4105_v30 = vpop.eup %4104 }
 0x3cf   :  { %v5593_v4 = vpop.eup %4106  ;;  %v1364_v10 = vpop.xlane.xlu1 %1363  ;;  %1486 = vadd.xlane.f32.xlu0 %v1485_v37  ;;  %3773 = vmatmul.mubr.msk.bf16.gmra.mrb[20].mxu1 %vm932_vm3, %v1640_v26  ;;  %v1582_v62 = vmul.f32 %v4105_v30, %v5337_v1 }
 0x3d0   :  { %v4109_v29 = vpop.eup %4108  ;;  %4118 = vrcp.f32 %v1364_v10  ;;  %3781 = vmatpush3.bf16.msra.mxu1 %v6539_v49  ;;  %2112 = vrot.lane.b32.xlu1 %v6540_v59, %s4370_s18  ;;  %v1491_v40 = vsel %vm932_vm3, %v5593_v4, 0.0  ;;  %v6545_v10 = vld [vmem:[#allocation20_spill] sm:$0xff] }
 0x3d1   :  { %3782 = vmatprep.subr.bf16.mxu1 %v6541_v54  ;;  %v1641_v45 = vpack.c.bf16 %v1582_v62, %v1581_v35  ;;  %v1583_v58 = vmul.f32 %v4109_v29, %v5286_v2 }
 0x3d2   :  { %v4111_v17 = vpop.eup %4110 }
 0x3d3   :  { %v1584_v14 = vmul.f32 %v4111_v17, %v5344_v11  ;;  %v1367_v55 = vpop.xlane.xlu1 %1366  ;;  %1492 = vadd.xlane.f32.xlu0 %v1491_v40  ;;  %3784 = vmatprep.mubr.msk.bf16.mxu1 %vm932_vm3, %v1641_v45  ;;  %v4113_v1 = vpop.eup %4112 }
 0x3d4   :  { %3783 = vmatpush3.bf16.msra.mxu1 %v6541_v54  ;;  %2025 = vrot.lane.b32.xlu1 %v6542_v34, %s4369_s1  ;;  %4120 = vrcp.f32 %v1367_v55  ;;  %v1585_v11 = vmul.f32 %v4113_v1, %v5293_v23 }
 0x3d5   :  { %v1642_v24 = vpack.c.bf16 %v1584_v14, %v1583_v58  ;;  %3808 = vmatprep.subr.bf16.mxu1 %v6543_v53  ;;  %v1178_v14 = vsub.f32 %v5256_v60, %v5526_v41  ;;  %v1188_v60 = vsub.f32 %v5284_v7, %v5542_v5  ;;  %v1179_v7 = vsub.f32 %v5163_v6, %v5524_v48 }
 0x3d6   :  { %v4115_v16 = vpop.eup %4114 }
 0x3d7   :  { %v1370_v2 = vpop.xlane.xlu1 %1369  ;;  %3785 = vmatmul.mubr.msk.bf16.vlgmr.msra.gmra.mrb[24].mxu1 %vm932_vm3, %v1642_v24  ;;  %v1586_v47 = vmul.f32 %v4115_v16, %v5350_v3  ;;  %v4117_v18 = vpop.eup %4116  ;;  %v1295_v24 = vmul.f32 1.442695, %v1178_v14 }
 0x3d8   :  { %4122 = vrcp.f32 %v1370_v2  ;;  %3809 = vmatpush3.bf16.msra.mxu1 %v6543_v53  ;;  %2114 = vrot.lane.b32.xlu1 %v6542_v34, %s4370_s18  ;;  %v1587_v23 = vmul.f32 %v4117_v18, %v5297_v36  ;;  %v1186_v53 = vsub.f32 %v5274_v12, %v5539_v0  ;;  %v6546_v18 = vld [vmem:[#allocation47_spill] sm:$0xff] }
 0x3d9   :  { %3810 = vmatprep.subr.bf16.mxu1 %v6544_v27  ;;  %v1643_v49 = vpack.c.bf16 %v1586_v47, %v1585_v11 }
 0x3da   :  { %v4119_v26 = vpop.eup %4118 }
 0x3db   :  { %v5620_v30 = vpop.xlane.xlu1 %1372  ;;  %3788 = vmatprep.mubr.msk.bf16.mxu1 %vm932_vm3, %v1643_v49  ;;  %v5623_v37 = vpop.xlane.xlu0 %1381  ;;  %v1588_v3 = vmul.f32 %v4119_v26, %v5356_v19  ;;  %v1315_v49 = vmul.f32 1.442695, %v1188_v60 }
 0x3dc   :  { %3811 = vmatpush3.bf16.msra.mxu1 %v6544_v27  ;;  %v1177_v27 = vsub.f32 %v6546_v18, %v5522_v8 }
 0x3dd   :  { %3812 = vmatprep.subr.bf16.mxu1 %v6545_v10  ;;  %v1644_v35 = vpack.c.bf16 %v1588_v3, %v1587_v23 }
 0x3de   :  { %v4121_v54 = vpop.eup %4120  ;;  %v1293_v3 = vmul.f32 1.442695, %v1177_v27 }
 0x3df   :  { %v5629_v62 = vpop.xlane.xlu1 %1375  ;;  %3789 = vmatmul.mubr.msk.bf16.gmra.mrb[28].mxu1 %vm932_vm3, %v1644_v35  ;;  %v5632_v29 = vpop.xlane.xlu0 %1384  ;;  %v1589_v36 = vmul.f32 %v4121_v54, %v5363_v38  ;;  %v1297_v54 = vmul.f32 1.442695, %v1179_v7 }
 0x3e0   :  { %3813 = vmatpush3.bf16.msra.mxu1 %v6545_v10 }
 0x3e2   :  { %v4123_v45 = vpop.eup %4122 }
 0x3e3   :  { %v1391_v17 = vpop.xlane.xlu1 %1390  ;;  %v5635_v40 = vpop.xlane.xlu0 %1387  ;;  %v1590_v19 = vmul.f32 %v4123_v45, %v5370_v21  ;;  %v1311_v21 = vmul.f32 1.442695, %v1186_v53 }
 0x3e4   :  { %4124 = vrcp.f32 %v1391_v17  ;;  %v1185_v17 = vsub.f32 %v5175_v31, %v5528_v39  ;;  %v1187_v31 = vsub.f32 %v5192_v61, %v5535_v13 }
 0x3e5   :  { %v1645_v58 = vpack.c.bf16 %v1590_v19, %v1589_v36 }
 0x3e6   :  { %v1309_v14 = vmul.f32 1.442695, %v1185_v17 }
 0x3e7   :  { %3800 = vmatprep.mubr.msk.bf16.mxu0 %vm932_vm3, %v1645_v58  ;;  %v1394_v55 = vpop.xlane.xlu1 %1393  ;;  %v1403_v1 = vpop.xlane.xlu0 %1402 }
 0x3e8   :  { %4126 = vrcp.f32 %v1394_v55 }
 0x3e9   :  { %2023 = vrot.lane.b32.xlu0 %v6540_v59, %s4369_s1  ;;  %4128 = vpow2.f32 %v1295_v24 }
 0x3ea   :  { %4130 = vpow2.f32 %v1311_v21 }
 0x3eb   :  { %v1400_v38 = vpop.xlane.xlu1 %1399  ;;  %v1406_v16 = vpop.xlane.xlu0 %1405  ;;  %4132 = vpow2.f32 %v1315_v49 }
 0x3ec   :  { %4134 = vpow2.f32 %v1293_v3 }
 0x3ed   :  { %4136 = vpow2.f32 %v1297_v54 }
 0x3ee   :  { %v4125_v11 = vpop.eup %4124  ;;  %4138 = vrcp.f32 %v1400_v38  ;;  %v1313_v38 = vmul.f32 1.442695, %v1187_v31 }
 0x3ef   :  { %v5648_v41 = vpop.xlane.xlu1 %1378  ;;  %v1409_v2 = vpop.xlane.xlu0 %1408  ;;  %v1597_v0 = vmul.f32 %v4125_v11, %v5393_v22  ;;  %v1180_v22 = vsub.f32 %v5267_v63, %v5531_v43  ;;  %4140 = vrcp.f32 %v1406_v16 }
 0x3f0   :  { %4142 = vrcp.f32 %v5611_v46 }
 0x3f1   :  { %v1299_v36 = vmul.f32 1.442695, %v1180_v22  ;;  %4144 = vrcp.f32 %v1403_v1 }
 0x3f2   :  { %v4127_v47 = vpop.eup %4126 }
 0x3f3   :  { %v5652_v26 = vpop.xlane.xlu1 %1417  ;;  %v1412_v12 = vpop.xlane.xlu0 %1411  ;;  %v1598_v23 = vmul.f32 %v4127_v47, %v5408_v51  ;;  %4146 = vpow2.f32 %v1299_v36 }
 0x3f4   :  { %v5661_v8 = vpop.eup %4128  ;;  %4148 = vpow2.f32 %v1309_v14 }
 0x3f5   :  { %v1649_v5 = vpack.c.bf16 %v1598_v23, %v1597_v0  ;;  %v1476_v6 = vsel %vm932_vm3, %v5661_v8, 0.0  ;;  %v5671_v48 = vpop.eup %4130  ;;  %4150 = vrcp.f32 %v1412_v12 }
 0x3f6   :  { %v1500_v19 = vsel %vm932_vm3, %v5671_v48, 0.0  ;;  %v5682_v58 = vpop.eup %4132 }
 0x3f7   :  { %v1442_v10 = vpop.xlane.xlu1 %1441  ;;  %3816 = vmatprep.mubr.msk.bf16.mxu1 %vm932_vm3, %v1649_v5  ;;  %v5659_v35 = vpop.xlane.xlu0 %1414  ;;  %v1506_v46 = vsel %vm932_vm3, %v5682_v58, 0.0 }
 0x3f8   :  { %v5690_v24 = vpop.eup %4134 }
 0x3f9   :  { %v5692_v53 = vpop.eup %4136  ;;  %v1473_v13 = vsel %vm932_vm3, %v5690_v24, 0.0 }
 0x3fa   :  { %v4139_v1 = vpop.eup %4138 }
 0x3fb   :  { %v5665_v45 = vpop.xlane.xlu1 %1447  ;;  %v5667_v51 = vpop.xlane.xlu0 %1420  ;;  %v1600_v47 = vmul.f32 %v4139_v1, %v5412_v32 }
 0x3fc   :  { %1477 = vadd.xlane.f32.xlu1 %v1476_v6  ;;  %v4141_v21 = vpop.eup %4140 }
 0x3fd   :  { %v4143_v60 = vpop.eup %4142  ;;  %v1602_v49 = vmul.f32 %v4141_v21, %v5418_v33 }
 0x3fe   :  { %v4145_v11 = vpop.eup %4144  ;;  %v1599_v0 = vmul.f32 %v4143_v60, %v5313_v56 }
 0x3ff   :  { %v5676_v63 = vpop.xlane.xlu1 %1429  ;;  %v5678_v43 = vpop.xlane.xlu0 %1423  ;;  %v1601_v23 = vmul.f32 %v4145_v11, %v5402_v44 }
 0x400   :  { %1501 = vadd.xlane.f32.xlu1 %v1500_v19  ;;  %v5706_v12 = vpop.eup %4146  ;;  %v1650_v32 = vpack.c.bf16 %v1600_v47, %v1599_v0  ;;  %v6551_v47 = vld [vmem:[#allocation32_spill] sm:$0xff] }
 0x401   :  { %v5710_v7 = vpop.eup %4148  ;;  %v1482_v33 = vsel %vm932_vm3, %v5706_v12, 0.0  ;;  %v1651_v54 = vpack.c.bf16 %v1602_v49, %v1601_v23  ;;  %v6552_v49 = vld [vmem:[#allocation33_spill] sm:$0xff] }
 0x402   :  { %v4151_v5 = vpop.eup %4150  ;;  %v1497_v19 = vsel %vm932_vm3, %v5710_v7, 0.0 }
 0x403   :  { %v5686_v39 = vpop.xlane.xlu1 %1453  ;;  %v1439_v55 = vpop.xlane.xlu0 %1438  ;;  %v1604_v6 = vmul.f32 %v4151_v5, %v5432_v25  ;;  %v6548_v25 = vld [vmem:[#allocation11_spill] sm:$0xff] }
 0x404   :  { %1507 = vadd.xlane.f32.xlu1 %v1506_v46  ;;  %4152 = vrcp.f32 %v1439_v55 }
 0x405   :  { %4154 = vrcp.f32 %v1409_v2  ;;  %v1479_v2 = vsel %vm932_vm3, %v5692_v53, 0.0 }
 0x406   :  { %4156 = vrcp.f32 %v1442_v10 }
 0x407   :  { %v5694_v16 = vpop.xlane.xlu1 %1459  ;;  %v5696_v61 = vpop.xlane.xlu0 %1444  ;;  %4158 = vpow2.f32 %v1313_v38 }
 0x408   :  { %1474 = vadd.xlane.f32.xlu0 %v1473_v13  ;;  %4160 = vrcp.f32 %v5629_v62  ;;  %v6547_v62 = vld [vmem:[#allocation34_spill] sm:$0xff] }
 0x409   :  { %4162 = vrcp.f32 %v5648_v41 }
 0x40a   :  { %4164 = vrcp.f32 %v5620_v30  ;;  %v6549_v30 = vld [vmem:[#allocation38_spill] sm:$0xff] }
 0x40b   :  { %v1939_v18 = vpop.permute.xlu1 %1938  ;;  %v5701_v27 = vpop.xlane.xlu0 %1426  ;;  %4166 = vrcp.f32 %v5623_v37  ;;  %v6550_v37 = vld [vmem:[#allocation8_spill] sm:$0xff] }
 0x40c   :  { %1480 = vadd.xlane.f32.xlu0 %v1479_v2  ;;  %3814 = vmatprep.subr.bf16.mxu1 %v1939_v18  ;;  %4168 = vrcp.f32 %v5635_v40 }
 0x40d   :  { %3815 = vmatpush3.bf16.msra.mxu1 %v1939_v18  ;;  %4170 = vrcp.f32 %v5659_v35  ;;  %v6553_v35 = vld [vmem:[#allocation31_spill] sm:$0xff] }
 0x40e   :  { %v4153_v22 = vpop.eup %4152  ;;  %4172 = vrcp.f32 %v5632_v29  ;;  %v6554_v29 = vld [vmem:[#allocation37_spill] sm:$0xff] }
 0x40f   :  { %v5712_v3 = vpop.permute.xlu1 %2021  ;;  %v5714_v10 = vpop.xlane.xlu0 %1432  ;;  %v1613_v14 = vmul.f32 %v4153_v22, %v5474_v42  ;;  %4174 = vrcp.f32 %v5652_v26 }
 0x410   :  { %1483 = vadd.xlane.f32.xlu0 %v1482_v33  ;;  %3817 = vmatmul.mubr.msk.bf16.vlgmr.msra.gmra.mrb[32].mxu1 %vm932_vm3, %v1650_v32  ;;  %v4155_v56 = vpop.eup %4154  ;;  %4176 = vrcp.f32 %v5696_v61 }
 0x411   :  { %3820 = vmatprep.mubr.msk.bf16.mxu1 %vm932_vm3, %v1651_v54  ;;  %v4157_v44 = vpop.eup %4156  ;;  %v1603_v41 = vmul.f32 %v4155_v56, %v6547_v62 }
 0x412   :  { %v5729_v31 = vpop.eup %4158  ;;  %v1614_v55 = vmul.f32 %v4157_v44, %v6549_v30  ;;  %v6555_v44 = vld [vmem:[#allocation30_spill] sm:$0xff] }
 0x413   :  { %v2111_v17 = vpop.permute.xlu1 %2110  ;;  %v5724_v36 = vpop.xlane.xlu0 %1435  ;;  %v1652_v46 = vpack.c.bf16 %v1604_v6, %v1603_v41  ;;  %v1503_v42 = vsel %vm932_vm3, %v5729_v31, 0.0  ;;  %v6558_v41 = vld [vmem:[#allocation35_spill] sm:$0xff] }
 0x414   :  { %1498 = vadd.xlane.f32.xlu0 %v1497_v19  ;;  %3840 = vmatprep.subr.bf16.mxu1 %v2111_v17  ;;  %v1657_v1 = vpack.c.bf16 %v1614_v55, %v1613_v14  ;;  %v4161_v13 = vpop.eup %4160  ;;  %v6557_v14 = vld [vmem:[#allocation28_spill] sm:$0xff] }
 0x415   :  { %2116 = vrot.lane.b32.xlu1 %v6548_v25, %s4370_s18  ;;  %3841 = vmatpush3.bf16.msra.mxu1 %v2111_v17  ;;  %v4163_v60 = vpop.eup %4162  ;;  %v1592_v18 = vmul.f32 %v4161_v13, %v6551_v47  ;;  %v6556_v17 = vld [vmem:[#allocation36_spill] sm:$0xff] }
 0x416   :  { %v4165_v11 = vpop.eup %4164  ;;  %v1593_v0 = vmul.f32 %v4163_v60, %v6552_v49 }
 0x417   :  { %v5736_v38 = vpop.xlane.xlu0 %1450  ;;  %v4167_v40 = vpop.eup %4166  ;;  %v1591_v23 = vmul.f32 %v4165_v11, %v6553_v35 }
 0x418   :  { %1504 = vadd.xlane.f32.xlu0 %v1503_v42  ;;  %3821 = vmatmul.mubr.msk.bf16.gmra.mrb[36].mxu1 %vm932_vm3, %v1652_v46  ;;  %v1594_v26 = vmul.f32 %v4167_v40, %v6554_v29  ;;  %v4169_v5 = vpop.eup %4168  ;;  %4178 = vrcp.f32 %v5736_v38  ;;  %v6559_v29 = vld [vmem:[#allocation41_spill] sm:$0xff] }
 0x419   :  { %2199 = vrot.lane.b32.xlu1 %v6550_v37, %s4371_s19  ;;  %3848 = vmatprep.mubr.msk.bf16.mxu1 %vm932_vm3, %v1657_v1  ;;  %v1646_v32 = vpack.c.bf16 %v1592_v18, %v1591_v23  ;;  %v4171_v54 = vpop.eup %4170  ;;  %v1596_v6 = vmul.f32 %v4169_v5, %v6555_v44  ;;  %4180 = vrcp.f32 %v5665_v45 }
 0x41a   :  { %v1647_v33 = vpack.c.bf16 %v1594_v26, %v1593_v0  ;;  %v4173_v22 = vpop.eup %4172  ;;  %v1605_v19 = vmul.f32 %v4171_v54, %v6556_v17  ;;  %4182 = vrcp.f32 %v5686_v39  ;;  %v6561_v39 = vld [vmem:[#allocation48_spill] sm:$0xff] }
 0x41b   :  { %v5747_v21 = vpop.xlane.xlu0 %1456  ;;  %v4175_v56 = vpop.eup %4174  ;;  %v1595_v62 = vmul.f32 %v4173_v22, %v6557_v14 }
 0x41c   :  { %v1606_v30 = vmul.f32 %v4175_v56, %v6558_v41  ;;  %4184 = vrcp.f32 %v5747_v21  ;;  %v4177_v49 = vpop.eup %4176  ;;  %v6562_v21 = vld [vmem:[#allocation50_spill] sm:$0xff] }
 0x41d   :  { %2288 = vrot.lane.b32.xlu1 %v6550_v37, %s4372_s20  ;;  %v1648_v55 = vpack.c.bf16 %v1596_v6, %v1595_v62  ;;  %v1615_v38 = vmul.f32 %v4177_v49, %v6559_v29 }
 0x41e   :  { %v1653_v46 = vpack.c.bf16 %v1606_v30, %v1605_v19 }
 0x41f   :  { %v1850_v2 = vpop.permute.xlu0 %1849 }
 0x420   :  { %3798 = vmatprep.subr.bf16.mxu0 %v1850_v2 }
 0x421   :  { %2290 = vrot.lane.b32.xlu1 %v6540_v59, %s4372_s20  ;;  %3799 = vmatpush3.bf16.msra.mxu0 %v1850_v2 }
 0x422   :  { %3824 = vmatprep.subr.bf16.mxu0 %v5712_v3  ;;  %v4179_v35 = vpop.eup %4178 }
 0x423   :  { %v4181_v23 = vpop.eup %4180 }
 0x424   :  { %3801 = vmatmul.mubr.msk.bf16.vlgmr.msra.gmra.mrb[0].mxu0 %vm932_vm3, %v1646_v32  ;;  %v4183_v61 = vpop.eup %4182  ;;  %v6560_v32 = vld [vmem:[#allocation54_spill] sm:$0xff] }
 0x425   :  { %2292 = vrot.lane.b32.xlu1 %v6542_v34, %s4372_s20  ;;  %3804 = vmatprep.mubr.msk.bf16.mxu0 %vm932_vm3, %v1647_v33  ;;  %v1617_v5 = vmul.f32 %v4179_v35, %v6560_v32  ;;  %v1616_v33 = vmul.f32 %v4181_v23, %v6561_v39  ;;  %v1618_v54 = vmul.f32 %v4183_v61, %v6562_v21 }
 0x426   :  { %3825 = vmatpush3.bf16.msra.mxu0 %v5712_v3 }
 0x427   :  { %v1658_v22 = vpack.c.bf16 %v1616_v33, %v1615_v38  ;;  %v1659_v6 = vpack.c.bf16 %v1618_v54, %v1617_v5 }
 0x429   :  { %2294 = vrot.lane.b32.xlu1 %v6548_v25, %s4372_s20 }
 0x42c   :  { %3805 = vmatmul.mubr.msk.bf16.gmra.mrb[4].mxu0 %vm932_vm3, %v1648_v55  ;;  %v6563_v55 = vld [vmem:[#allocation55_spill] sm:$0xff] }
 0x42d   :  { %3832 = vmatprep.mubr.msk.bf16.mxu0 %vm932_vm3, %v1653_v46 }
 0x42e   :  { %2027 = vrot.lane.b32.xlu0 %v6548_v25, %s4369_s1 }
 0x432   :  { %2201 = vrot.lane.b32.xlu0 %v6540_v59, %s4371_s19 }
 0x436   :  { %2203 = vrot.lane.b32.xlu0 %v6542_v34, %s4371_s19 }
 0x43a   :  { %2205 = vrot.lane.b32.xlu0 %v6548_v25, %s4371_s19 }
 0x444   :  { %v5780_v3 = vpop.xlane.xlu1 %1465 }
 0x448   :  { %v1490_v42 = vpop.xlane.xlu1 %1489 }
 0x44c   :  { %v1496_v1 = vpop.xlane.xlu1 %1495 }
 0x450   :  { %v2113_v37 = vpop.permute.xlu1 %2112  ;;  %v5782_v13 = vpop.xlane.xlu0 %1462 }
 0x451   :  { %3842 = vmatprep.subr.bf16.mxu1 %v2113_v37 }
 0x452   :  { %3843 = vmatpush3.bf16.msra.mxu1 %v2113_v37 }
 0x454   :  { %v2026_v60 = vpop.permute.xlu1 %2025  ;;  %v5784_v11 = vpop.xlane.xlu0 %1468 }
 0x458   :  { %v2115_v40 = vpop.permute.xlu1 %2114  ;;  %v5786_v59 = vpop.xlane.xlu0 %1471 }
 0x459   :  { %3844 = vmatprep.subr.bf16.mxu1 %v2115_v40 }
 0x45a   :  { %3845 = vmatpush3.bf16.msra.mxu1 %v2115_v40  ;;  %v6564_v40 = vld [vmem:[#allocation51_spill] sm:$0xff] }
 0x45c   :  { %v1487_v34 = vpop.xlane.xlu0 %1486 }
 0x45d   :  { %4186 = vrcp.f32 %v1487_v34 }
 0x45e   :  { %4188 = vrcp.f32 %v5694_v16  ;;  %v4185_v16 = vpop.eup %4184 }
 0x45f   :  { %4190 = vrcp.f32 %v1490_v42  ;;  %v1619_v46 = vmul.f32 %v4185_v16, %v6563_v55  ;;  %v6567_v16 = vld [vmem:[#allocation39_spill] sm:$0xff] }
 0x460   :  { %v1493_v47 = vpop.xlane.xlu0 %1492  ;;  %4192 = vrcp.f32 %v5678_v43 }
 0x461   :  { %4194 = vrcp.f32 %v1493_v47 }
 0x462   :  { %4196 = vrcp.f32 %v5701_v27 }
 0x463   :  { %4198 = vrcp.f32 %v1496_v1 }
 0x464   :  { %v2024_v25 = vpop.permute.xlu0 %2023  ;;  %4200 = vrcp.f32 %v5667_v51 }
 0x465   :  { %3826 = vmatprep.subr.bf16.mxu0 %v2024_v25  ;;  %4202 = vrcp.f32 %v5676_v63 }
 0x466   :  { %3827 = vmatpush3.bf16.msra.mxu0 %v2024_v25  ;;  %4204 = vrcp.f32 %v5714_v10 }
 0x467   :  { %3828 = vmatprep.subr.bf16.mxu0 %v2026_v60  ;;  %v4187_v17 = vpop.eup %4186 }
 0x468   :  { %v4189_v14 = vpop.eup %4188  ;;  %v1629_v37 = vmul.f32 %v4187_v17, %v5584_v20 }
 0x469   :  { %v4191_v41 = vpop.eup %4190  ;;  %v1620_v34 = vmul.f32 %v4189_v14, %v6564_v40 }
 0x46a   :  { %3829 = vmatpush3.bf16.msra.mxu0 %v2026_v60  ;;  %v1630_v27 = vmul.f32 %v4191_v41, %v5550_v57  ;;  %v4193_v57 = vpop.eup %4192 }
 0x46b   :  { %v1660_v1 = vpack.c.bf16 %v1620_v34, %v1619_v46  ;;  %v4195_v10 = vpop.eup %4194 }
 0x46c   :  { %v1665_v25 = vpack.c.bf16 %v1630_v27, %v1629_v37  ;;  %v4197_v35 = vpop.eup %4196  ;;  %v1631_v38 = vmul.f32 %v4195_v10, %v5593_v4 }
 0x46d   :  { %v4199_v61 = vpop.eup %4198 }
 0x46e   :  { %v4201_v29 = vpop.eup %4200 }
 0x489   :  { %v5791_v18 = vpop.xlane.xlu1 %1477 }
 0x48d   :  { %v1502_v2 = vpop.xlane.xlu1 %1501 }
 0x48e   :  { %4206 = vrcp.f32 %v1502_v2 }
 0x48f   :  { %4208 = vrcp.f32 %v5724_v36 }
 0x491   :  { %v1508_v0 = vpop.xlane.xlu1 %1507 }
 0x495   :  { %v2117_v26 = vpop.permute.xlu1 %2116  ;;  %v5797_v45 = vpop.xlane.xlu0 %1474 }
 0x496   :  { %3846 = vmatprep.subr.bf16.mxu1 %v2117_v26 }
 0x497   :  { %3847 = vmatpush3.bf16.msra.mxu1 %v2117_v26  ;;  %v4203_v26 = vpop.eup %4202 }
 0x498   :  { %v4205_v39 = vpop.eup %4204 }
 0x499   :  { %v5802_v56 = vpop.permute.xlu1 %2199  ;;  %v5804_v44 = vpop.xlane.xlu0 %1480 }
 0x49a   :  { %v5807_v19 = vpop.f32.mrb[16].mxu1  ;;  %3849 = vmatmul.mubr.msk.bf16.vlgmr.msra.gmra.mrb[40].mxu1 %vm932_vm3, %v1658_v22  ;;  %v4207_v22 = vpop.eup %4206 }
 0x49b   :  { %v5810_v62 = vpop.f32.mrb[17].mxu1  ;;  %3852 = vmatprep.mubr.msk.bf16.mxu1 %vm932_vm3, %v1659_v6  ;;  %v1607_v6 = vmul.f32 %v4201_v29, %v6567_v16  ;;  %v4209_v4 = vpop.eup %4208 }
 0x49c   :  { %v5814_v30 = vpop.f32.mrb[18].mxu1 }
 0x49d   :  { %v2289_v42 = vpop.permute.xlu1 %2288  ;;  %v5817_v43 = vpop.f32.mrb[19].mxu1 }
 0x49e   :  { %v5821_v60 = vpop.xlane.xlu0 %1483  ;;  %3872 = vmatprep.subr.bf16.mxu1 %v2289_v42 }
 0x49f   :  { %3873 = vmatpush3.bf16.msra.mxu1 %v2289_v42 }
 0x4a1   :  { %v2291_v47 = vpop.permute.xlu1 %2290 }
 0x4a2   :  { %v1499_v20 = vpop.xlane.xlu0 %1498  ;;  %v5828_v51 = vpop.f32.mrb[20].mxu1  ;;  %3853 = vmatmul.mubr.msk.bf16.gmra.mrb[44].mxu1 %vm932_vm3, %v1660_v1  ;;  %3874 = vmatprep.subr.bf16.mxu1 %v2291_v47  ;;  %v1634_v1 = vmul.f32 %v4207_v22, %v5671_v48 }
 0x4a3   :  { %4210 = vrcp.f32 %v1499_v20  ;;  %v5831_v49 = vpop.f32.mrb[21].mxu1  ;;  %3875 = vmatpush3.bf16.msra.mxu1 %v2291_v47  ;;  %3880 = vmatprep.mubr.msk.bf16.mxu1 %vm932_vm3, %v1665_v25  ;;  %v6569_v20 = vld [vmem:[#allocation53_spill] sm:$0xff] }
 0x4a4   :  { %4212 = vrcp.f32 %v5782_v13  ;;  %v5835_v63 = vpop.f32.mrb[22].mxu1  ;;  %v6565_v13 = vld [vmem:[#allocation40_spill] sm:$0xff] }
 0x4a5   :  { %4214 = vrcp.f32 %v1508_v0  ;;  %v2293_v36 = vpop.permute.xlu1 %2292  ;;  %v5837_v2 = vpop.f32.mrb[23].mxu1  ;;  %v1608_v32 = vmul.f32 %v4193_v57, %v6565_v13  ;;  %v1632_v0 = vmul.f32 %v4199_v61, %v5556_v50  ;;  %v6568_v50 = vld [vmem:[#allocation49_spill] sm:$0xff]  ;;  %v1612_v57 = vmul.f32 %v4209_v4, %v6569_v20 }
 0x4a6   :  { %4216 = vrcp.f32 %v5780_v3  ;;  %v1505_v23 = vpop.xlane.xlu0 %1504  ;;  %3876 = vmatprep.subr.bf16.mxu1 %v2293_v36  ;;  %v6566_v3 = vld [vmem:[#allocation42_spill] sm:$0xff]  ;;  %v1610_v55 = vmul.f32 %v4203_v26, %v6568_v50 }
 0x4a7   :  { %4218 = vrcp.f32 %v1505_v23  ;;  %3877 = vmatpush3.bf16.msra.mxu1 %v2293_v36  ;;  %v1609_v54 = vmul.f32 %v4197_v35, %v6566_v3  ;;  %v1666_v14 = vpack.c.bf16 %v1632_v0, %v1631_v38  ;;  %v1654_v42 = vpack.c.bf16 %v1608_v32, %v1607_v6  ;;  %v6570_v23 = vld [vmem:[#allocation52_spill] sm:$0xff] }
 0x4a8   :  { %4220 = vrcp.f32 %v5786_v59 }
 0x4a9   :  { %v2295_v5 = vpop.permute.xlu1 %2294  ;;  %4222 = vrcp.f32 %v5797_v45  ;;  %v1655_v59 = vpack.c.bf16 %v1610_v55, %v1609_v54 }
 0x4aa   :  { %v2028_v33 = vpop.permute.xlu0 %2027  ;;  %v5843_v21 = vpop.f32.mrb[24].mxu1  ;;  %3878 = vmatprep.subr.bf16.mxu1 %v2295_v5  ;;  %4224 = vrcp.f32 %v5784_v11 }
 0x4ab   :  { %3830 = vmatprep.subr.bf16.mxu0 %v2028_v33  ;;  %v5847_v17 = vpop.f32.mrb[25].mxu1  ;;  %3879 = vmatpush3.bf16.msra.mxu1 %v2295_v5  ;;  %4226 = vrcp.f32 %v5791_v18 }
 0x4ac   :  { %3831 = vmatpush3.bf16.msra.mxu0 %v2028_v33  ;;  %v5850_v41 = vpop.f32.mrb[26].mxu1  ;;  %4228 = vrcp.f32 %v5821_v60 }
 0x4ad   :  { %v4211_v46 = vpop.eup %4210  ;;  %3856 = vmatprep.subr.bf16.mxu0 %v5802_v56  ;;  %v5855_v37 = vpop.f32.mrb[27].mxu1  ;;  %4230 = vrcp.f32 %v5804_v44 }
 0x4ae   :  { %v4213_v40 = vpop.eup %4212  ;;  %v2202_v34 = vpop.permute.xlu0 %2201  ;;  %3881 = vmatmul.mubr.msk.bf16.vlgmr.msra.gmra.mrb[48].mxu1 %vm932_vm3, %v1666_v14  ;;  %v1633_v27 = vmul.f32 %v4211_v46, %v5710_v7 }
 0x4af   :  { %v4215_v47 = vpop.eup %4214  ;;  %3833 = vmatmul.mubr.msk.bf16.vlgmr.msra.gmra.mrb[8].mxu0 %vm932_vm3, %v1654_v42  ;;  %v1621_v36 = vmul.f32 %v4213_v40, %v5562_v9 }
 0x4b0   :  { %v4217_v45 = vpop.eup %4216  ;;  %3836 = vmatprep.mubr.msk.bf16.mxu0 %vm932_vm3, %v1655_v59  ;;  %3857 = vmatpush3.bf16.msra.mxu0 %v5802_v56  ;;  %v1667_v25 = vpack.c.bf16 %v1634_v1, %v1633_v27  ;;  %v1636_v18 = vmul.f32 %v4215_v47, %v5682_v58  ;;  %v1611_v56 = vmul.f32 %v4205_v39, %v6570_v23 }
 0x4b1   :  { %v4219_v11 = vpop.eup %4218  ;;  %3858 = vmatprep.subr.bf16.mxu0 %v2202_v34  ;;  %v1622_v38 = vmul.f32 %v4217_v45, %v5545_v28 }
 0x4b2   :  { %3884 = vmatprep.mubr.msk.bf16.mxu1 %vm932_vm3, %v1667_v25  ;;  %v2204_v7 = vpop.permute.xlu0 %2203  ;;  %v5867_v10 = vpop.f32.mrb[28].mxu1  ;;  %v1635_v48 = vmul.f32 %v4219_v11, %v5729_v31  ;;  %v1656_v31 = vpack.c.bf16 %v1612_v57, %v1611_v56 }
 0x4b3   :  { %v5872_v35 = vpop.f32.mrb[29].mxu1  ;;  %v4221_v13 = vpop.eup %4220  ;;  %v1661_v9 = vpack.c.bf16 %v1622_v38, %v1621_v36 }
 0x4b4   :  { %3859 = vmatpush3.bf16.msra.mxu0 %v2202_v34  ;;  %v5876_v61 = vpop.f32.mrb[30].mxu1  ;;  %v1668_v29 = vpack.c.bf16 %v1636_v18, %v1635_v48  ;;  %v4223_v58 = vpop.eup %4222  ;;  %v1624_v28 = vmul.f32 %v4221_v13, %v5575_v15 }
 0x4b5   :  { %3860 = vmatprep.subr.bf16.mxu0 %v2204_v7  ;;  %v5879_v26 = vpop.f32.mrb[31].mxu1  ;;  %v4225_v60 = vpop.eup %4224  ;;  %v1625_v39 = vmul.f32 %v4223_v58, %v5690_v24 }
 0x4b6   :  { %3885 = vmatmul.mubr.msk.bf16.gmra.mrb[52].mxu1 %vm932_vm3, %v1668_v29  ;;  %v2206_v32 = vpop.permute.xlu0 %2205  ;;  %v4227_v5 = vpop.eup %4226  ;;  %v1623_v0 = vmul.f32 %v4225_v60, %v5568_v52 }
 0x4b7   :  { %3837 = vmatmul.mubr.msk.bf16.gmra.mrb[12].mxu0 %vm932_vm3, %v1656_v31  ;;  %v1626_v44 = vmul.f32 %v4227_v5, %v5661_v8  ;;  %v4229_v3 = vpop.eup %4228 }
 0x4b8   :  { %3861 = vmatpush3.bf16.msra.mxu0 %v2204_v7  ;;  %3864 = vmatprep.mubr.msk.bf16.mxu0 %vm932_vm3, %v1661_v9  ;;  %v1662_v33 = vpack.c.bf16 %v1624_v28, %v1623_v0  ;;  %v4231_v22 = vpop.eup %4230  ;;  %v1628_v16 = vmul.f32 %v4229_v3, %v5706_v12 }
 0x4b9   :  { %3862 = vmatprep.subr.bf16.mxu0 %v2206_v32  ;;  %v1663_v54 = vpack.c.bf16 %v1626_v44, %v1625_v39  ;;  %v1627_v15 = vmul.f32 %v4231_v22, %v5692_v53 }
 0x4bb   :  { %v1664_v6 = vpack.c.bf16 %v1628_v16, %v1627_v15 }
 0x4bc   :  { %3863 = vmatpush3.bf16.msra.mxu0 %v2206_v32 }
 0x4bf   :  { %3865 = vmatmul.mubr.msk.bf16.vlgmr.msra.gmra.mrb[16].mxu0 %vm932_vm3, %v1662_v33 }
 0x4c0   :  { %3868 = vmatprep.mubr.msk.bf16.mxu0 %vm932_vm3, %v1663_v54 }
 0x4c7   :  { %3869 = vmatmul.mubr.msk.bf16.gmra.mrb[20].mxu0 %vm932_vm3, %v1664_v6 }
 0x4e3   :  { %v5894_v24 = vpop.f32.mrb[32].mxu1 }
 0x4e4   :  { %v5896_v52 = vpop.f32.mrb[33].mxu1 }
 0x4e5   :  { %v5898_v8 = vpop.f32.mrb[34].mxu1 }
 0x4e6   :  { %v5900_v4 = vpop.f32.mrb[35].mxu1 }
 0x4eb   :  { %v5902_v14 = vpop.f32.mrb[36].mxu1 }
 0x4ec   :  { %v5904_v50 = vpop.f32.mrb[37].mxu1 }
 0x4ed   :  { %v5906_v55 = vpop.f32.mrb[38].mxu1 }
 0x4ee   :  { %v5908_v12 = vpop.f32.mrb[39].mxu1 }
 0x4f7   :  { %v3802_v53 = vpop.f32.mrb[0].mxu0 }
 0x4f8   :  { %2421 = vrot.lane.b32.xlu0 %v3802_v53, %s4371_s19  ;;  %v1901_v46 = vpop.f32.mrb[1].mxu0 }
 0x4f9   :  { %v3803_v42 = vpop.f32.mrb[2].mxu0 }
 0x4fa   :  { %2423 = vrot.lane.b32.xlu1 %v3803_v42, %s4371_s19  ;;  %v1904_v40 = vpop.f32.mrb[3].mxu0 }
 0x4fc   :  { %2417 = vrot.lane.b32.xlu0 %v1901_v46, %s4371_s19 }
 0x4fe   :  { %2419 = vrot.lane.b32.xlu1 %v1904_v40, %s4371_s19 }
 0x4ff   :  { %v3806_v34 = vpop.f32.mrb[4].mxu0 }
 0x500   :  { %2429 = vrot.lane.b32.xlu0 %v3806_v34, %s4371_s19  ;;  %v1917_v59 = vpop.f32.mrb[5].mxu0 }
 0x501   :  { %v3807_v27 = vpop.f32.mrb[6].mxu0 }
 0x502   :  { %2431 = vrot.lane.b32.xlu1 %v3807_v27, %s4371_s19  ;;  %v1920_v1 = vpop.f32.mrb[7].mxu0 }
 0x504   :  { %2425 = vrot.lane.b32.xlu0 %v1917_v59, %s4371_s19 }
 0x506   :  { %2427 = vrot.lane.b32.xlu1 %v1920_v1, %s4371_s19 }
 0x508   :  { %2389 = vrot.lane.b32.xlu0 %v5843_v21, %s4372_s20 }
 0x50a   :  { %2391 = vrot.lane.b32.xlu1 %v5850_v41, %s4372_s20 }
 0x56c   :  { %v2424_v47 = vpop.permute.xlu1 %2423 }
 0x56d   :  { %v5922_v45 = vpop.f32.mrb[40].mxu1 }
 0x56e   :  { %v5924_v25 = vpop.f32.mrb[41].mxu1 }
 0x56f   :  { %v5926_v11 = vpop.f32.mrb[42].mxu1 }
 0x570   :  { %v5928_v20 = vpop.f32.mrb[43].mxu1  ;;  %v5930_v57 = vpop.permute.xlu1 %2419 }
 0x574   :  { %v5932_v7 = vpop.permute.xlu1 %2431 }
 0x575   :  { %v5934_v48 = vpop.f32.mrb[44].mxu1 }
 0x576   :  { %v5936_v18 = vpop.f32.mrb[45].mxu1 }
 0x577   :  { %v5938_v21 = vpop.f32.mrb[46].mxu1 }
 0x578   :  { %v5940_v41 = vpop.f32.mrb[47].mxu1  ;;  %v5942_v36 = vpop.permute.xlu1 %2427 }
 0x57c   :  { %v2392_v23 = vpop.permute.xlu1 %2391 }
 0x57d   :  { %v2605_v56 = vsel %vm2601_vm5, %v5814_v30, %v2392_v23 }
 0x57e   :  { %v5947_v29 = vsel %vm108_vm0, %v2605_v56, %v2424_v47 }
 0x581   :  { %v5949_v38 = vpop.f32.mrb[48].mxu1 }
 0x582   :  { %v3834_v31 = vpop.f32.mrb[8].mxu0  ;;  %v5951_v13 = vpop.f32.mrb[49].mxu1 }
 0x583   :  { %2485 = vrot.lane.b32.xlu0 %v3834_v31, %s4369_s1  ;;  %v2079_v9 = vpop.f32.mrb[9].mxu0  ;;  %v5954_v58 = vpop.f32.mrb[50].mxu1 }
 0x584   :  { %v3835_v60 = vpop.f32.mrb[10].mxu0  ;;  %v5956_v32 = vpop.f32.mrb[51].mxu1 }
 0x585   :  { %2487 = vrot.lane.b32.xlu1 %v3835_v60, %s4369_s1  ;;  %v2082_v5 = vpop.f32.mrb[11].mxu0 }
 0x587   :  { %2385 = vrot.lane.b32.xlu0 %v5847_v17, %s4372_s20 }
 0x589   :  { %2387 = vrot.lane.b32.xlu1 %v5855_v37, %s4372_s20  ;;  %v5963_v30 = vpop.f32.mrb[52].mxu1 }
 0x58a   :  { %v3838_v28 = vpop.f32.mrb[12].mxu0  ;;  %v5965_v39 = vpop.f32.mrb[53].mxu1 }
 0x58b   :  { %2481 = vrot.lane.b32.xlu0 %v2079_v9, %s4369_s1  ;;  %v2095_v0 = vpop.f32.mrb[13].mxu0  ;;  %v5968_v44 = vpop.f32.mrb[54].mxu1 }
 0x58c   :  { %v3839_v33 = vpop.f32.mrb[14].mxu0  ;;  %v5970_v3 = vpop.f32.mrb[55].mxu1 }
 0x58d   :  { %2483 = vrot.lane.b32.xlu1 %v2082_v5, %s4369_s1  ;;  %v2098_v54 = vpop.f32.mrb[15].mxu0 }
 0x58f   :  { %2397 = vrot.lane.b32.xlu0 %v5867_v10, %s4372_s20 }
 0x591   :  { %2399 = vrot.lane.b32.xlu1 %v5876_v61, %s4372_s20 }
 0x592   :  { %v3866_v17 = vpop.f32.mrb[16].mxu0 }
 0x593   :  { %2493 = vrot.lane.b32.xlu0 %v3838_v28, %s4369_s1  ;;  %v2257_v37 = vpop.f32.mrb[17].mxu0 }
 0x594   :  { %v3867_v22 = vpop.f32.mrb[18].mxu0 }
 0x595   :  { %2495 = vrot.lane.b32.xlu1 %v3839_v33, %s4369_s1  ;;  %v2260_v16 = vpop.f32.mrb[19].mxu0 }
 0x597   :  { %2393 = vrot.lane.b32.xlu0 %v5872_v35, %s4372_s20  ;;  %v3952_v35 = vld [vmem:[%s6377_s3] sm:$0xff]  }
 0x598   :  { %3888 = vmatprep.subr.bf16.mxu0 %v3952_v35 }
 0x599   :  { %2395 = vrot.lane.b32.xlu1 %v5879_v26, %s4372_s20  ;;  %3889 = vmatpush3.bf16.msra.mxu0 %v3952_v35  ;;  %v3953_v26 = vld [vmem:[%s6377_s3 + $0x8] sm:$0xff]  }
 0x59a   :  { %v3870_v15 = vpop.f32.mrb[20].mxu0  ;;  %3890 = vmatprep.subr.bf16.mxu0 %v3953_v26 }
 0x59b   :  { %2489 = vrot.lane.b32.xlu0 %v2095_v0, %s4369_s1  ;;  %v2273_v10 = vpop.f32.mrb[21].mxu0 }
 0x59c   :  { %v3871_v6 = vpop.f32.mrb[22].mxu0 }
 0x59d   :  { %2491 = vrot.lane.b32.xlu1 %v2098_v54, %s4369_s1  ;;  %v2276_v61 = vpop.f32.mrb[23].mxu0  ;;  %3891 = vmatpush3.bf16.msra.mxu0 %v3953_v26 }
 0x59f   :  { %2453 = vrot.lane.b32.xlu0 %v5894_v24, %s4370_s18  ;;  %v3954_v24 = vld [vmem:[%s6377_s3 + $0x10] sm:$0xff]  }
 0x5a0   :  { %3892 = vmatprep.subr.bf16.mxu0 %v3954_v24 }
 0x5a1   :  { %2455 = vrot.lane.b32.xlu1 %v5898_v8, %s4370_s18  ;;  %3893 = vmatpush3.bf16.msra.mxu0 %v3954_v24  ;;  %v3956_v8 = vld [vmem:[%s6377_s3 + $0x20] sm:$0xff]  }
 0x5a3   :  { %2549 = vrot.lane.b32.xlu0 %v3866_v17, %s4365_s24 }
 0x5a5   :  { %2551 = vrot.lane.b32.xlu1 %v3867_v22, %s4365_s24 }
 0x5a7   :  { %2449 = vrot.lane.b32.xlu0 %v5896_v52, %s4370_s18  ;;  %v3955_v52 = vld [vmem:[%s6377_s3 + $0x18] sm:$0xff]  }
 0x5a8   :  { %3894 = vmatprep.subr.bf16.mxu0 %v3955_v52 }
 0x5a9   :  { %2451 = vrot.lane.b32.xlu1 %v5900_v4, %s4370_s18  ;;  %3895 = vmatpush3.bf16.msra.mxu0 %v3955_v52  ;;  %v3957_v4 = vld [vmem:[%s6377_s3 + $0x28] sm:$0xff]  }
 0x5aa   :  { %3896 = vmatprep.subr.bf16.mxu0 %v3956_v8 }
 0x5ab   :  { %2545 = vrot.lane.b32.xlu0 %v2257_v37, %s4365_s24 }
 0x5ad   :  { %2547 = vrot.lane.b32.xlu1 %v2260_v16, %s4365_s24  ;;  %3897 = vmatpush3.bf16.msra.mxu0 %v3956_v8 }
 0x5ae   :  { %3898 = vmatprep.subr.bf16.mxu0 %v3957_v4 }
 0x5af   :  { %2461 = vrot.lane.b32.xlu0 %v5902_v14, %s4370_s18  ;;  %v3958_v14 = vld [vmem:[%s6377_s3 + $0x30] sm:$0xff]  }
 0x5b1   :  { %2463 = vrot.lane.b32.xlu1 %v5906_v55, %s4370_s18  ;;  %3899 = vmatpush3.bf16.msra.mxu0 %v3957_v4  ;;  %v6571_v55 = vmov 0  }
 0x5b2   :  { %3900 = vmatprep.subr.bf16.mxu0 %v3958_v14 }
 0x5b3   :  { %2457 = vrot.lane.b32.xlu0 %v5904_v50, %s4370_s18  ;;  %v3959_v50 = vld [vmem:[%s6377_s3 + $0x38] sm:$0xff]   ;;  %s4374_s3 = smov 111  }
 0x5b5   :  { %2459 = vrot.lane.b32.xlu1 %v5908_v12, %s4370_s18  ;;  %3901 = vmatpush3.bf16.msra.mxu0 %v3958_v14  ;;  %v2422_v12 = vpop.permute.xlu0 %2421 }
 0x5b6   :  { %3902 = vmatprep.subr.bf16.mxu0 %v3959_v50 }
 0x5b7   :  { %2553 = vrot.lane.b32.xlu0 %v2273_v10, %s4365_s24 }
 0x5b9   :  { %2555 = vrot.lane.b32.xlu1 %v2276_v61, %s4365_s24  ;;  %3903 = vmatpush3.bf16.msra.mxu0 %v3959_v50  ;;  %v2418_v53 = vpop.permute.xlu0 %2417 }
 0x5ba   :  { %3497 = vmatprep.subr.bf16.mxu0 %v6571_v55 }
 0x5bb   :  { %2517 = vrot.lane.b32.xlu0 %v5922_v45, %s4367_s0 }
 0x5bd   :  { %2519 = vrot.lane.b32.xlu1 %v5926_v11, %s4367_s0  ;;  %v2430_v46 = vpop.permute.xlu0 %2429 }
 0x5bf   :  { %2513 = vrot.lane.b32.xlu0 %v5924_v25, %s4367_s0 }
 0x5c1   :  { %2515 = vrot.lane.b32.xlu1 %v5928_v20, %s4367_s0  ;;  %v6066_v42 = vpop.permute.xlu0 %2425 }
 0x5c3   :  { %2525 = vrot.lane.b32.xlu0 %v5934_v48, %s4367_s0 }
 0x5c5   :  { %2527 = vrot.lane.b32.xlu1 %v5938_v21, %s4367_s0  ;;  %v2390_v40 = vpop.permute.xlu0 %2389 }
 0x5c7   :  { %2521 = vrot.lane.b32.xlu0 %v5936_v18, %s4367_s0 }
 0x5c9   :  { %2523 = vrot.lane.b32.xlu1 %v5940_v41, %s4367_s0 }
 0x5cb   :  { %2581 = vrot.lane.b32.xlu0 %v5949_v38, %s4366_s25 }
 0x5cd   :  { %2583 = vrot.lane.b32.xlu1 %v5954_v58, %s4366_s25 }
 0x5cf   :  { %2577 = vrot.lane.b32.xlu0 %v5951_v13, %s4366_s25 }
 0x5d1   :  { %2579 = vrot.lane.b32.xlu1 %v5956_v32, %s4366_s25 }
 0x5d3   :  { %2557 = vrot.lane.b32.xlu0 %v3870_v15, %s4365_s24 }
 0x5d5   :  { %2559 = vrot.lane.b32.xlu1 %v3871_v6, %s4365_s24 }
 0x5d7   :  { %2585 = vrot.lane.b32.xlu0 %v5965_v39, %s4366_s25 }
 0x5d9   :  { %2587 = vrot.lane.b32.xlu1 %v5970_v3, %s4366_s25 }
 0x5db   :  { %2589 = vrot.lane.b32.xlu0 %v5963_v30, %s4366_s25 }
 0x5dd   :  { %2591 = vrot.lane.b32.xlu1 %v5968_v44, %s4366_s25 }
 0x5f5   :  { %v2486_v34 = vpop.permute.xlu0 %2485 }
 0x5f7   :  { %v2488_v59 = vpop.permute.xlu1 %2487 }
 0x5f9   :  { %v2386_v27 = vpop.permute.xlu0 %2385 }
 0x5fa   :  { %v2602_v1 = vsel %vm2601_vm5, %v5810_v62, %v2386_v27  ;;  %v2604_v62 = vsel %vm2601_vm5, %v5807_v19, %v2390_v40 }
 0x5fb   :  { %v2388_v47 = vpop.permute.xlu1 %2387  ;;  %v2612_v13 = vsel %vm108_vm0, %v2604_v62, %v2422_v12  ;;  %v2610_v19 = vsel %vm108_vm0, %v2602_v1, %v2418_v53 }
 0x5fc   :  { %v2603_v45 = vsel %vm2601_vm5, %v5817_v43, %v2388_v47 }
 0x5fd   :  { %v2482_v25 = vpop.permute.xlu0 %2481  ;;  %v2611_v0 = vsel %vm108_vm0, %v2603_v45, %v5930_v57 }
 0x5ff   :  { %v2484_v11 = vpop.permute.xlu1 %2483 }
 0x601   :  { %v2398_v20 = vpop.permute.xlu0 %2397 }
 0x602   :  { %v2608_v48 = vsel %vm2601_vm5, %v5828_v51, %v2398_v20 }
 0x603   :  { %v2400_v18 = vpop.permute.xlu1 %2399  ;;  %v2616_v37 = vsel %vm108_vm0, %v2608_v48, %v2430_v46 }
 0x604   :  { %v2609_v21 = vsel %vm2601_vm5, %v5835_v63, %v2400_v18 }
 0x605   :  { %v2494_v41 = vpop.permute.xlu0 %2493  ;;  %v2617_v15 = vsel %vm108_vm0, %v2609_v21, %v5932_v7 }
 0x607   :  { %v2496_v23 = vpop.permute.xlu1 %2495 }
 0x609   :  { %v2394_v56 = vpop.permute.xlu0 %2393 }
 0x60a   :  { %v2606_v1 = vsel %vm2601_vm5, %v5831_v49, %v2394_v56 }
 0x60b   :  { %v2396_v38 = vpop.permute.xlu1 %2395  ;;  %v2614_v49 = vsel %vm108_vm0, %v2606_v1, %v6066_v42 }
 0x60d   :  { %v6076_v31 = vpop.permute.xlu0 %2489 }
 0x60f   :  { %v6080_v43 = vpop.permute.xlu1 %2491 }
 0x611   :  { %v2454_v9 = vpop.permute.xlu0 %2453 }
 0x612   :  { %v2621_v51 = vsel %vm2618_vm8, %v2612_v13, %v2454_v9 }
 0x613   :  { %v2456_v58 = vpop.permute.xlu1 %2455  ;;  %v2629_v63 = vsel %vm932_vm3, %v2621_v51, %v2486_v34 }
 0x614   :  { %v2622_v60 = vsel %vm2618_vm8, %v5947_v29, %v2456_v58 }
 0x615   :  { %v2550_v32 = vpop.permute.xlu0 %2549  ;;  %v2630_v5 = vsel %vm932_vm3, %v2622_v60, %v2488_v59 }
 0x617   :  { %v2552_v30 = vpop.permute.xlu1 %2551 }
 0x619   :  { %v2450_v28 = vpop.permute.xlu0 %2449 }
 0x61a   :  { %v2619_v39 = vsel %vm2618_vm8, %v2610_v19, %v2450_v28 }
 0x61b   :  { %v2452_v44 = vpop.permute.xlu1 %2451  ;;  %v2627_v33 = vsel %vm932_vm3, %v2619_v39, %v2482_v25  ;;  %v2607_v25 = vsel %vm2601_vm5, %v5837_v2, %v2396_v38 }
 0x61c   :  { %v2620_v3 = vsel %vm2618_vm8, %v2611_v0, %v2452_v44  ;;  %v2615_v2 = vsel %vm108_vm0, %v2607_v25, %v5942_v36 }
 0x61d   :  { %v2546_v54 = vpop.permute.xlu0 %2545  ;;  %v2628_v29 = vsel %vm932_vm3, %v2620_v3, %v2484_v11 }
 0x61f   :  { %v2548_v17 = vpop.permute.xlu1 %2547 }
 0x621   :  { %v2462_v22 = vpop.permute.xlu0 %2461 }
 0x622   :  { %v2625_v16 = vsel %vm2618_vm8, %v2616_v37, %v2462_v22 }
 0x623   :  { %v2464_v10 = vpop.permute.xlu1 %2463  ;;  %v6100_v57 = vsel %vm932_vm3, %v2625_v16, %v2494_v41 }
 0x624   :  { %v2626_v6 = vsel %vm2618_vm8, %v2617_v15, %v2464_v10 }
 0x625   :  { %v2458_v61 = vpop.permute.xlu0 %2457  ;;  %v6104_v35 = vsel %vm932_vm3, %v2626_v6, %v2496_v23 }
 0x626   :  { %v2623_v13 = vsel %vm2618_vm8, %v2614_v49, %v2458_v61 }
 0x627   :  { %v2460_v26 = vpop.permute.xlu1 %2459 }
 0x628   :  { %v2624_v42 = vsel %vm2618_vm8, %v2615_v2, %v2460_v26 }
 0x629   :  { %v2554_v24 = vpop.permute.xlu0 %2553  ;;  %v2632_v28 = vsel %vm932_vm3, %v2624_v42, %v6080_v43 }
 0x62b   :  { %v2556_v52 = vpop.permute.xlu1 %2555 }
 0x62d   :  { %v2518_v8 = vpop.permute.xlu0 %2517 }
 0x62e   :  { %v2638_v46 = vsel %vm2635_vm10, %v2629_v63, %v2518_v8 }
 0x62f   :  { %v2520_v4 = vpop.permute.xlu1 %2519  ;;  %v2647_v59 = vsel %vm2644_vm12, %v2638_v46, %v2550_v32  ;;  %v2631_v32 = vsel %vm932_vm3, %v2623_v13, %v6076_v31 }
 0x630   :  { %v2639_v34 = vsel %vm2635_vm10, %v2630_v5, %v2520_v4 }
 0x631   :  { %v2514_v14 = vpop.permute.xlu0 %2513  ;;  %v2648_v20 = vsel %vm2644_vm12, %v2639_v34, %v2552_v30 }
 0x632   :  { %v2636_v47 = vsel %vm2635_vm10, %v2627_v33, %v2514_v14 }
 0x633   :  { %v2516_v50 = vpop.permute.xlu1 %2515  ;;  %v2645_v56 = vsel %vm2644_vm12, %v2636_v47, %v2546_v54 }
 0x634   :  { %v2637_v18 = vsel %vm2635_vm10, %v2628_v29, %v2516_v50 }
 0x635   :  { %v2526_v12 = vpop.permute.xlu0 %2525  ;;  %v2646_v58 = vsel %vm2644_vm12, %v2637_v18, %v2548_v17 }
 0x636   :  { %v2642_v37 = vsel %vm2635_vm10, %v6100_v57, %v2526_v12 }
 0x637   :  { %v2528_v7 = vpop.permute.xlu1 %2527 }
 0x638   :  { %v2643_v61 = vsel %vm2635_vm10, %v6104_v35, %v2528_v7 }
 0x639   :  { %v2522_v53 = vpop.permute.xlu0 %2521 }
 0x63a   :  { %v2640_v36 = vsel %vm2635_vm10, %v2631_v32, %v2522_v53 }
 0x63b   :  { %v2524_v40 = vpop.permute.xlu1 %2523  ;;  %v2649_v33 = vsel %vm2644_vm12, %v2640_v36, %v2554_v24 }
 0x63c   :  { %v2641_v44 = vsel %vm2635_vm10, %v2632_v28, %v2524_v40 }
 0x63d   :  { %v2582_v27 = vpop.permute.xlu0 %2581  ;;  %v2650_v29 = vsel %vm2644_vm12, %v2641_v44, %v2556_v52 }
 0x63e   :  { %v6113_v45 = vsel %vm2653_vm14, %v2647_v59, %v2582_v27 }
 0x63f   :  { %v2672_v11 = vmin.f32 %v6113_v45, 0.0  ;;  %v2584_v48 = vpop.permute.xlu1 %2583  ;;  %vm2664_vm0 = vcmp.gt.f32.partialorder %v6113_v45, 0.0 }
 0x640   :  { %v2657_v21 = vsel %vm2653_vm14, %v2648_v20, %v2584_v48 }
 0x641   :  { %v2682_v41 = vmul.f32 1.442695, %v2672_v11  ;;  %v2673_v23 = vmin.f32 %v2657_v21, 0.0  ;;  %v2578_v62 = vpop.permute.xlu0 %2577  ;;  %vm2665_vm2 = vcmp.gt.f32.partialorder %v2657_v21, 0.0 }
 0x642   :  { %v2654_v38 = vsel %vm2653_vm14, %v2645_v56, %v2578_v62 }
 0x643   :  { %4232 = vpow2.f32 %v2682_v41  ;;  %v2684_v9 = vmul.f32 1.442695, %v2673_v23  ;;  %v2670_v51 = vmin.f32 %v2654_v38, 0.0  ;;  %v2580_v63 = vpop.permute.xlu1 %2579  ;;  %vm2662_vm8 = vcmp.gt.f32.partialorder %v2654_v38, 0.0 }
 0x644   :  { %v2655_v60 = vsel %vm2653_vm14, %v2646_v58, %v2580_v63  ;;  %v4373_v58 = vmov 16  }
 0x645   :  { %4234 = vpow2.f32 %v2684_v9  ;;  %v2678_v5 = vmul.f32 1.442695, %v2670_v51  ;;  %v2671_v30 = vmin.f32 %v2655_v60, 0.0  ;;  %v2558_v19 = vpop.permute.xlu0 %2557  ;;  %vm2663_vm10 = vcmp.gt.f32.partialorder %v2655_v60, 0.0  ;;  %3945 = vset.pattern.permute.xlu1 %v4373_v58  ;;  %3944 = vset.pattern.permute.xlu0 %v4373_v58 }
 0x646   :  { %v2651_v16 = vsel %vm2644_vm12, %v2642_v37, %v2558_v19 }
 0x647   :  { %4236 = vpow2.f32 %v2678_v5  ;;  %v2680_v39 = vmul.f32 1.442695, %v2671_v30  ;;  %v2560_v0 = vpop.permute.xlu1 %2559 }
 0x648   :  { %v2652_v52 = vsel %vm2644_vm12, %v2643_v61, %v2560_v0 }
 0x649   :  { %4238 = vpow2.f32 %v2680_v39  ;;  %v2586_v3 = vpop.permute.xlu0 %2585 }
 0x64a   :  { %v2658_v31 = vsel %vm2653_vm14, %v2649_v33, %v2586_v3 }
 0x64b   :  { %v2674_v54 = vmin.f32 %v2658_v31, 0.0  ;;  %v2588_v17 = vpop.permute.xlu1 %2587  ;;  %vm2666_vm12 = vcmp.gt.f32.partialorder %v2658_v31, 0.0 }
 0x64c   :  { %v2659_v43 = vsel %vm2653_vm14, %v2650_v29, %v2588_v17 }
 0x64d   :  { %v4233_v22 = vpop.eup %4232  ;;  %v2686_v15 = vmul.f32 1.442695, %v2674_v54  ;;  %v2675_v10 = vmin.f32 %v2659_v43, 0.0  ;;  %v2590_v6 = vpop.permute.xlu0 %2589 }
 0x64e   :  { %v3618_v26 = vadd.f32 -1.0, %v4233_v22  ;;  %v2660_v24 = vsel %vm2653_vm14, %v2651_v16, %v2590_v6 }
 0x64f   :  { %v4235_v8 = vpop.eup %4234  ;;  %4240 = vpow2.f32 %v2686_v15  ;;  %v2688_v4 = vmul.f32 1.442695, %v2675_v10  ;;  %v2676_v57 = vmin.f32 %v2660_v24, 0.0  ;;  %v2592_v14 = vpop.permute.xlu1 %2591 }
 0x650   :  { %v3619_v50 = vadd.f32 -1.0, %v4235_v8  ;;  %v2661_v12 = vsel %vm2653_vm14, %v2652_v52, %v2592_v14  ;;  %v2704_v7 = vsel %vm2664_vm0, %v6113_v45, %v3618_v26  ;;  %vm2667_vm14 = vcmp.gt.f32.partialorder %v2659_v43, 0.0  ;;  %v6572_v26 = vld [vmem:[#allocation19_spill] sm:$0xff] }
 0x651   :  { %v4237_v53 = vpop.eup %4236  ;;  %4242 = vpow2.f32 %v2688_v4  ;;  %v2690_v46 = vmul.f32 1.442695, %v2676_v57  ;;  %v2677_v35 = vmin.f32 %v2661_v12, 0.0  ;;  %vm2668_vm0 = vcmp.gt.f32.partialorder %v2660_v24, 0.0 }
 0x652   :  { %v2705_v40 = vsel %vm2665_vm2, %v2657_v21, %v3619_v50  ;;  %v3616_v34 = vadd.f32 -1.0, %v4237_v53  ;;  %vm2669_vm2 = vcmp.gt.f32.partialorder %v2661_v12, 0.0 }
 0x653   :  { %v4239_v59 = vpop.eup %4238  ;;  %v2711_v27 = vpack.c.bf16 %v2705_v40, %v2704_v7  ;;  %4244 = vpow2.f32 %v2690_v46  ;;  %v2692_v1 = vmul.f32 1.442695, %v2677_v35 }
 0x654   :  { %v3617_v47 = vadd.f32 -1.0, %v4239_v59  ;;  %v2702_v25 = vsel %vm2662_vm8, %v2654_v38, %v3616_v34 }
 0x655   :  { %4246 = vpow2.f32 %v2692_v1 }
 0x656   :  { %v2703_v11 = vsel %vm2663_vm10, %v2655_v60, %v3617_v47 }
 0x657   :  { %v2710_v20 = vpack.c.bf16 %v2703_v11, %v2702_v25 }
 0x659   :  { %v4241_v48 = vpop.eup %4240  ;;  %3904 = vmatprep.mubr.bf16.mxu0 %v2710_v20 }
 0x65a   :  { %v3620_v18 = vadd.f32 -1.0, %v4241_v48  ;;  %3905 = vmatmul.mubr.bf16.vlgmr.msra.gmra.mrb[24].mxu0 %v2711_v27 }
 0x65b   :  { %v4243_v49 = vpop.eup %4242 }
 0x65c   :  { %v3621_v41 = vadd.f32 -1.0, %v4243_v49  ;;  %v2706_v21 = vsel %vm2666_vm12, %v2658_v31, %v3620_v18 }
 0x65d   :  { %v4245_v45 = vpop.eup %4244 }
 0x65e   :  { %v2707_v23 = vsel %vm2667_vm14, %v2659_v43, %v3621_v41  ;;  %v3622_v56 = vadd.f32 -1.0, %v4245_v45 }
 0x65f   :  { %v4247_v62 = vpop.eup %4246  ;;  %v2712_v13 = vpack.c.bf16 %v2707_v23, %v2706_v21 }
 0x660   :  { %v3623_v2 = vadd.f32 -1.0, %v4247_v62  ;;  %v2708_v38 = vsel %vm2668_vm0, %v2660_v24, %v3622_v56 }
 0x661   :  { %3908 = vmatprep.mubr.bf16.mxu0 %v2712_v13 }
 0x662   :  { %v2709_v9 = vsel %vm2669_vm2, %v2661_v12, %v3623_v2 }
 0x663   :  { %v2713_v51 = vpack.c.bf16 %v2709_v9, %v2708_v38 }
 0x665   :  { %3909 = vmatmul.mubr.bf16.gmra.mrb[28].mxu0 %v2713_v51 }
 0x72d   :  { %v3906_v63 = vpop.f32.mrb[24].mxu0 }
 0x72e   :  { %v2812_v42 = vpop.f32.mrb[25].mxu0 }
 0x72f   :  { %2851 = vrot.lane.b32.xlu0 %v2812_v42, %s4374_s3  ;;  %v3907_v60 = vpop.f32.mrb[26].mxu0 }
 0x730   :  { %v3076_v32 = vpack.c.bf16 %v3907_v60, %v3906_v63  ;;  %2857 = vrot.lane.b32.xlu1 %v3907_v60, %s4374_s3  ;;  %v2815_v5 = vpop.f32.mrb[27].mxu0 }
 0x731   :  { %v3075_v30 = vpack.c.bf16 %v2815_v5, %v2812_v42 }
 0x733   :  { %2855 = vrot.lane.b32.xlu0 %v3906_v63, %s4374_s3  ;;  %3912 = vmatprep.subr.bf16.mxu1 %v3075_v30 }
 0x734   :  { %2853 = vrot.lane.b32.xlu1 %v2815_v5, %s4374_s3  ;;  %3913 = vmatpush3.bf16.msra.mxu1 %v3075_v30 }
 0x735   :  { %3914 = vmatprep.subr.bf16.mxu1 %v3076_v32 }
 0x738   :  { %2912 = vperm.xlu1 %3945, %v2815_v5   ;;  %v3910_v19 = vpop.f32.mrb[28].mxu0  ;;  %3915 = vmatpush3.bf16.msra.mxu1 %v3076_v32 }
 0x739   :  { %v2828_v36 = vpop.f32.mrb[29].mxu0 }
 0x73a   :  { %2859 = vrot.lane.b32.xlu0 %v2828_v36, %s4374_s3  ;;  %v3911_v28 = vpop.f32.mrb[30].mxu0 }
 0x73b   :  { %v3078_v39 = vpack.c.bf16 %v3911_v28, %v3910_v19  ;;  %v2831_v0 = vpop.f32.mrb[31].mxu0 }
 0x73c   :  { %v3077_v44 = vpack.c.bf16 %v2831_v0, %v2828_v36  ;;  %2916 = vperm.xlu1 %3945, %v3906_v63  }
 0x73e   :  { %2863 = vrot.lane.b32.xlu0 %v3910_v19, %s4374_s3  ;;  %3916 = vmatprep.subr.bf16.mxu1 %v3077_v44 }
 0x73f   :  { %3917 = vmatpush3.bf16.msra.mxu1 %v3077_v44 }
 0x740   :  { %2932 = vperm.xlu1 %3945, %v3910_v19   ;;  %3918 = vmatprep.subr.bf16.mxu1 %v3078_v39 }
 0x742   :  { %2908 = vperm.xlu0 %3944, %v2812_v42  }
 0x743   :  { %3919 = vmatpush3.bf16.msra.mxu1 %v3078_v39 }
 0x744   :  { %2924 = vperm.xlu1 %3945, %v2828_v36  }
 0x746   :  { %2920 = vperm.xlu0 %3944, %v3907_v60  }
 0x748   :  { %2865 = vrot.lane.b32.xlu1 %v3911_v28, %s4374_s3 }
 0x74a   :  { %2928 = vperm.xlu0 %3944, %v2831_v0  }
 0x74c   :  { %2861 = vrot.lane.b32.xlu1 %v2831_v0, %s4374_s3 }
 0x74e   :  { %2936 = vperm.xlu0 %3944, %v3911_v28  }
 0x7a1   :  { %v2852_v33 = vpop.permute.xlu0 %2851 }
 0x7a2   :  { %v2858_v3 = vpop.permute.xlu1 %2857  ;;  %2875 = vxpose.xlu1.b32.start [1/8] (short) (narrow) %v2852_v33, 8 }
 0x7a5   :  { %v2856_v54 = vpop.permute.xlu0 %2855 }
 0x7a6   :  { %v2854_v31 = vpop.permute.xlu1 %2853 }
 0x7a7   :  { %2876 = vxpose.xlu1.b32.cont [2/8] (short) (narrow) %v2854_v31, 8 }
 0x7ab   :  { %2877 = vxpose.xlu1.b32.cont [3/8] (short) (narrow) %v2856_v54, 8 }
 0x7ac   :  { %v2860_v29 = vpop.permute.xlu0 %2859 }
 0x7af   :  { %2878 = vxpose.xlu1.b32.cont [4/8] (short) (narrow) %v2858_v3, 8 }
 0x7b0   :  { %v2864_v10 = vpop.permute.xlu0 %2863 }
 0x7b3   :  { %2879 = vxpose.xlu1.b32.cont [5/8] (short) (narrow) %v2860_v29, 8 }
 0x7b7   :  { %v2913_v17 = vpop.permute.xlu1 %2912 }
 0x7bb   :  { %v2917_v37 = vpop.permute.xlu1 %2916 }
 0x7bf   :  { %v2933_v43 = vpop.permute.xlu1 %2932 }
 0x7c1   :  { %v2909_v6 = vpop.permute.xlu0 %2908 }
 0x7c3   :  { %v2925_v22 = vpop.permute.xlu1 %2924 }
 0x7c5   :  { %v2921_v50 = vpop.permute.xlu0 %2920 }
 0x7c7   :  { %v2866_v16 = vpop.permute.xlu1 %2865 }
 0x7c9   :  { %v2929_v20 = vpop.permute.xlu0 %2928 }
 0x7cb   :  { %v2862_v15 = vpop.permute.xlu1 %2861 }
 0x7cc   :  { %2880 = vxpose.xlu1.b32.cont [6/8] (short) (narrow) %v2862_v15, 8 }
 0x7cd   :  { %v2937_v9 = vpop.permute.xlu0 %2936 }
 0x7d0   :  { %2881 = vxpose.xlu1.b32.cont [7/8] (short) (narrow) %v2864_v10, 8 }
 0x7d4   :  { %2882 = vxpose.xlu1.b32.end [8/8] (short) (narrow) %v2866_v16, 8 }
 0x838   :  { %v2891_v61 = vpop.trf.xlu1 }
 0x839   :  { %v2942_v24 = vrot.slane %v2891_v61, %v6572_v26 }
 0x83b   :  { %v2943_v8 = vadd.f32 %v2942_v24, %v2909_v6  ;;  %v2944_v52 = vadd.f32 %v2942_v24, %v2913_v17  ;;  %v2945_v4 = vadd.f32 %v2942_v24, %v2917_v37  ;;  %v2946_v35 = vadd.f32 %v2942_v24, %v2921_v50 }
 0x83c   :  { %v2947_v25 = vadd.f32 %v2942_v24, %v2925_v22  ;;  %v2948_v45 = vadd.f32 %v2942_v24, %v2929_v20  ;;  %v2949_v2 = vadd.f32 %v2942_v24, %v2933_v43  ;;  %v2950_v60 = vadd.f32 %v2942_v24, %v2937_v9 }
 0x83d   :  { %vm2951_vm8 = vcmp.gt.f32.partialorder %v2943_v8, 0.0  ;;  %v2959_v57 = vmul.f32 0.2, %v2943_v8  ;;  %vm2952_vm10 = vcmp.gt.f32.partialorder %v2944_v52, 0.0  ;;  %v2960_v14 = vmul.f32 0.2, %v2944_v52 }
 0x83e   :  { %v2961_v46 = vmul.f32 0.2, %v2945_v4  ;;  %vm2953_vm12 = vcmp.gt.f32.partialorder %v2945_v4, 0.0  ;;  %v2962_v47 = vmul.f32 0.2, %v2946_v35  ;;  %vm2954_vm14 = vcmp.gt.f32.partialorder %v2946_v35, 0.0 }
 0x83f   :  { %v2967_v12 = vsel %vm2951_vm8, %v2943_v8, %v2959_v57  ;;  %v2968_v53 = vsel %vm2952_vm10, %v2944_v52, %v2960_v14  ;;  %v2963_v41 = vmul.f32 0.2, %v2947_v25  ;;  %v2964_v13 = vmul.f32 0.2, %v2948_v45 }
 0x840   :  { %v2975_v40 = vsel %vm76_vm1, %v2967_v12, -9e+15  ;;  %v2976_v27 = vsel %vm77_vm15, %v2968_v53, -9e+15  ;;  %v2969_v1 = vsel %vm2953_vm12, %v2945_v4, %v2961_v46  ;;  %v2970_v49 = vsel %vm2954_vm14, %v2946_v35, %v2962_v47 }
 0x841   :  { %v2983_v34 = vsel %vm932_vm3, %v2975_v40, -inf  ;;  %v2986_v11 = vsel %vm932_vm3, %v2976_v27, -inf  ;;  %v2977_v18 = vsel %vm78_vm4, %v2969_v1, -9e+15  ;;  %vm2955_vm1 = vcmp.gt.f32.partialorder %v2947_v25, 0.0 }
 0x842   :  { %2984 = vmax.xlane.f32.xlu0 %v2983_v34  ;;  %v2989_v21 = vsel %vm932_vm3, %v2977_v18, -inf  ;;  %v2978_v56 = vsel %vm79_vm6, %v2970_v49, -9e+15  ;;  %v2971_v62 = vsel %vm2955_vm1, %v2947_v25, %v2963_v41  ;;  %vm2956_vm15 = vcmp.gt.f32.partialorder %v2948_v45, 0.0 }
 0x843   :  { %v2992_v38 = vsel %vm932_vm3, %v2978_v56, -inf  ;;  %v2979_v58 = vsel %vm80_vm9, %v2971_v62, -9e+15  ;;  %v2972_v63 = vsel %vm2956_vm15, %v2948_v45, %v2964_v13  ;;  %v2965_v42 = vmul.f32 0.2, %v2949_v2 }
 0x844   :  { %vm2957_vm4 = vcmp.gt.f32.partialorder %v2949_v2, 0.0  ;;  %v2995_v32 = vsel %vm932_vm3, %v2979_v58, -inf  ;;  %v2980_v30 = vsel %vm81_vm7, %v2972_v63, -9e+15  ;;  %v2966_v36 = vmul.f32 0.2, %v2950_v60 }
 0x845   :  { %v2973_v19 = vsel %vm2957_vm4, %v2949_v2, %v2965_v42  ;;  %vm2958_vm6 = vcmp.gt.f32.partialorder %v2950_v60, 0.0  ;;  %v2998_v28 = vsel %vm932_vm3, %v2980_v30, -inf  ;;  %v3962_v13 = vld [vmem:[%s6378_s4 + $0x4] ss:$8 sps:$4 sm:$0xff]   ;;  %vm3480_vm9 = vcmask 588800  }
 0x846   :  { %2987 = vmax.xlane.f32.xlu0 %v2986_v11  ;;  %v2981_v0 = vsel %vm82_vm11, %v2973_v19, -9e+15  ;;  %v2974_v44 = vsel %vm2958_vm6, %v2950_v60, %v2966_v36  ;;  %3196 = vmatprep.subr.bf16.mxu1 %v3962_v13 }
 0x847   :  { %v3001_v33 = vsel %vm932_vm3, %v2981_v0, -inf  ;;  %v2982_v31 = vsel %vm83_vm13, %v2974_v44, -9e+15  ;;  %v3960_v44 = vld [vmem:[%s6378_s4] ss:$8 sps:$4 sm:$0xff]  }
 0x848   :  { %v3004_v54 = vsel %vm932_vm3, %v2982_v31, -inf }
 0x84a   :  { %2990 = vmax.xlane.f32.xlu0 %v2989_v21 }
 0x84e   :  { %2993 = vmax.xlane.f32.xlu0 %v2992_v38 }
 0x852   :  { %2996 = vmax.xlane.f32.xlu0 %v2995_v32 }
 0x856   :  { %2999 = vmax.xlane.f32.xlu0 %v2998_v28 }
 0x85a   :  { %3002 = vmax.xlane.f32.xlu0 %v3001_v33 }
 0x85e   :  { %3005 = vmax.xlane.f32.xlu0 %v3004_v54 }
 0x8cf   :  { %v2985_v29 = vpop.xlane.xlu0 %2984 }
 0x8d0   :  { %v3007_v17 = vsub.f32 %v2975_v40, %v2985_v29 }
 0x8d2   :  { %v3015_v37 = vmul.f32 1.442695, %v3007_v17 }
 0x8d3   :  { %v2988_v43 = vpop.xlane.xlu0 %2987 }
 0x8d4   :  { %4248 = vpow2.f32 %v3015_v37  ;;  %v3008_v22 = vsub.f32 %v2976_v27, %v2988_v43 }
 0x8d6   :  { %v3017_v16 = vmul.f32 1.442695, %v3008_v22 }
 0x8d7   :  { %v2991_v15 = vpop.xlane.xlu0 %2990 }
 0x8d8   :  { %4250 = vpow2.f32 %v3017_v16  ;;  %v3009_v10 = vsub.f32 %v2977_v18, %v2991_v15 }
 0x8da   :  { %v3019_v6 = vmul.f32 1.442695, %v3009_v10 }
 0x8db   :  { %v2994_v61 = vpop.xlane.xlu0 %2993 }
 0x8dc   :  { %4252 = vpow2.f32 %v3019_v6  ;;  %v3010_v24 = vsub.f32 %v2978_v56, %v2994_v61  ;;  %v3963_v6 = vld [vmem:[%s6380_s6] sm:$0xff]   ;;  %v3964_v61 = vld [vmem:[%s6380_s6 + $0x8] sm:$0xff]  }
 0x8dd   :  { %3498 = vmatpush1.bf16.msra.mxu0 %v3963_v6 }
 0x8de   :  { %v4249_v8 = vpop.eup %4248  ;;  %v3021_v52 = vmul.f32 1.442695, %v3010_v24  ;;  %3499 = vmatprep.subr.bf16.mxu0 %v6571_v55  ;;  %v3965_v24 = vld [vmem:[%s6380_s6 + $0x10] sm:$0xff]  }
 0x8df   :  { %v2997_v4 = vpop.xlane.xlu0 %2996  ;;  %v3031_v57 = vsel %vm932_vm3, %v4249_v8, 0.0 }
 0x8e0   :  { %4254 = vpow2.f32 %v3021_v52  ;;  %v3011_v14 = vsub.f32 %v2979_v58, %v2997_v4  ;;  %3032 = vadd.xlane.f32.xlu0 %v3031_v57  ;;  %v3967_v52 = vld [vmem:[%s6380_s6 + $0x20] sm:$0xff]   ;;  %v3968_v4 = vld [vmem:[%s6380_s6 + $0x28] sm:$0xff]  }
 0x8e1   :  { %3500 = vmatpush1.bf16.msra.mxu0 %v3964_v61 }
 0x8e2   :  { %v4251_v50 = vpop.eup %4250  ;;  %v3023_v12 = vmul.f32 1.442695, %v3011_v14  ;;  %3501 = vmatprep.subr.bf16.mxu0 %v6571_v55 }
 0x8e3   :  { %v3000_v53 = vpop.xlane.xlu0 %2999  ;;  %v3034_v46 = vsel %vm932_vm3, %v4251_v50, 0.0 }
 0x8e4   :  { %4256 = vpow2.f32 %v3023_v12  ;;  %v3012_v35 = vsub.f32 %v2980_v30, %v3000_v53  ;;  %3035 = vadd.xlane.f32.xlu0 %v3034_v46 }
 0x8e5   :  { %3502 = vmatpush1.bf16.msra.mxu0 %v3965_v24 }
 0x8e6   :  { %v4253_v7 = vpop.eup %4252  ;;  %v3025_v40 = vmul.f32 1.442695, %v3012_v35  ;;  %3503 = vmatprep.subr.bf16.mxu0 %v6571_v55 }
 0x8e7   :  { %v3003_v34 = vpop.xlane.xlu0 %3002  ;;  %v3037_v59 = vsel %vm932_vm3, %v4253_v7, 0.0 }
 0x8e8   :  { %4258 = vpow2.f32 %v3025_v40  ;;  %v3013_v27 = vsub.f32 %v2981_v0, %v3003_v34  ;;  %3038 = vadd.xlane.f32.xlu0 %v3037_v59 }
 0x8ea   :  { %v4255_v1 = vpop.eup %4254  ;;  %v3027_v47 = vmul.f32 1.442695, %v3013_v27 }
 0x8eb   :  { %v3006_v25 = vpop.xlane.xlu0 %3005  ;;  %v3040_v11 = vsel %vm932_vm3, %v4255_v1, 0.0 }
 0x8ec   :  { %4260 = vpow2.f32 %v3027_v47  ;;  %v3014_v20 = vsub.f32 %v2982_v31, %v3006_v25  ;;  %3041 = vadd.xlane.f32.xlu1 %v3040_v11  ;;  %v3970_v47 = vld [vmem:[%s6380_s6 + $0x38] sm:$0xff]   ;;  %v3971_v25 = vld [vmem:[%s6380_s6 + $0x40] sm:$0xff]   ;;  %v3972_v11 = vld [vmem:[%s6380_s6 + $0x48] sm:$0xff]  }
 0x8ee   :  { %v4257_v48 = vpop.eup %4256  ;;  %v3029_v18 = vmul.f32 1.442695, %v3014_v20  ;;  %v3973_v20 = vld [vmem:[%s6380_s6 + $0x50] sm:$0xff]  }
 0x8ef   :  { %v3043_v49 = vsel %vm932_vm3, %v4257_v48, 0.0 }
 0x8f0   :  { %4262 = vpow2.f32 %v3029_v18  ;;  %3044 = vadd.xlane.f32.xlu0 %v3043_v49  ;;  %v3975_v18 = vld [vmem:[%s6380_s6 + $0x60] ss:$0 sps:$4 sm:$0xff]  }
 0x8f2   :  { %v4259_v41 = vpop.eup %4258 }
 0x8f3   :  { %v3046_v45 = vsel %vm932_vm3, %v4259_v41, 0.0 }
 0x8f4   :  { %3047 = vadd.xlane.f32.xlu0 %v3046_v45 }
 0x8f6   :  { %v4261_v21 = vpop.eup %4260 }
 0x8f7   :  { %v3049_v23 = vsel %vm932_vm3, %v4261_v21, 0.0 }
 0x8f8   :  { %3050 = vadd.xlane.f32.xlu0 %v3049_v23 }
 0x8fa   :  { %v4263_v56 = vpop.eup %4262 }
 0x8fb   :  { %v3052_v62 = vsel %vm932_vm3, %v4263_v56, 0.0 }
 0x8fc   :  { %3053 = vadd.xlane.f32.xlu0 %v3052_v62 }
 0x96d   :  { %v3033_v2 = vpop.xlane.xlu0 %3032 }
 0x96e   :  { %4264 = vrcp.f32 %v3033_v2 }
 0x971   :  { %v3036_v38 = vpop.xlane.xlu0 %3035 }
 0x972   :  { %4266 = vrcp.f32 %v3036_v38 }
 0x975   :  { %v3039_v9 = vpop.xlane.xlu0 %3038 }
 0x976   :  { %4268 = vrcp.f32 %v3039_v9 }
 0x978   :  { %v4265_v58 = vpop.eup %4264 }
 0x979   :  { %v3042_v51 = vpop.xlane.xlu1 %3041  ;;  %v3063_v60 = vmul.f32 %v4265_v58, %v4249_v8  ;;  %v3966_v8 = vld [vmem:[%s6380_s6 + $0x18] sm:$0xff]  }
 0x97a   :  { %4270 = vrcp.f32 %v3042_v51  ;;  %3504 = vmatpush1.bf16.msra.mxu0 %v3966_v8 }
 0x97b   :  { %3505 = vmatprep.subr.bf16.mxu0 %v6571_v55 }
 0x97c   :  { %v4267_v63 = vpop.eup %4266 }
 0x97d   :  { %v3045_v42 = vpop.xlane.xlu0 %3044  ;;  %v3064_v32 = vmul.f32 %v4267_v63, %v4251_v50 }
 0x97e   :  { %4272 = vrcp.f32 %v3045_v42  ;;  %3506 = vmatpush1.bf16.msra.mxu0 %v3967_v52 }
 0x97f   :  { %v3071_v5 = vpack.c.bf16 %v3064_v32, %v3063_v60  ;;  %3507 = vmatprep.subr.bf16.mxu0 %v6571_v55 }
 0x980   :  { %v4269_v19 = vpop.eup %4268 }
 0x981   :  { %3920 = vmatprep.mubr.msk.bf16.mxu1 %vm932_vm3, %v3071_v5  ;;  %v3048_v30 = vpop.xlane.xlu0 %3047  ;;  %v3065_v28 = vmul.f32 %v4269_v19, %v4253_v7 }
 0x982   :  { %4274 = vrcp.f32 %v3048_v30  ;;  %3508 = vmatpush1.bf16.msra.mxu0 %v3968_v4 }
 0x983   :  { %3509 = vmatprep.subr.bf16.mxu0 %v6571_v55 }
 0x984   :  { %v4271_v36 = vpop.eup %4270 }
 0x985   :  { %v3066_v39 = vmul.f32 %v4271_v36, %v4255_v1  ;;  %v3051_v0 = vpop.xlane.xlu0 %3050  ;;  %v3969_v1 = vld [vmem:[%s6380_s6 + $0x30] sm:$0xff]  }
 0x986   :  { %4276 = vrcp.f32 %v3051_v0  ;;  %3510 = vmatpush1.bf16.msra.mxu0 %v3969_v1 }
 0x987   :  { %v3072_v33 = vpack.c.bf16 %v3066_v39, %v3065_v28  ;;  %3511 = vmatprep.subr.bf16.mxu0 %v6571_v55 }
 0x988   :  { %v4273_v31 = vpop.eup %4272 }
 0x989   :  { %3921 = vmatmul.mubr.msk.bf16.vlgmr.msra.gmra.mrb[56].mxu1 %vm932_vm3, %v3072_v33  ;;  %v3054_v3 = vpop.xlane.xlu0 %3053  ;;  %v3067_v29 = vmul.f32 %v4273_v31, %v4257_v48  ;;  %v3974_v48 = vld [vmem:[%s6380_s6 + $0x58] sm:$0xff]  }
 0x98a   :  { %4278 = vrcp.f32 %v3054_v3  ;;  %3197 = vmatpush1.bf16.msra.mxu1 %v3960_v44  ;;  %3512 = vmatpush1.bf16.msra.mxu0 %v3970_v47 }
 0x98b   :  { %3513 = vmatprep.subr.bf16.mxu0 %v6571_v55 }
 0x98c   :  { %v4275_v54 = vpop.eup %4274 }
 0x98d   :  { %v3068_v17 = vmul.f32 %v4275_v54, %v4259_v41  ;;  %v3162_v41 = vld [vmem:[%s6379_s5] sm:$0x3] }
 0x98e   :  { %3514 = vmatpush1.bf16.msra.mxu0 %v3971_v25  ;;  %v6265_v45 = vrot.slane %v3162_v41, %v6572_v26 }
 0x98f   :  { %v3073_v37 = vpack.c.bf16 %v3068_v17, %v3067_v29  ;;  %3515 = vmatprep.subr.bf16.mxu0 %v6571_v55 }
 0x990   :  { %v4277_v43 = vpop.eup %4276 }
 0x991   :  { %3924 = vmatprep.mubr.msk.bf16.mxu1 %vm932_vm3, %v3073_v37  ;;  %v3069_v16 = vmul.f32 %v4277_v43, %v4261_v21  ;;  %v6581_v21 = vld [vmem:[#allocation17_spill] sm:$0xff] }
 0x992   :  { %3516 = vmatpush1.bf16.msra.mxu0 %v3972_v11  ;;  %v6582_v23 = vsub.s32 1, %v6581_v21 }
 0x993   :  { %3517 = vmatprep.subr.bf16.mxu0 %v6571_v55 }
 0x994   :  { %v4279_v22 = vpop.eup %4278 }
 0x995   :  { %v3070_v15 = vmul.f32 %v4279_v22, %v4263_v56  ;;  %v6269_v56 = vrot.slane %v3162_v41, %v6582_v23 }
 0x996   :  { %3518 = vmatpush1.bf16.msra.mxu0 %v3973_v20 }
 0x997   :  { %v3074_v10 = vpack.c.bf16 %v3070_v15, %v3069_v16  ;;  %3519 = vmatprep.subr.bf16.mxu0 %v6571_v55 }
 0x999   :  { %3925 = vmatmul.mubr.msk.bf16.gmra.mrb[60].mxu1 %vm932_vm3, %v3074_v10  ;;  %vm3493_vm3 = vcmask 1043456  }
 0x99a   :  { %3228 = vmatprep.mubr.bf16.mxu1 %v6571_v55  ;;  %3520 = vmatpush1.bf16.msra.mxu0 %v3974_v48  ;;  %v3495_v49 = vsel %vm3493_vm3, %v3975_v18, 0 }
 0x99b   :  { %3521 = vmatprep.subr.bf16.mxu0 %v6571_v55 }
 0x99e   :  { %3522 = vmatpush1.bf16.msra.mxu0 %v3495_v49 }
 0xa5c   :  { %v3922_v57 = vpop.f32.mrb[56].mxu1 }
 0xa5d   :  { %v3125_v14 = vpop.f32.mrb[57].mxu1 }
 0xa5e   :  { %v3923_v50 = vpop.f32.mrb[58].mxu1 }
 0xa5f   :  { %v3157_v12 = vpack.c.bf16 %v3923_v50, %v3922_v57  ;;  %v3128_v53 = vpop.f32.mrb[59].mxu1 }
 0xa60   :  { %v3156_v46 = vpack.c.bf16 %v3128_v53, %v3125_v14 }
 0xa62   :  { %3638 = vmatmul.mubr.msk.bf16.vlgmr.msra.gmra.mrb[64].mxu1 %vm2601_vm5, %v3156_v46 }
 0xa63   :  { %3238 = vmatprep.mubr.bf16.mxu1 %v6571_v55 }
 0xa6a   :  { %3639 = vmatmul.mubr.msk.bf16.gmra.mrb[68].mxu1 %vm2601_vm5, %v3157_v12 }
 0xa6b   :  { %3248 = vmatprep.mubr.bf16.mxu1 %v6571_v55 }
 0xa6c   :  { %v3926_v35 = vpop.f32.mrb[60].mxu1 }
 0xa6d   :  { %v3141_v7 = vpop.f32.mrb[61].mxu1 }
 0xa6e   :  { %v3927_v40 = vpop.f32.mrb[62].mxu1 }
 0xa6f   :  { %v3159_v34 = vpack.c.bf16 %v3927_v40, %v3926_v35  ;;  %v3144_v59 = vpop.f32.mrb[63].mxu1 }
 0xa70   :  { %v3158_v27 = vpack.c.bf16 %v3144_v59, %v3141_v7 }
 0xa72   :  { %3640 = vmatmul.mubr.msk.bf16.gmra.mrb[72].mxu1 %vm2601_vm5, %v3158_v27 }
 0xa73   :  { %3258 = vmatprep.mubr.bf16.mxu1 %v6571_v55 }
 0xa7a   :  { %3641 = vmatmul.mubr.msk.bf16.gmra.mrb[76].mxu1 %vm2601_vm5, %v3159_v34 }
 0xb35   :  { %v3230_v62 = vpop.f32.mrb[64].mxu1 }
 0xb36   :  { %v3231_v55 = vadd.f32 %v3230_v62, %v6265_v45  ;;  %v3232_v13 = vpop.f32.mrb[65].mxu1 }
 0xb37   :  { %v6273_v2 = vadd.f32 %v3232_v13, %v6269_v56  ;;  %v3234_v38 = vpop.f32.mrb[66].mxu1 }
 0xb38   :  { %v3285_v9 = vmin.f32 %v3231_v55, 0.0  ;;  %v3235_v51 = vadd.f32 %v3234_v38, %v6265_v45  ;;  %v3236_v58 = vpop.f32.mrb[67].mxu1  ;;  %vm3269_vm11 = vcmp.gt.f32.partialorder %v3231_v55, 0.0 }
 0xb39   :  { %v3286_v63 = vmin.f32 %v6273_v2, 0.0  ;;  %v3237_v26 = vadd.f32 %v3236_v58, %v6269_v56  ;;  %vm3270_vm13 = vcmp.gt.f32.partialorder %v6273_v2, 0.0 }
 0xb3a   :  { %v3301_v42 = vmul.f32 1.442695, %v3285_v9  ;;  %v3287_v60 = vmin.f32 %v3235_v51, 0.0  ;;  %vm3271_vm7 = vcmp.gt.f32.partialorder %v3235_v51, 0.0 }
 0xb3b   :  { %v3303_v32 = vmul.f32 1.442695, %v3286_v63  ;;  %v3288_v5 = vmin.f32 %v3237_v26, 0.0  ;;  %vm3272_vm5 = vcmp.gt.f32.partialorder %v3237_v26, 0.0 }
 0xb3c   :  { %4280 = vpow2.f32 %v3301_v42  ;;  %v3305_v30 = vmul.f32 1.442695, %v3287_v60 }
 0xb3d   :  { %4282 = vpow2.f32 %v3303_v32  ;;  %v3307_v19 = vmul.f32 1.442695, %v3288_v5  ;;  %v3240_v36 = vpop.f32.mrb[68].mxu1 }
 0xb3e   :  { %4284 = vpow2.f32 %v3305_v30  ;;  %v6279_v28 = vadd.f32 %v3240_v36, %v6265_v45  ;;  %v3242_v39 = vpop.f32.mrb[69].mxu1 }
 0xb3f   :  { %4286 = vpow2.f32 %v3307_v19  ;;  %v6282_v0 = vadd.f32 %v3242_v39, %v6269_v56  ;;  %v3244_v44 = vpop.f32.mrb[70].mxu1 }
 0xb40   :  { %v3289_v33 = vmin.f32 %v6279_v28, 0.0  ;;  %v6286_v3 = vadd.f32 %v3244_v44, %v6265_v45  ;;  %v3246_v31 = vpop.f32.mrb[71].mxu1  ;;  %vm3273_vm0 = vcmp.gt.f32.partialorder %v6279_v28, 0.0 }
 0xb41   :  { %v3290_v54 = vmin.f32 %v6282_v0, 0.0  ;;  %v6290_v29 = vadd.f32 %v3246_v31, %v6269_v56  ;;  %vm3274_vm2 = vcmp.gt.f32.partialorder %v6282_v0, 0.0 }
 0xb42   :  { %v3309_v17 = vmul.f32 1.442695, %v3289_v33  ;;  %v3291_v37 = vmin.f32 %v6286_v3, 0.0  ;;  %vm3275_vm8 = vcmp.gt.f32.partialorder %v6286_v3, 0.0 }
 0xb43   :  { %v3311_v43 = vmul.f32 1.442695, %v3290_v54  ;;  %v3292_v22 = vmin.f32 %v6290_v29, 0.0  ;;  %vm3276_vm10 = vcmp.gt.f32.partialorder %v6290_v29, 0.0 }
 0xb44   :  { %4288 = vpow2.f32 %v3309_v17  ;;  %v3313_v16 = vmul.f32 1.442695, %v3291_v37 }
 0xb45   :  { %4290 = vpow2.f32 %v3311_v43  ;;  %v3315_v15 = vmul.f32 1.442695, %v3292_v22  ;;  %v3250_v10 = vpop.f32.mrb[72].mxu1 }
 0xb46   :  { %v4281_v6 = vpop.eup %4280  ;;  %4292 = vpow2.f32 %v3313_v16  ;;  %v6295_v61 = vadd.f32 %v3250_v10, %v6265_v45  ;;  %v3252_v24 = vpop.f32.mrb[73].mxu1 }
 0xb47   :  { %v4283_v8 = vpop.eup %4282  ;;  %v3642_v52 = vadd.f32 -1.0, %v4281_v6  ;;  %4294 = vpow2.f32 %v3315_v15  ;;  %v6298_v4 = vadd.f32 %v3252_v24, %v6269_v56  ;;  %v3254_v57 = vpop.f32.mrb[74].mxu1 }
 0xb48   :  { %v4285_v14 = vpop.eup %4284  ;;  %v3643_v50 = vadd.f32 -1.0, %v4283_v8  ;;  %v3293_v12 = vmin.f32 %v6295_v61, 0.0  ;;  %v6302_v53 = vadd.f32 %v3254_v57, %v6265_v45  ;;  %v3256_v46 = vpop.f32.mrb[75].mxu1  ;;  %vm3277_vm12 = vcmp.gt.f32.partialorder %v6295_v61, 0.0 }
 0xb49   :  { %v4287_v35 = vpop.eup %4286  ;;  %v3644_v7 = vadd.f32 -1.0, %v4285_v14  ;;  %v3294_v40 = vmin.f32 %v6298_v4, 0.0  ;;  %v3349_v34 = vsel %vm3269_vm11, %v3231_v55, %v3642_v52  ;;  %v6308_v11 = vadd.f32 %v3256_v46, %v6269_v56 }
 0xb4a   :  { %v3645_v59 = vadd.f32 -1.0, %v4287_v35  ;;  %v3317_v27 = vmul.f32 1.442695, %v3293_v12  ;;  %v3295_v25 = vmin.f32 %v6302_v53, 0.0  ;;  %v3350_v20 = vsel %vm3270_vm13, %v6273_v2, %v3643_v50 }
 0xb4b   :  { %v3351_v1 = vsel %vm3271_vm7, %v3235_v51, %v3644_v7  ;;  %v3319_v47 = vmul.f32 1.442695, %v3294_v40  ;;  %v3296_v62 = vmin.f32 %v6308_v11, 0.0  ;;  %vm3279_vm14 = vcmp.gt.f32.partialorder %v6302_v53, 0.0 }
 0xb4c   :  { %v3365_v48 = vpack.c.bf16 %v3351_v1, %v3349_v34  ;;  %v3352_v18 = vsel %vm3272_vm5, %v3237_v26, %v3645_v59  ;;  %4296 = vpow2.f32 %v3317_v27  ;;  %v3321_v41 = vmul.f32 1.442695, %v3295_v25 }
 0xb4d   :  { %v3366_v49 = vpack.c.bf16 %v3352_v18, %v3350_v20  ;;  %v3260_v21 = vpop.f32.mrb[76].mxu1  ;;  %4298 = vpow2.f32 %v3319_v47  ;;  %v3323_v63 = vmul.f32 1.442695, %v3296_v62  ;;  %vm3278_vm1 = vcmp.gt.f32.partialorder %v6298_v4, 0.0 }
 0xb4e   :  { %v4289_v23 = vpop.eup %4288  ;;  %v6313_v55 = vadd.f32 %v3260_v21, %v6265_v45  ;;  %v3262_v13 = vpop.f32.mrb[77].mxu1  ;;  %4300 = vpow2.f32 %v3321_v41  ;;  %vm3280_vm15 = vcmp.gt.f32.partialorder %v6308_v11, 0.0 }
 0xb4f   :  { %v4291_v38 = vpop.eup %4290  ;;  %v6317_v2 = vadd.f32 %v3262_v13, %v6269_v56  ;;  %v3264_v9 = vpop.f32.mrb[78].mxu1  ;;  %3672 = vmatprep.mubr.msk.bf16.mxu0 %vm3480_vm9, %v3366_v49  ;;  %v3646_v32 = vadd.f32 -1.0, %v4289_v23  ;;  %4302 = vpow2.f32 %v3323_v63 }
 0xb50   :  { %v4293_v51 = vpop.eup %4292  ;;  %v3647_v58 = vadd.f32 -1.0, %v4291_v38  ;;  %v3297_v26 = vmin.f32 %v6313_v55, 0.0  ;;  %v3266_v42 = vpop.f32.mrb[79].mxu1  ;;  %3530 = vmatmul.mubr.bf16.vlgmr.msra.gmra.mrb[32].mxu0 %v3365_v48  ;;  %v3265_v19 = vadd.f32 %v3264_v9, %v6265_v45  ;;  %vm3281_vm4 = vcmp.gt.f32.partialorder %v6313_v55, 0.0  ;;  %v3658_v48 = vld [vmem:[#allocation4] ss:$0 sm:$0xff] }
 0xb51   :  { %v4295_v60 = vpop.eup %4294  ;;  %v3648_v5 = vadd.f32 -1.0, %v4293_v51  ;;  %v3298_v30 = vmin.f32 %v6317_v2, 0.0  ;;  %v3267_v31 = vadd.f32 %v3266_v42, %v6269_v56  ;;  %v3353_v22 = vsel %vm3273_vm0, %v6279_v28, %v3646_v32 }
 0xb52   :  { %v3649_v36 = vadd.f32 -1.0, %v4295_v60  ;;  %v3325_v39 = vmul.f32 1.442695, %v3297_v26  ;;  %v3299_v33 = vmin.f32 %v3265_v19, 0.0  ;;  %v3354_v54 = vsel %vm3274_vm2, %v6282_v0, %v3647_v58 }
 0xb53   :  { %v3327_v44 = vmul.f32 1.442695, %v3298_v30  ;;  %v3355_v45 = vsel %vm3275_vm8, %v6286_v3, %v3648_v5  ;;  %v3300_v15 = vmin.f32 %v3267_v31, 0.0  ;;  %vm3283_vm6 = vcmp.gt.f32.partialorder %v3265_v19, 0.0 }
 0xb54   :  { %v3356_v17 = vsel %vm3276_vm10, %v6290_v29, %v3649_v36  ;;  %4304 = vpow2.f32 %v3325_v39  ;;  %v3329_v43 = vmul.f32 1.442695, %v3299_v33  ;;  %v3367_v10 = vpack.c.bf16 %v3355_v45, %v3353_v22 }
 0xb55   :  { %v3368_v37 = vpack.c.bf16 %v3356_v17, %v3354_v54  ;;  %4306 = vpow2.f32 %v3327_v44  ;;  %v3331_v6 = vmul.f32 1.442695, %v3300_v15  ;;  %vm3282_vm3 = vcmp.gt.f32.partialorder %v6317_v2, 0.0 }
 0xb56   :  { %v4297_v16 = vpop.eup %4296  ;;  %4308 = vpow2.f32 %v3329_v43  ;;  %vm3284_vm11 = vcmp.gt.f32.partialorder %v3267_v31, 0.0 }
 0xb57   :  { %3673 = vmatprep.mubr.msk.bf16.mxu0 %vm3480_vm9, %v3368_v37  ;;  %v4299_v56 = vpop.eup %4298  ;;  %v3650_v0 = vadd.f32 -1.0, %v4297_v16  ;;  %4310 = vpow2.f32 %v3331_v6 }
 0xb58   :  { %3538 = vmatmul.mubr.bf16.gmra.mrb[36].mxu0 %v3367_v10  ;;  %v4301_v29 = vpop.eup %4300  ;;  %v3651_v3 = vadd.f32 -1.0, %v4299_v56 }
 0xb59   :  { %v3652_v24 = vadd.f32 -1.0, %v4301_v29  ;;  %v4303_v28 = vpop.eup %4302  ;;  %v3357_v8 = vsel %vm3277_vm12, %v6295_v61, %v3650_v0 }
 0xb5a   :  { %v3653_v57 = vadd.f32 -1.0, %v4303_v28  ;;  %v3358_v12 = vsel %vm3278_vm1, %v6298_v4, %v3651_v3 }
 0xb5b   :  { %v3359_v52 = vsel %vm3279_vm14, %v6302_v53, %v3652_v24 }
 0xb5c   :  { %v3369_v14 = vpack.c.bf16 %v3359_v52, %v3357_v8  ;;  %v3360_v46 = vsel %vm3280_vm15, %v6308_v11, %v3653_v57 }
 0xb5d   :  { %v3370_v7 = vpack.c.bf16 %v3360_v46, %v3358_v12 }
 0xb5e   :  { %v4305_v50 = vpop.eup %4304 }
 0xb5f   :  { %v4307_v35 = vpop.eup %4306  ;;  %v3654_v40 = vadd.f32 -1.0, %v4305_v50  ;;  %3674 = vmatprep.mubr.msk.bf16.mxu0 %vm3480_vm9, %v3370_v7 }
 0xb60   :  { %v4309_v34 = vpop.eup %4308  ;;  %v3655_v61 = vadd.f32 -1.0, %v4307_v35  ;;  %3546 = vmatmul.mubr.bf16.gmra.mrb[40].mxu0 %v3369_v14 }
 0xb61   :  { %v3656_v59 = vadd.f32 -1.0, %v4309_v34  ;;  %v4311_v53 = vpop.eup %4310  ;;  %v3361_v27 = vsel %vm3281_vm4, %v6313_v55, %v3654_v40 }
 0xb62   :  { %v3657_v47 = vadd.f32 -1.0, %v4311_v53  ;;  %v3362_v25 = vsel %vm3282_vm3, %v6317_v2, %v3655_v61 }
 0xb63   :  { %v3363_v1 = vsel %vm3283_vm6, %v3265_v19, %v3656_v59 }
 0xb64   :  { %v3371_v4 = vpack.c.bf16 %v3363_v1, %v3361_v27  ;;  %v3364_v11 = vsel %vm3284_vm11, %v3267_v31, %v3657_v47 }
 0xb65   :  { %v3372_v20 = vpack.c.bf16 %v3364_v11, %v3362_v25 }
 0xb67   :  { %3675 = vmatprep.mubr.msk.bf16.mxu0 %vm3480_vm9, %v3372_v20 }
 0xb68   :  { %3554 = vmatmul.mubr.bf16.gmra.mrb[44].mxu0 %v3371_v4 }
 0xc23   :  { %v3531_v18 = vpop.f32.mrb[32].mxu0 }
 0xc24   :  { %v3532_v49 = vadd.f32 %v3658_v48, %v3531_v18  ;;  %v3533_v41 = vpop.f32.mrb[33].mxu0 }
 0xc25   :  { %v3534_v21 = vpop.f32.mrb[34].mxu0 }
 0xc26   :  { %3562 = vst [vmem:[%s6382_s8] sm:$0xff] %v3532_v49  ;;  %v3535_v23 = vadd.f32 %v3658_v48, %v3534_v21  ;;  %v3536_v62 = vpop.f32.mrb[35].mxu0 }
 0xc28   :  { %3563 = vst [vmem:[%s6382_s8 + $0x8] sm:$0xff] %v3535_v23 }
 0xc2b   :  { %v3539_v55 = vpop.f32.mrb[36].mxu0 }
 0xc2c   :  { %v3540_v13 = vadd.f32 %v3658_v48, %v3539_v55  ;;  %v3541_v38 = vpop.f32.mrb[37].mxu0 }
 0xc2d   :  { %v3542_v2 = vpop.f32.mrb[38].mxu0 }
 0xc2e   :  { %3564 = vst [vmem:[%s6382_s8 + $0x10] sm:$0xff] %v3540_v13  ;;  %v3543_v9 = vadd.f32 %v3658_v48, %v3542_v2  ;;  %v3544_v51 = vpop.f32.mrb[39].mxu0 }
 0xc30   :  { %3565 = vst [vmem:[%s6382_s8 + $0x18] sm:$0xff] %v3543_v9 }
 0xc33   :  { %v3547_v58 = vpop.f32.mrb[40].mxu0 }
 0xc34   :  { %v3548_v63 = vadd.f32 %v3658_v48, %v3547_v58  ;;  %v3549_v26 = vpop.f32.mrb[41].mxu0 }
 0xc35   :  { %v3550_v42 = vpop.f32.mrb[42].mxu0 }
 0xc36   :  { %3566 = vst [vmem:[%s6382_s8 + $0x20] sm:$0xff] %v3548_v63  ;;  %v3551_v60 = vadd.f32 %v3658_v48, %v3550_v42  ;;  %v3552_v32 = vpop.f32.mrb[43].mxu0 }
 0xc38   :  { %3567 = vst [vmem:[%s6382_s8 + $0x28] sm:$0xff] %v3551_v60 }
 0xc3b   :  { %v3555_v5 = vpop.f32.mrb[44].mxu0 }
 0xc3c   :  { %v3556_v30 = vadd.f32 %v3658_v48, %v3555_v5  ;;  %v3557_v19 = vpop.f32.mrb[45].mxu0 }
 0xc3d   :  { %v3558_v36 = vpop.f32.mrb[46].mxu0 }
 0xc3e   :  { %3568 = vst [vmem:[%s6382_s8 + $0x30] sm:$0xff] %v3556_v30  ;;  %v3559_v39 = vadd.f32 %v3658_v48, %v3558_v36  ;;  %v3560_v44 = vpop.f32.mrb[47].mxu0 }
 0xc40   :  { %3569 = vst [vmem:[%s6382_s8 + $0x38] sm:$0xff] %v3559_v39 }
 0xc41   :  { %3574 = vsyncpa [#allocation3], 1 }
 0xc42   :  { %3575 = vsyncpa [#allocation5], 1 }

</bundles_post_ra>
